<compile_context>
chip_gen: v7x
topology: tpu7x:2x2x1
jax: 0.10.0
libtpu: 0.0.40
codegen_flags: <defaults>
</compile_context>

<pallas_src>
import functools

import jax
import jax.numpy as jnp
from jax.experimental import pallas as pl
from jax.experimental.pallas import tpu as pltpu

LEAK = 0.2
BN_EPS = 0.8          # nn.BatchNorm1d(256, 0.8): 2nd positional arg is eps
HIDDEN = 256
OUT_PAD = 128         # final layer padded to a full lane group (true out_dim=2)
STATS_ROWS = 8        # sublane-aligned partial-stats tile (rows 0/1 used)
VMEM_LIMIT_BYTES = 48 << 20   # headroom below v7x's 64 MiB physical VMEM


def _leaky_relu(x):
    return jnp.maximum(x, LEAK * x)


def _bn_train(h, gamma, beta):
    """Training-mode BatchNorm over axis 0 (f32), single-pass variance."""
    s1 = jnp.mean(h, axis=0, keepdims=True)
    s2 = jnp.mean(h * h, axis=0, keepdims=True)
    var = jnp.maximum(s2 - s1 * s1, 0.0)                  # biased batch variance
    scale = gamma * jax.lax.rsqrt(var + BN_EPS)
    return h * scale + (beta - s1 * scale)


def _l12(x, w1, w2, b1, b2):
    """Linear1 + LeakyReLU + Linear2 (pre-BN), f32 accumulation."""
    f32 = jnp.float32
    h1 = _leaky_relu(jnp.dot(x, w1, preferred_element_type=f32) + b1)
    return jnp.dot(h1.astype(w2.dtype), w2, preferred_element_type=f32) + b2


# ---------------------------------------------------------------------------
# Path 1: fully fused single kernel (whole batch resident in VMEM).
# ---------------------------------------------------------------------------
def _fused_kernel(x_ref, w1_ref, w2_ref, w3_ref, w4_ref, vec_ref, b4_ref, o_ref):
    f32 = jnp.float32
    b1, b2 = vec_ref[0:1, :], vec_ref[1:2, :]
    g2, be2 = vec_ref[2:3, :], vec_ref[3:4, :]
    b3 = vec_ref[4:5, :]
    g3, be3 = vec_ref[5:6, :], vec_ref[6:7, :]

    h = _l12(x_ref[...], w1_ref[...], w2_ref[...], b1, b2)
    h = _leaky_relu(_bn_train(h, g2, be2))

    h = jnp.dot(h.astype(w3_ref.dtype), w3_ref[...], preferred_element_type=f32) + b3
    h = _leaky_relu(_bn_train(h, g3, be3))

    out = jnp.dot(h.astype(w4_ref.dtype), w4_ref[...], preferred_element_type=f32) + b4_ref[...]
    o_ref[...] = jnp.tanh(out).astype(o_ref.dtype)


# ---------------------------------------------------------------------------
# Path 2: batch-tiled, stats-only + recompute-from-x pipeline.
#         BN statistics remain whole-batch exact.
# ---------------------------------------------------------------------------
def _write_stats(stats_ref, h, *, tm, n_valid, need_mask):
    """Write per-tile sum / sum-of-squares (f32) over valid rows of h."""
    def _store(hv):
        s1 = jnp.sum(hv, axis=0, keepdims=True)
        s2 = jnp.sum(hv * hv, axis=0, keepdims=True)
        stats_ref[:, 0:1, :] = s1[None]
        stats_ref[:, 1:2, :] = s2[None]

    if need_mask:
        i = pl.program_id(0)
        last = pl.num_programs(0) - 1

        @pl.when(i == last)   # only the last tile contains padded rows
        def _():
            rows = i * tm + jax.lax.broadcasted_iota(jnp.int32, h.shape, 0)
            _store(jnp.where(rows < n_valid, h, 0.0))

        @pl.when(i != last)
        def _():
            _store(h)
    else:
        _store(h)


def _stats1_kernel(x_ref, w1_ref, w2_ref, vec_ref, stats_ref, *, tm, n_valid, need_mask):
    b1, b2 = vec_ref[0:1, :], vec_ref[1:2, :]
    h2p = _l12(x_ref[...], w1_ref[...], w2_ref[...], b1, b2)
    _write_stats(stats_ref, h2p, tm=tm, n_valid=n_valid, need_mask=need_mask)


def _stats2_kernel(x_ref, w1_ref, w2_ref, w3_ref, vec_ref, stats_ref, *,
                   tm, n_valid, need_mask):
    f32 = jnp.float32
    b1, b2 = vec_ref[0:1, :], vec_ref[1:2, :]
    sc2, sh2, b3 = vec_ref[2:3, :], vec_ref[3:4, :], vec_ref[4:5, :]
    h2p = _l12(x_ref[...], w1_ref[...], w2_ref[...], b1, b2)
    h2 = _leaky_relu(h2p * sc2 + sh2)                     # folded whole-batch BN2
    h3p = jnp.dot(h2.astype(w3_ref.dtype), w3_ref[...], preferred_element_type=f32) + b3
    _write_stats(stats_ref, h3p, tm=tm, n_valid=n_valid, need_mask=need_mask)


def _output_kernel(x_ref, w1_ref, w2_ref, w3_ref, w4_ref, vec_ref, b4_ref, o_ref):
    f32 = jnp.float32
    b1, b2 = vec_ref[0:1, :], vec_ref[1:2, :]
    sc2, sh2, b3 = vec_ref[2:3, :], vec_ref[3:4, :], vec_ref[4:5, :]
    sc3, sh3 = vec_ref[5:6, :], vec_ref[6:7, :]
    h2p = _l12(x_ref[...], w1_ref[...], w2_ref[...], b1, b2)
    h2 = _leaky_relu(h2p * sc2 + sh2)
    h3p = jnp.dot(h2.astype(w3_ref.dtype), w3_ref[...], preferred_element_type=f32) + b3
    h3 = _leaky_relu(h3p * sc3 + sh3)
    out = jnp.dot(h3.astype(w4_ref.dtype), w4_ref[...], preferred_element_type=f32) + b4_ref[...]
    o_ref[...] = jnp.tanh(out).astype(o_ref.dtype)


# ---------------------------------------------------------------------------
# Wrappers
# ---------------------------------------------------------------------------
def _pad_final_layer(params):
    od = params["w4"].shape[1]
    w4p = jnp.pad(params["w4"], ((0, 0), (0, OUT_PAD - od)))
    b4p = jnp.pad(params["b4"], ((0, 0), (0, OUT_PAD - od)))
    return w4p, b4p, od


def _bn_affine_from_stats(stats, n, gamma, beta):
    s1 = jnp.sum(stats[:, 0, :], axis=0)
    s2 = jnp.sum(stats[:, 1, :], axis=0)
    mu = s1 / n
    var = jnp.maximum(s2 / n - mu * mu, 0.0)
    scale = gamma[0] * jax.lax.rsqrt(var + BN_EPS)
    shift = beta[0] - mu * scale
    return scale, shift


def _fused_forward(x, params, compute_dtype):
    n = x.shape[0]
    w4p, b4p, od = _pad_final_layer(params)
    vecs = (jnp.zeros((STATS_ROWS, HIDDEN), jnp.float32)
            .at[0].set(params["b1"][0]).at[1].set(params["b2"][0])
            .at[2].set(params["g2"][0]).at[3].set(params["be2"][0])
            .at[4].set(params["b3"][0]).at[5].set(params["g3"][0])
            .at[6].set(params["be3"][0]))
    cd = compute_dtype
    args = (x.astype(cd), params["w1"].astype(cd), params["w2"].astype(cd),
            params["w3"].astype(cd), w4p.astype(cd), vecs, b4p)
    vmem = pl.BlockSpec(memory_space=pltpu.MemorySpace.VMEM)
    out = pl.pallas_call(
        _fused_kernel,
        out_shape=jax.ShapeDtypeStruct((n, OUT_PAD), cd),
        in_specs=[vmem] * len(args),
        out_specs=vmem,
        compiler_params=pltpu.CompilerParams(vmem_limit_bytes=VMEM_LIMIT_BYTES),
    )(*args)
    return out[:, :od].astype(jnp.float32)


def _tiled_forward(x, params, compute_dtype, tm):
    n, zd = x.shape
    cd = compute_dtype
    num_tiles = pl.cdiv(n, tm)
    n_pad = num_tiles * tm
    need_mask = n_pad != n
    if need_mask:
        x = jnp.pad(x, ((0, n_pad - n), (0, 0)))

    w4p, b4p, od = _pad_final_layer(params)
    x = x.astype(cd)
    w1 = params["w1"].astype(cd)
    w2 = params["w2"].astype(cd)
    w3 = params["w3"].astype(cd)
    w4p = w4p.astype(cd)

    cparams = pltpu.CompilerParams(dimension_semantics=("parallel",),
                                   vmem_limit_bytes=VMEM_LIMIT_BYTES)
    row_in = pl.BlockSpec((tm, zd), lambda i: (i, 0))
    row_o = pl.BlockSpec((tm, OUT_PAD), lambda i: (i, 0))
    stats_spec = pl.BlockSpec((1, STATS_ROWS, HIDDEN), lambda i: (i, 0, 0))
    stats_shape = jax.ShapeDtypeStruct((num_tiles, STATS_ROWS, HIDDEN), jnp.float32)

    def full(shape):
        return pl.BlockSpec(shape, lambda i: (0,) * len(shape))

    # ---- Pass A: L1 + L2 -> BN2 partial stats (stats-only, no HBM intermediates)
    vec_a = (jnp.zeros((STATS_ROWS, HIDDEN), jnp.float32)
             .at[0].set(params["b1"][0]).at[1].set(params["b2"][0]))
    st1 = pl.pallas_call(
        functools.partial(_stats1_kernel, tm=tm, n_valid=n, need_mask=need_mask),
        grid=(num_tiles,),
        in_specs=[row_in, full((zd, HIDDEN)), full((HIDDEN, HIDDEN)),
                  full((STATS_ROWS, HIDDEN))],
        out_specs=stats_spec,
        out_shape=stats_shape,
        compiler_params=cparams,
    )(x, w1, w2, vec_a)

    scale2, shift2 = _bn_affine_from_stats(st1, n, params["g2"], params["be2"])

    # ---- Pass B: L1 + L2 + folded BN2 + L3 -> BN3 partial stats (stats-only)
    vec_b = (jnp.zeros((STATS_ROWS, HIDDEN), jnp.float32)
             .at[0].set(params["b1"][0]).at[1].set(params["b2"][0])
             .at[2].set(scale2).at[3].set(shift2).at[4].set(params["b3"][0]))
    st2 = pl.pallas_call(
        functools.partial(_stats2_kernel, tm=tm, n_valid=n, need_mask=need_mask),
        grid=(num_tiles,),
        in_specs=[row_in, full((zd, HIDDEN)), full((HIDDEN, HIDDEN)),
                  full((HIDDEN, HIDDEN)), full((STATS_ROWS, HIDDEN))],
        out_specs=stats_spec,
        out_shape=stats_shape,
        compiler_params=cparams,
    )(x, w1, w2, w3, vec_b)

    scale3, shift3 = _bn_affine_from_stats(st2, n, params["g3"], params["be3"])

    # ---- Pass C: full forward with folded BN2/BN3 -> lane-dense tanh output
    vec_c = vec_b.at[5].set(scale3).at[6].set(shift3)
    out = pl.pallas_call(
        _output_kernel,
        grid=(num_tiles,),
        in_specs=[row_in, full((zd, HIDDEN)), full((HIDDEN, HIDDEN)),
                  full((HIDDEN, HIDDEN)), full((HIDDEN, OUT_PAD)),
                  full((STATS_ROWS, HIDDEN)), full((1, OUT_PAD))],
        out_specs=row_o,
        out_shape=jax.ShapeDtypeStruct((n_pad, OUT_PAD), cd),
        compiler_params=cparams,
    )(x, w1, w2, w3, w4p, vec_c, b4p)

    return out[:n, :od].astype(jnp.float32)


def generator_forward(x, params, *, compute_dtype=jnp.bfloat16,
                      fused_max_rows=2048, tile_rows=1024):
    """Generator forward (PyTorch training-mode BatchNorm semantics, whole-batch
    exact statistics in both paths).

    Tuning:
      * fused_max_rows: batches up to this size use the fully fused
        whole-batch-in-VMEM kernel. Can be raised to 4096-8192 on v5e/v6e
        (128 MiB VMEM); keep <= ~2048-4096 on v7x (64 MiB VMEM). The tiled
        path is gridded "parallel", so on v7x it shards across both TCs.
      * tile_rows: row-tile for the tiled path; keep a multiple of 256.
    """
    if x.shape[0] <= fused_max_rows:
        return _fused_forward(x, params, compute_dtype)
    return _tiled_forward(x, params, compute_dtype, tile_rows)


# ---------------------------------------------------------------------------
# Params / reference
# ---------------------------------------------------------------------------
def init_params(key, z_dim, hidden=HIDDEN, out_dim=2):
    ks = jax.random.split(key, 8)

    def lin(kw, kb, fan_in, fan_out):
        bound = 1.0 / jnp.sqrt(fan_in)
        w = jax.random.uniform(kw, (fan_in, fan_out), jnp.float32, -bound, bound)
        b = jax.random.uniform(kb, (1, fan_out), jnp.float32, -bound, bound)
        return w, b

    w1, b1 = lin(ks[0], ks[1], z_dim, hidden)
    w2, b2 = lin(ks[2], ks[3], hidden, hidden)
    w3, b3 = lin(ks[4], ks[5], hidden, hidden)
    w4, b4 = lin(ks[6], ks[7], hidden, out_dim)
    return {
        "w1": w1, "b1": b1,
        "w2": w2, "b2": b2,
        "g2": jnp.ones((1, hidden), jnp.float32), "be2": jnp.zeros((1, hidden), jnp.float32),
        "w3": w3, "b3": b3,
        "g3": jnp.ones((1, hidden), jnp.float32), "be3": jnp.zeros((1, hidden), jnp.float32),
        "w4": w4, "b4": b4,
    }


def reference_forward(x, p):
    """Pure-JAX f32 reference (PyTorch training-mode BatchNorm semantics)."""
    def lrelu(v):
        return jnp.where(v > 0, v, LEAK * v)
    h = lrelu(x @ p["w1"] + p["b1"])
    h = h @ p["w2"] + p["b2"]
    mu = h.mean(0, keepdims=True)
    var = ((h - mu) ** 2).mean(0, keepdims=True)
    h = lrelu((h - mu) / jnp.sqrt(var + BN_EPS) * p["g2"] + p["be2"])
    h = h @ p["w3"] + p["b3"]
    mu = h.mean(0, keepdims=True)
    var = ((h - mu) ** 2).mean(0, keepdims=True)
    h = lrelu((h - mu) / jnp.sqrt(var + BN_EPS) * p["g3"] + p["be3"])
    return jnp.tanh(h @ p["w4"] + p["b4"])


# TODO(synk): BatchNorm running-stat (running_mean/var) side-effect updates are
# not implemented; they do not affect the training-mode forward output.

if __name__ == "__main__":
    key = jax.random.PRNGKey(0)
    k_x, k_p = jax.random.split(key)

    N, Z_DIM = 256, 64
    x = jax.random.normal(k_x, (N, Z_DIM), jnp.float32)
    params = init_params(k_p, Z_DIM)
    ref = reference_forward(x, params)

    fwd = jax.jit(generator_forward,
                  static_argnames=("compute_dtype", "fused_max_rows", "tile_rows"))

    # 1) Fused kernel, f32 operands: exact-semantics check.
    out_f32 = jax.block_until_ready(fwd(x, params, compute_dtype=jnp.float32))
    assert out_f32.shape == (N, 2)
    assert jnp.allclose(out_f32, ref, atol=1e-4, rtol=1e-4), "fused f32 mismatch"

    # 2) Fused kernel, bf16 operands (f32 accumulation / f32 BN): perf path.
    out_bf16 = jax.block_until_ready(fwd(x, params, compute_dtype=jnp.bfloat16))
    assert out_bf16.shape == (N, 2)
    assert float(jnp.max(jnp.abs(out_bf16 - ref))) < 5e-2, "fused bf16 mismatch"

    # 3) Tiled recompute-from-x path with padded last tile (masked stats).
    out_t1 = jax.block_until_ready(
        fwd(x, params, compute_dtype=jnp.float32, fused_max_rows=0, tile_rows=96))
    assert out_t1.shape == (N, 2)
    assert jnp.allclose(out_t1, ref, atol=1e-4, rtol=1e-4), "tiled (masked) mismatch"

    # 4) Tiled path, exact tile division (mask elided at trace time).
    out_t2 = jax.block_until_ready(
        fwd(x, params, compute_dtype=jnp.float32, fused_max_rows=0, tile_rows=128))
    assert out_t2.shape == (N, 2)
    assert jnp.allclose(out_t2, ref, atol=1e-4, rtol=1e-4), "tiled (unmasked) mismatch"

    print("KERNEL_OK")
</pallas_src>

<mosaic_0001>
module attributes {stable_mosaic.version = 11 : i64} {
  func.func @_fused_kernel(%arg0: memref<256x64xf32, #tpu.memory_space<vmem>>, %arg1: memref<64x256xf32, #tpu.memory_space<vmem>>, %arg2: memref<256x256xf32, #tpu.memory_space<vmem>>, %arg3: memref<256x256xf32, #tpu.memory_space<vmem>>, %arg4: memref<256x128xf32, #tpu.memory_space<vmem>>, %arg5: memref<8x256xf32, #tpu.memory_space<vmem>>, %arg6: memref<1x128xf32, #tpu.memory_space<vmem>>, %arg7: memref<256x128xf32, #tpu.memory_space<vmem>>) attributes {dimension_semantics = [], scalar_prefetch = 0 : i64, scratch_operands = 0 : i64, tpu.core_type = #tpu.core_type<tc>} {
    %c0 = arith.constant 0 : index
    %c0_0 = arith.constant 0 : index
    %0 = vector.load %arg5[%c0, %c0_0] : memref<8x256xf32, #tpu.memory_space<vmem>>, vector<1x256xf32>
    %c1 = arith.constant 1 : index
    %c0_1 = arith.constant 0 : index
    %1 = vector.load %arg5[%c1, %c0_1] : memref<8x256xf32, #tpu.memory_space<vmem>>, vector<1x256xf32>
    %c2 = arith.constant 2 : index
    %c0_2 = arith.constant 0 : index
    %2 = vector.load %arg5[%c2, %c0_2] : memref<8x256xf32, #tpu.memory_space<vmem>>, vector<1x256xf32>
    %c3 = arith.constant 3 : index
    %c0_3 = arith.constant 0 : index
    %3 = vector.load %arg5[%c3, %c0_3] : memref<8x256xf32, #tpu.memory_space<vmem>>, vector<1x256xf32>
    %c4 = arith.constant 4 : index
    %c0_4 = arith.constant 0 : index
    %4 = vector.load %arg5[%c4, %c0_4] : memref<8x256xf32, #tpu.memory_space<vmem>>, vector<1x256xf32>
    %c5 = arith.constant 5 : index
    %c0_5 = arith.constant 0 : index
    %5 = vector.load %arg5[%c5, %c0_5] : memref<8x256xf32, #tpu.memory_space<vmem>>, vector<1x256xf32>
    %c6 = arith.constant 6 : index
    %c0_6 = arith.constant 0 : index
    %6 = vector.load %arg5[%c6, %c0_6] : memref<8x256xf32, #tpu.memory_space<vmem>>, vector<1x256xf32>
    %c0_7 = arith.constant 0 : index
    %c0_8 = arith.constant 0 : index
    %7 = vector.load %arg0[%c0_7, %c0_8] : memref<256x64xf32, #tpu.memory_space<vmem>>, vector<256x64xf32>
    %c0_9 = arith.constant 0 : index
    %c0_10 = arith.constant 0 : index
    %8 = vector.load %arg1[%c0_9, %c0_10] : memref<64x256xf32, #tpu.memory_space<vmem>>, vector<64x256xf32>
    %c0_11 = arith.constant 0 : index
    %c0_12 = arith.constant 0 : index
    %9 = vector.load %arg2[%c0_11, %c0_12] : memref<256x256xf32, #tpu.memory_space<vmem>>, vector<256x256xf32>
    %cst = arith.constant dense<0.000000e+00> : vector<256x256xf32>
    %10 = tpu.matmul %7, %8, %cst {dimension_numbers = #tpu.dot_dimension_numbers<[1], [0], [0], [1], [0, 0, 1, 1], [], []>} : vector<256x64xf32>, vector<64x256xf32>, vector<256x256xf32> -> vector<256x256xf32>
    %11 = vector.broadcast %0 : vector<1x256xf32> to vector<256x256xf32>
    %12 = arith.addf %10, %11 : vector<256x256xf32>
    %cst_13 = arith.constant 2.000000e-01 : f32
    %13 = vector.broadcast %cst_13 : f32 to vector<256x256xf32>
    %14 = arith.mulf %13, %12 : vector<256x256xf32>
    %15 = arith.maximumf %12, %14 : vector<256x256xf32>
    %cst_14 = arith.constant dense<0.000000e+00> : vector<256x256xf32>
    %16 = tpu.matmul %15, %9, %cst_14 {dimension_numbers = #tpu.dot_dimension_numbers<[1], [0], [0], [1], [0, 0, 1, 1], [], []>} : vector<256x256xf32>, vector<256x256xf32>, vector<256x256xf32> -> vector<256x256xf32>
    %17 = vector.broadcast %1 : vector<1x256xf32> to vector<256x256xf32>
    %18 = arith.addf %16, %17 : vector<256x256xf32>
    %cst_15 = arith.constant dense<0.000000e+00> : vector<256xf32>
    %19 = vector.multi_reduction <add>, %18, %cst_15 [0] : vector<256x256xf32> to vector<256xf32>
    %20 = vector.shape_cast %19 : vector<256xf32> to vector<1x256xf32>
    %cst_16 = arith.constant 2.560000e+02 : f32
    %21 = vector.broadcast %cst_16 : f32 to vector<1x256xf32>
    %22 = arith.divf %20, %21 : vector<1x256xf32>
    %23 = arith.mulf %18, %18 : vector<256x256xf32>
    %cst_17 = arith.constant dense<0.000000e+00> : vector<256xf32>
    %24 = vector.multi_reduction <add>, %23, %cst_17 [0] : vector<256x256xf32> to vector<256xf32>
    %25 = vector.shape_cast %24 : vector<256xf32> to vector<1x256xf32>
    %cst_18 = arith.constant 2.560000e+02 : f32
    %26 = vector.broadcast %cst_18 : f32 to vector<1x256xf32>
    %27 = arith.divf %25, %26 : vector<1x256xf32>
    %28 = arith.mulf %22, %22 : vector<1x256xf32>
    %29 = arith.subf %27, %28 : vector<1x256xf32>
    %cst_19 = arith.constant 0.000000e+00 : f32
    %30 = vector.broadcast %cst_19 : f32 to vector<1x256xf32>
    %31 = arith.maximumf %29, %30 : vector<1x256xf32>
    %cst_20 = arith.constant 8.000000e-01 : f32
    %32 = vector.broadcast %cst_20 : f32 to vector<1x256xf32>
    %33 = arith.addf %31, %32 : vector<1x256xf32>
    %34 = math.rsqrt %33 : vector<1x256xf32>
    %35 = arith.mulf %2, %34 : vector<1x256xf32>
    %36 = vector.broadcast %35 : vector<1x256xf32> to vector<256x256xf32>
    %37 = arith.mulf %18, %36 : vector<256x256xf32>
    %38 = arith.mulf %22, %35 : vector<1x256xf32>
    %39 = arith.subf %3, %38 : vector<1x256xf32>
    %40 = vector.broadcast %39 : vector<1x256xf32> to vector<256x256xf32>
    %41 = arith.addf %37, %40 : vector<256x256xf32>
    %cst_21 = arith.constant 2.000000e-01 : f32
    %42 = vector.broadcast %cst_21 : f32 to vector<256x256xf32>
    %43 = arith.mulf %42, %41 : vector<256x256xf32>
    %44 = arith.maximumf %41, %43 : vector<256x256xf32>
    %c0_22 = arith.constant 0 : index
    %c0_23 = arith.constant 0 : index
    %45 = vector.load %arg3[%c0_22, %c0_23] : memref<256x256xf32, #tpu.memory_space<vmem>>, vector<256x256xf32>
    %cst_24 = arith.constant dense<0.000000e+00> : vector<256x256xf32>
    %46 = tpu.matmul %44, %45, %cst_24 {dimension_numbers = #tpu.dot_dimension_numbers<[1], [0], [0], [1], [0, 0, 1, 1], [], []>} : vector<256x256xf32>, vector<256x256xf32>, vector<256x256xf32> -> vector<256x256xf32>
    %47 = vector.broadcast %4 : vector<1x256xf32> to vector<256x256xf32>
    %48 = arith.addf %46, %47 : vector<256x256xf32>
    %cst_25 = arith.constant dense<0.000000e+00> : vector<256xf32>
    %49 = vector.multi_reduction <add>, %48, %cst_25 [0] : vector<256x256xf32> to vector<256xf32>
    %50 = vector.shape_cast %49 : vector<256xf32> to vector<1x256xf32>
    %cst_26 = arith.constant 2.560000e+02 : f32
    %51 = vector.broadcast %cst_26 : f32 to vector<1x256xf32>
    %52 = arith.divf %50, %51 : vector<1x256xf32>
    %53 = arith.mulf %48, %48 : vector<256x256xf32>
    %cst_27 = arith.constant dense<0.000000e+00> : vector<256xf32>
    %54 = vector.multi_reduction <add>, %53, %cst_27 [0] : vector<256x256xf32> to vector<256xf32>
    %55 = vector.shape_cast %54 : vector<256xf32> to vector<1x256xf32>
    %cst_28 = arith.constant 2.560000e+02 : f32
    %56 = vector.broadcast %cst_28 : f32 to vector<1x256xf32>
    %57 = arith.divf %55, %56 : vector<1x256xf32>
    %58 = arith.mulf %52, %52 : vector<1x256xf32>
    %59 = arith.subf %57, %58 : vector<1x256xf32>
    %cst_29 = arith.constant 0.000000e+00 : f32
    %60 = vector.broadcast %cst_29 : f32 to vector<1x256xf32>
    %61 = arith.maximumf %59, %60 : vector<1x256xf32>
    %cst_30 = arith.constant 8.000000e-01 : f32
    %62 = vector.broadcast %cst_30 : f32 to vector<1x256xf32>
    %63 = arith.addf %61, %62 : vector<1x256xf32>
    %64 = math.rsqrt %63 : vector<1x256xf32>
    %65 = arith.mulf %5, %64 : vector<1x256xf32>
    %66 = vector.broadcast %65 : vector<1x256xf32> to vector<256x256xf32>
    %67 = arith.mulf %48, %66 : vector<256x256xf32>
    %68 = arith.mulf %52, %65 : vector<1x256xf32>
    %69 = arith.subf %6, %68 : vector<1x256xf32>
    %70 = vector.broadcast %69 : vector<1x256xf32> to vector<256x256xf32>
    %71 = arith.addf %67, %70 : vector<256x256xf32>
    %cst_31 = arith.constant 2.000000e-01 : f32
    %72 = vector.broadcast %cst_31 : f32 to vector<256x256xf32>
    %73 = arith.mulf %72, %71 : vector<256x256xf32>
    %74 = arith.maximumf %71, %73 : vector<256x256xf32>
    %c0_32 = arith.constant 0 : index
    %c0_33 = arith.constant 0 : index
    %75 = vector.load %arg4[%c0_32, %c0_33] : memref<256x128xf32, #tpu.memory_space<vmem>>, vector<256x128xf32>
    %cst_34 = arith.constant dense<0.000000e+00> : vector<256x128xf32>
    %76 = tpu.matmul %74, %75, %cst_34 {dimension_numbers = #tpu.dot_dimension_numbers<[1], [0], [0], [1], [0, 0, 1, 1], [], []>} : vector<256x256xf32>, vector<256x128xf32>, vector<256x128xf32> -> vector<256x128xf32>
    %c0_35 = arith.constant 0 : index
    %c0_36 = arith.constant 0 : index
    %77 = vector.load %arg6[%c0_35, %c0_36] : memref<1x128xf32, #tpu.memory_space<vmem>>, vector<1x128xf32>
    %78 = vector.broadcast %77 : vector<1x128xf32> to vector<256x128xf32>
    %79 = arith.addf %76, %78 : vector<256x128xf32>
    %80 = math.tanh %79 : vector<256x128xf32>
    %c0_37 = arith.constant 0 : index
    %c0_38 = arith.constant 0 : index
    %81 = vector.load %arg7[%c0_37, %c0_38] : memref<256x128xf32, #tpu.memory_space<vmem>>, vector<256x128xf32>
    tpu.vector_store %arg7[%c0_37, %c0_38], %80 {strides = array<i32>} : memref<256x128xf32, #tpu.memory_space<vmem>>, vector<256x128xf32>,
    return
  }
}

</mosaic_0001>

<bundles_post_ra>
// kernel: generator_forward.1
= control target key start
LH: loop header
LB: loop body
LE: loop exit
PB: predicated region body
PF: predicated region fallthrough
CT: control target
= control target key end

     0   :  { %v3003_v3 = vmov 0.0   ;;  %vm162_vm0 = vcmask 523264   ;;  %s5849_s1 = inlined_call_operand.vmem [shape: f32[64,256], index: 1, kind: input, shape index: {}]   ;;  %s5850_s0 = inlined_call_operand.vmem [shape: f32[256,64], index: 0, kind: input, shape index: {}]   ;;  %s5851_s2 = inlined_call_operand.vmem [shape: f32[256,256], index: 2, kind: input, shape index: {}]   ;;  %s5852_s5 = inlined_call_operand.vmem [shape: f32[8,256], index: 5, kind: input, shape index: {}]   ;;  %s5853_s3 = inlined_call_operand.vmem [shape: f32[256,256], index: 3, kind: input, shape index: {}]   ;;  %s5854_s4 = inlined_call_operand.vmem [shape: f32[256,128], index: 4, kind: input, shape index: {}]   ;;  %s5855_s6 = inlined_call_operand.vmem [shape: f32[1,128], index: 6, kind: input, shape index: {}]   ;;  %s5856_s7 = inlined_call_operand.vmem [shape: f32[256,128], index: 7, kind: output, shape index: {}]  }
   0x1   :  { %v72_v0 = vld [vmem:[%s5849_s1 + $0x8] sm:$0xff]  ;;  %v74_v1 = vld [vmem:[%s5849_s1 + $0x18] sm:$0xff]  ;;  %v71_v2 = vld [vmem:[%s5849_s1] sm:$0xff]  ;;  %323 = vmatprep.mubr.f32.mxu0 %v3003_v3 }
   0x2   :  { %v2704_v4 = vpack.c.bf16 %v74_v1, %v72_v0  ;;  %v73_v5 = vld [vmem:[%s5849_s1 + $0x10] sm:$0xff]  ;;  %v76_v6 = vld [vmem:[%s5849_s1 + $0x28] sm:$0xff]  ;;  %v78_v7 = vld [vmem:[%s5849_s1 + $0x38] sm:$0xff] }
   0x3   :  { %v2706_v8 = vpack.c.bf16 %v73_v5, %v71_v2  ;;  %v2708_v9 = vpack.c.bf16 %v78_v7, %v76_v6  ;;  %v75_v10 = vld [vmem:[%s5849_s1 + $0x20] sm:$0xff]  ;;  %v77_v11 = vld [vmem:[%s5849_s1 + $0x30] sm:$0xff]  ;;  %v80_v12 = vld [vmem:[%s5849_s1 + $0x48] sm:$0xff] }
   0x4   :  { %2705 = vmatprep.subr.bf16.mxu0 %v2704_v4  ;;  %v82_v13 = vld [vmem:[%s5849_s1 + $0x58] sm:$0xff]  ;;  %v2710_v14 = vpack.c.bf16 %v77_v11, %v75_v10  ;;  %v79_v16 = vld [vmem:[%s5849_s1 + $0x40] sm:$0xff]  ;;  %v81_v17 = vld [vmem:[%s5849_s1 + $0x50] sm:$0xff] }
   0x5   :  { %2707 = vmatpush1.bf16.msra.mxu0 %v2706_v8  ;;  %v2712_v15 = vpack.c.bf16 %v82_v13, %v80_v12  ;;  %v84_v18 = vld [vmem:[%s5849_s1 + $0x68] sm:$0xff]  ;;  %v86_v19 = vld [vmem:[%s5849_s1 + $0x78] sm:$0xff]  ;;  %v2714_v20 = vpack.c.bf16 %v81_v17, %v79_v16  ;;  %v83_v22 = vld [vmem:[%s5849_s1 + $0x60] sm:$0xff] }
   0x6   :  { %2709 = vmatprep.subr.bf16.mxu0 %v2708_v9  ;;  %v2716_v21 = vpack.c.bf16 %v86_v19, %v84_v18  ;;  %v85_v23 = vld [vmem:[%s5849_s1 + $0x70] sm:$0xff]  ;;  %v39_v25 = vld [vmem:[%s5850_s0] sm:$0xff]  ;;  %v88_v26 = vld [vmem:[%s5851_s2 + $0x8] sm:$0xff] }
   0x7   :  { %v2718_v24 = vpack.c.bf16 %v85_v23, %v83_v22  ;;  %v90_v27 = vld [vmem:[%s5851_s2 + $0x18] sm:$0xff]  ;;  %v87_v28 = vld [vmem:[%s5851_s2] sm:$0xff]  ;;  %v89_v30 = vld [vmem:[%s5851_s2 + $0x10] sm:$0xff] }
   0x8   :  { %v2720_v29 = vpack.c.bf16 %v90_v27, %v88_v26  ;;  %v92_v31 = vld [vmem:[%s5851_s2 + $0x28] sm:$0xff]  ;;  %v94_v32 = vld [vmem:[%s5851_s2 + $0x38] sm:$0xff]  ;;  %v2722_v33 = vpack.c.bf16 %v89_v30, %v87_v28  ;;  %v91_v35 = vld [vmem:[%s5851_s2 + $0x20] sm:$0xff] }
   0x9   :  { %2711 = vmatpush1.bf16.msra.mxu0 %v2710_v14  ;;  %v2724_v34 = vpack.c.bf16 %v94_v32, %v92_v31  ;;  %v93_v36 = vld [vmem:[%s5851_s2 + $0x30] sm:$0xff]  ;;  %v96_v37 = vld [vmem:[%s5851_s2 + $0x48] sm:$0xff]  ;;  %v98_v38 = vld [vmem:[%s5851_s2 + $0x58] sm:$0xff] }
   0xa   :  { %2713 = vmatprep.subr.bf16.mxu0 %v2712_v15  ;;  %2721 = vmatprep.subr.bf16.mxu1 %v2720_v29  ;;  %v40_v39 = vld [vmem:[%s5850_s0 + $0x8] sm:$0xff]  ;;  %v2726_v40 = vpack.c.bf16 %v93_v36, %v91_v35  ;;  %v2728_v41 = vpack.c.bf16 %v98_v38, %v96_v37  ;;  %v95_v42 = vld [vmem:[%s5851_s2 + $0x40] sm:$0xff]  ;;  %v97_v43 = vld [vmem:[%s5851_s2 + $0x50] sm:$0xff] }
   0xb   :  { %2723 = vmatpush1.bf16.msra.mxu1 %v2722_v33  ;;  %v100_v44 = vld [vmem:[%s5851_s2 + $0x68] sm:$0xff]  ;;  %v102_v45 = vld [vmem:[%s5851_s2 + $0x78] sm:$0xff]  ;;  %v41_v46 = vld [vmem:[%s5850_s0 + $0x10] sm:$0xff]  ;;  %v2730_v47 = vpack.c.bf16 %v97_v43, %v95_v42 }
   0xc   :  { %2725 = vmatprep.subr.bf16.mxu1 %v2724_v34  ;;  %v2732_v48 = vpack.c.bf16 %v102_v45, %v100_v44  ;;  %v99_v49 = vld [vmem:[%s5851_s2 + $0x60] sm:$0xff]  ;;  %v101_v50 = vld [vmem:[%s5851_s2 + $0x70] sm:$0xff]  ;;  %v104_v51 = vld [vmem:[%s5851_s2 + $0x88] sm:$0xff] }
   0xd   :  { %2715 = vmatpush1.bf16.msra.mxu0 %v2714_v20  ;;  %v106_v52 = vld [vmem:[%s5851_s2 + $0x98] sm:$0xff]  ;;  %v2734_v54 = vpack.c.bf16 %v101_v50, %v99_v49  ;;  %v103_v56 = vld [vmem:[%s5851_s2 + $0x80] sm:$0xff]  ;;  %v105_v57 = vld [vmem:[%s5851_s2 + $0x90] sm:$0xff] }
   0xe   :  { %2717 = vmatprep.subr.bf16.mxu0 %v2716_v21  ;;  %v42_v53 = vld [vmem:[%s5850_s0 + $0x18] sm:$0xff]  ;;  %v2736_v55 = vpack.c.bf16 %v106_v52, %v104_v51  ;;  %v108_v58 = vld [vmem:[%s5851_s2 + $0xa8] sm:$0xff]  ;;  %v43_v60 = vld [vmem:[%s5850_s0 + $0x20] sm:$0xff]  ;;  %v2738_v61 = vpack.c.bf16 %v105_v57, %v103_v56 }
   0xf   :  { %2727 = vmatpush1.bf16.msra.mxu1 %v2726_v40  ;;  %v110_v59 = vld [vmem:[%s5851_s2 + $0xb8] sm:$0xff]  ;;  %v107_v63 = vld [vmem:[%s5851_s2 + $0xa0] sm:$0xff]  ;;  %v109_v0 = vld [vmem:[%s5851_s2 + $0xb0] sm:$0xff] }
  0x10   :  { %2729 = vmatprep.subr.bf16.mxu1 %v2728_v41  ;;  %v2740_v62 = vpack.c.bf16 %v110_v59, %v108_v58  ;;  %v112_v1 = vld [vmem:[%s5851_s2 + $0xc8] sm:$0xff]  ;;  %v114_v2 = vld [vmem:[%s5851_s2 + $0xd8] sm:$0xff]  ;;  %v2742_v5 = vpack.c.bf16 %v109_v0, %v107_v63  ;;  %v111_v7 = vld [vmem:[%s5851_s2 + $0xc0] sm:$0xff] }
  0x11   :  { %2719 = vmatpush1.bf16.msra.mxu0 %v2718_v24  ;;  %v44_v4 = vld [vmem:[%s5850_s0 + $0x28] sm:$0xff]  ;;  %v2744_v6 = vpack.c.bf16 %v114_v2, %v112_v1  ;;  %v113_v8 = vld [vmem:[%s5851_s2 + $0xd0] sm:$0xff]  ;;  %v118_v10 = vld [vmem:[%s5851_s2 + $0xf8] sm:$0xff] }
  0x12   :  { %v116_v9 = vld [vmem:[%s5851_s2 + $0xe8] sm:$0xff]  ;;  %v45_v11 = vld [vmem:[%s5850_s0 + $0x30] sm:$0xff]  ;;  %v2746_v12 = vpack.c.bf16 %v113_v8, %v111_v7  ;;  %v115_v14 = vld [vmem:[%s5851_s2 + $0xe0] sm:$0xff] }
  0x13   :  { %2731 = vmatpush1.bf16.msra.mxu1 %v2730_v47  ;;  %v2748_v13 = vpack.c.bf16 %v118_v10, %v116_v9  ;;  %v117_v15 = vld [vmem:[%s5851_s2 + $0xf0] sm:$0xff]  ;;  %v120_v16 = vld [vmem:[%s5851_s2 + $0x108] sm:$0xff]  ;;  %v122_v17 = vld [vmem:[%s5851_s2 + $0x118] sm:$0xff] }
  0x14   :  { %2671 = vmatmul.mubr.msk.f32.vlgmr.msra.gmra.mrb[0].mxu0 %vm162_vm0, %v39_v25  ;;  %2733 = vmatprep.subr.bf16.mxu1 %v2732_v48  ;;  %v46_v18 = vld [vmem:[%s5850_s0 + $0x38] sm:$0xff]  ;;  %v2750_v19 = vpack.c.bf16 %v117_v15, %v115_v14  ;;  %v2752_v20 = vpack.c.bf16 %v122_v17, %v120_v16  ;;  %v119_v21 = vld [vmem:[%s5851_s2 + $0x100] sm:$0xff]  ;;  %v121_v22 = vld [vmem:[%s5851_s2 + $0x110] sm:$0xff] }
  0x15   :  { %329 = vmatprep.mubr.f32.mxu0 %v3003_v3  ;;  %v124_v23 = vld [vmem:[%s5851_s2 + $0x128] sm:$0xff]  ;;  %v126_v24 = vld [vmem:[%s5851_s2 + $0x138] sm:$0xff]  ;;  %v47_v25 = vld [vmem:[%s5850_s0 + $0x40] sm:$0xff]  ;;  %v2754_v26 = vpack.c.bf16 %v121_v22, %v119_v21 }
  0x16   :  { %v2756_v27 = vpack.c.bf16 %v126_v24, %v124_v23  ;;  %v123_v28 = vld [vmem:[%s5851_s2 + $0x120] sm:$0xff]  ;;  %v125_v29 = vld [vmem:[%s5851_s2 + $0x130] sm:$0xff]  ;;  %v128_v30 = vld [vmem:[%s5851_s2 + $0x148] sm:$0xff] }
  0x17   :  { %2735 = vmatpush1.bf16.msra.mxu1 %v2734_v54  ;;  %v130_v31 = vld [vmem:[%s5851_s2 + $0x158] sm:$0xff]  ;;  %v48_v32 = vld [vmem:[%s5850_s0 + $0x48] sm:$0xff]  ;;  %v2758_v33 = vpack.c.bf16 %v125_v29, %v123_v28  ;;  %v127_v35 = vld [vmem:[%s5851_s2 + $0x140] sm:$0xff] }
  0x18   :  { %2672 = vmatmul.mubr.msk.f32.gmra.mrb[2].mxu0 %vm162_vm0, %v40_v39  ;;  %2737 = vmatprep.subr.bf16.mxu1 %v2736_v55  ;;  %v2760_v34 = vpack.c.bf16 %v130_v31, %v128_v30  ;;  %v129_v36 = vld [vmem:[%s5851_s2 + $0x150] sm:$0xff]  ;;  %v132_v37 = vld [vmem:[%s5851_s2 + $0x168] sm:$0xff]  ;;  %v134_v38 = vld [vmem:[%s5851_s2 + $0x178] sm:$0xff] }
  0x19   :  { %335 = vmatprep.mubr.f32.mxu0 %v3003_v3  ;;  %v49_v39 = vld [vmem:[%s5850_s0 + $0x50] sm:$0xff]  ;;  %v2762_v40 = vpack.c.bf16 %v129_v36, %v127_v35  ;;  %v2764_v41 = vpack.c.bf16 %v134_v38, %v132_v37  ;;  %v131_v42 = vld [vmem:[%s5851_s2 + $0x160] sm:$0xff]  ;;  %v136_v44 = vld [vmem:[%s5851_s2 + $0x188] sm:$0xff] }
  0x1a   :  { %v133_v43 = vld [vmem:[%s5851_s2 + $0x170] sm:$0xff]  ;;  %v138_v45 = vld [vmem:[%s5851_s2 + $0x198] sm:$0xff]  ;;  %v135_v49 = vld [vmem:[%s5851_s2 + $0x180] sm:$0xff] }
  0x1b   :  { %2739 = vmatpush1.bf16.msra.mxu1 %v2738_v61  ;;  %v2766_v47 = vpack.c.bf16 %v133_v43, %v131_v42  ;;  %v2768_v48 = vpack.c.bf16 %v138_v45, %v136_v44  ;;  %v137_v50 = vld [vmem:[%s5851_s2 + $0x190] sm:$0xff]  ;;  %v140_v51 = vld [vmem:[%s5851_s2 + $0x1a8] sm:$0xff]  ;;  %v142_v52 = vld [vmem:[%s5851_s2 + $0x1b8] sm:$0xff] }
  0x1c   :  { %2673 = vmatmul.mubr.msk.f32.gmra.mrb[4].mxu0 %vm162_vm0, %v41_v46  ;;  %2741 = vmatprep.subr.bf16.mxu1 %v2740_v62  ;;  %v50_v46 = vld [vmem:[%s5850_s0 + $0x58] sm:$0xff]  ;;  %v2770_v54 = vpack.c.bf16 %v137_v50, %v135_v49  ;;  %v2772_v55 = vpack.c.bf16 %v142_v52, %v140_v51  ;;  %v139_v56 = vld [vmem:[%s5851_s2 + $0x1a0] sm:$0xff]  ;;  %v141_v57 = vld [vmem:[%s5851_s2 + $0x1b0] sm:$0xff] }
  0x1d   :  { %341 = vmatprep.mubr.f32.mxu0 %v3003_v3  ;;  %v52_v58 = vld [vmem:[%s5850_s0 + $0x68] sm:$0xff]  ;;  %v2774_v59 = vpack.c.bf16 %v141_v57, %v139_v56  ;;  %v54_v61 = vld [vmem:[%s5850_s0 + $0x78] sm:$0xff]  ;;  %v55_v62 = vld [vmem:[%s5850_s0 + $0x80] sm:$0xff] }
  0x1e   :  { %v56_v63 = vld [vmem:[%s5850_s0 + $0x88] sm:$0xff]  ;;  %v57_v0 = vld [vmem:[%s5850_s0 + $0x90] sm:$0xff]  ;;  %v58_v1 = vld [vmem:[%s5850_s0 + $0x98] sm:$0xff] }
  0x1f   :  { %2743 = vmatpush1.bf16.msra.mxu1 %v2742_v5  ;;  %v59_v2 = vld [vmem:[%s5850_s0 + $0xa0] sm:$0xff]  ;;  %v144_v5 = vld [vmem:[%s5851_s2 + $0x1c8] sm:$0xff]  ;;  %v145_v9 = vld [vmem:[%s5851_s2 + $0x1d0] sm:$0xff] }
  0x20   :  { %2674 = vmatmul.mubr.msk.f32.gmra.mrb[6].mxu0 %vm162_vm0, %v42_v53  ;;  %2745 = vmatprep.subr.bf16.mxu1 %v2744_v6  ;;  %v51_v53 = vld [vmem:[%s5850_s0 + $0x60] sm:$0xff]  ;;  %v146_v6 = vld [vmem:[%s5851_s2 + $0x1d8] sm:$0xff]  ;;  %v149_v16 = vld [vmem:[%s5851_s2 + $0x1f0] sm:$0xff] }
  0x21   :  { %347 = vmatprep.mubr.f32.mxu0 %v3003_v3  ;;  %v2776_v7 = vpack.c.bf16 %v146_v6, %v144_v5  ;;  %v143_v8 = vld [vmem:[%s5851_s2 + $0x1c0] sm:$0xff]  ;;  %v65_v21 = vld [vmem:[%s5850_s0 + $0xd0] sm:$0xff]  ;;  %v66_v22 = vld [vmem:[%s5850_s0 + $0xd8] sm:$0xff] }
  0x22   :  { %v2778_v10 = vpack.c.bf16 %v145_v9, %v143_v8  ;;  %v147_v15 = vld [vmem:[%s5851_s2 + $0x1e0] sm:$0xff]  ;;  %v68_v24 = vld [vmem:[%s5850_s0 + $0xe8] sm:$0xff] }
  0x23   :  { %2747 = vmatpush1.bf16.msra.mxu1 %v2746_v12  ;;  %v148_v12 = vld [vmem:[%s5851_s2 + $0x1e8] sm:$0xff]  ;;  %v2782_v17 = vpack.c.bf16 %v149_v16, %v147_v15  ;;  %v67_v23 = vld [vmem:[%s5850_s0 + $0xe0] sm:$0xff] }
  0x24   :  { %2675 = vmatmul.mubr.msk.f32.gmra.mrb[8].mxu0 %vm162_vm0, %v43_v60  ;;  %2749 = vmatprep.subr.bf16.mxu1 %v2748_v13  ;;  %v53_v60 = vld [vmem:[%s5850_s0 + $0x70] sm:$0xff]  ;;  %v150_v13 = vld [vmem:[%s5851_s2 + $0x1f8] sm:$0xff]  ;;  %v26_v30 = vld [vmem:[%s5852_s5] ss:$8 sm:$0x3] }
  0x25   :  { %353 = vmatprep.mubr.f32.mxu0 %v3003_v3  ;;  %v2780_v14 = vpack.c.bf16 %v150_v13, %v148_v12 }
  0x27   :  { %2751 = vmatpush1.bf16.msra.mxu1 %v2750_v19  ;;  %v63_v19 = vld [vmem:[%s5850_s0 + $0xc0] sm:$0xff] }
  0x28   :  { %2676 = vmatmul.mubr.msk.f32.gmra.mrb[10].mxu0 %vm162_vm0, %v44_v4  ;;  %2753 = vmatprep.subr.bf16.mxu1 %v2752_v20  ;;  %v60_v4 = vld [vmem:[%s5850_s0 + $0xa8] sm:$0xff] }
  0x29   :  { %359 = vmatprep.mubr.f32.mxu0 %v3003_v3  ;;  %v64_v20 = vld [vmem:[%s5850_s0 + $0xc8] sm:$0xff] }
  0x2b   :  { %2755 = vmatpush1.bf16.msra.mxu1 %v2754_v26  ;;  %v70_v26 = vld [vmem:[%s5850_s0 + $0xf8] sm:$0xff] }
  0x2c   :  { %2677 = vmatmul.mubr.msk.f32.gmra.mrb[12].mxu0 %vm162_vm0, %v45_v11  ;;  %2757 = vmatprep.subr.bf16.mxu1 %v2756_v27  ;;  %v61_v11 = vld [vmem:[%s5850_s0 + $0xb0] sm:$0xff]  ;;  %v152_v27 = vlaneseq }
  0x2d   :  { %365 = vmatprep.mubr.f32.mxu0 %v3003_v3 }
  0x2e   :  { %v3446_v28 = vshrl.u32 %v152_v27, 7 }
  0x2f   :  { %2759 = vmatpush1.bf16.msra.mxu1 %v2758_v33 }
  0x30   :  { %2678 = vmatmul.mubr.msk.f32.gmra.mrb[14].mxu0 %vm162_vm0, %v46_v18  ;;  %2761 = vmatprep.subr.bf16.mxu1 %v2760_v34  ;;  %v62_v18 = vld [vmem:[%s5850_s0 + $0xb8] sm:$0xff]  ;;  %v3449_v29 = vsub.s32 0, %v3446_v28  ;;  %v3455_v31 = vsub.s32 1, %v3446_v28 }
  0x31   :  { %371 = vmatprep.mubr.f32.mxu0 %v3003_v3 }
  0x33   :  { %2763 = vmatpush1.bf16.msra.mxu1 %v2762_v40 }
  0x34   :  { %2679 = vmatmul.mubr.msk.f32.gmra.mrb[16].mxu0 %vm162_vm0, %v47_v25  ;;  %2765 = vmatprep.subr.bf16.mxu1 %v2764_v41  ;;  %v69_v25 = vld [vmem:[%s5850_s0 + $0xf0] sm:$0xff] }
  0x35   :  { %377 = vmatprep.mubr.f32.mxu0 %v3003_v3 }
  0x37   :  { %2767 = vmatpush1.bf16.msra.mxu1 %v2766_v47 }
  0x38   :  { %2680 = vmatmul.mubr.msk.f32.gmra.mrb[18].mxu0 %vm162_vm0, %v48_v32  ;;  %2769 = vmatprep.subr.bf16.mxu1 %v2768_v48  ;;  %v3461_v32 = vrot.slane %v26_v30, %v3455_v31 }
  0x39   :  { %383 = vmatprep.mubr.f32.mxu0 %v3003_v3 }
  0x3b   :  { %2771 = vmatpush1.bf16.msra.mxu1 %v2770_v54 }
  0x3c   :  { %2681 = vmatmul.mubr.msk.f32.gmra.mrb[20].mxu0 %vm162_vm0, %v49_v39  ;;  %2773 = vmatprep.subr.bf16.mxu1 %v2772_v55 }
  0x3d   :  { %389 = vmatprep.mubr.f32.mxu0 %v3003_v3 }
  0x3f   :  { %2775 = vmatpush1.bf16.msra.mxu1 %v2774_v59 }
  0x40   :  { %2682 = vmatmul.mubr.msk.f32.gmra.mrb[22].mxu0 %vm162_vm0, %v50_v46  ;;  %2777 = vmatprep.subr.bf16.mxu1 %v2776_v7 }
  0x41   :  { %395 = vmatprep.mubr.f32.mxu0 %v3003_v3 }
  0x43   :  { %2779 = vmatpush1.bf16.msra.mxu1 %v2778_v10 }
  0x44   :  { %2683 = vmatmul.mubr.msk.f32.gmra.mrb[24].mxu0 %vm162_vm0, %v51_v53  ;;  %2781 = vmatprep.subr.bf16.mxu1 %v2780_v14 }
  0x45   :  { %401 = vmatprep.mubr.f32.mxu0 %v3003_v3 }
  0x47   :  { %2783 = vmatpush1.bf16.msra.mxu1 %v2782_v17 }
  0x48   :  { %2684 = vmatmul.mubr.msk.f32.gmra.mrb[26].mxu0 %vm162_vm0, %v52_v58 }
  0x49   :  { %407 = vmatprep.mubr.f32.mxu0 %v3003_v3 }
  0x4c   :  { %2685 = vmatmul.mubr.msk.f32.gmra.mrb[28].mxu0 %vm162_vm0, %v53_v60 }
  0x4d   :  { %413 = vmatprep.mubr.f32.mxu0 %v3003_v3 }
  0x50   :  { %2686 = vmatmul.mubr.msk.f32.gmra.mrb[30].mxu0 %vm162_vm0, %v54_v61 }
  0x51   :  { %419 = vmatprep.mubr.f32.mxu0 %v3003_v3 }
  0x54   :  { %2687 = vmatmul.mubr.msk.f32.gmra.mrb[32].mxu0 %vm162_vm0, %v55_v62 }
  0x55   :  { %425 = vmatprep.mubr.f32.mxu0 %v3003_v3 }
  0x58   :  { %2688 = vmatmul.mubr.msk.f32.gmra.mrb[34].mxu0 %vm162_vm0, %v56_v63 }
  0x59   :  { %431 = vmatprep.mubr.f32.mxu0 %v3003_v3 }
  0x5c   :  { %2689 = vmatmul.mubr.msk.f32.gmra.mrb[36].mxu0 %vm162_vm0, %v57_v0 }
  0x5d   :  { %437 = vmatprep.mubr.f32.mxu0 %v3003_v3 }
  0x60   :  { %2690 = vmatmul.mubr.msk.f32.gmra.mrb[38].mxu0 %vm162_vm0, %v58_v1 }
  0x61   :  { %443 = vmatprep.mubr.f32.mxu0 %v3003_v3 }
  0x64   :  { %2691 = vmatmul.mubr.msk.f32.gmra.mrb[40].mxu0 %vm162_vm0, %v59_v2 }
  0x65   :  { %449 = vmatprep.mubr.f32.mxu0 %v3003_v3 }
  0x68   :  { %2692 = vmatmul.mubr.msk.f32.gmra.mrb[42].mxu0 %vm162_vm0, %v60_v4 }
  0x69   :  { %455 = vmatprep.mubr.f32.mxu0 %v3003_v3 }
  0x6c   :  { %2693 = vmatmul.mubr.msk.f32.gmra.mrb[44].mxu0 %vm162_vm0, %v61_v11 }
  0x6d   :  { %461 = vmatprep.mubr.f32.mxu0 %v3003_v3 }
  0x70   :  { %2694 = vmatmul.mubr.msk.f32.gmra.mrb[46].mxu0 %vm162_vm0, %v62_v18 }
  0x71   :  { %467 = vmatprep.mubr.f32.mxu0 %v3003_v3 }
  0x74   :  { %2695 = vmatmul.mubr.msk.f32.gmra.mrb[48].mxu0 %vm162_vm0, %v63_v19 }
  0x75   :  { %473 = vmatprep.mubr.f32.mxu0 %v3003_v3 }
  0x78   :  { %2696 = vmatmul.mubr.msk.f32.gmra.mrb[50].mxu0 %vm162_vm0, %v64_v20 }
  0x79   :  { %479 = vmatprep.mubr.f32.mxu0 %v3003_v3 }
  0x7c   :  { %2697 = vmatmul.mubr.msk.f32.gmra.mrb[52].mxu0 %vm162_vm0, %v65_v21 }
  0x7d   :  { %485 = vmatprep.mubr.f32.mxu0 %v3003_v3 }
  0x80   :  { %2698 = vmatmul.mubr.msk.f32.gmra.mrb[54].mxu0 %vm162_vm0, %v66_v22 }
  0x81   :  { %491 = vmatprep.mubr.f32.mxu0 %v3003_v3 }
  0x84   :  { %2699 = vmatmul.mubr.msk.f32.gmra.mrb[56].mxu0 %vm162_vm0, %v67_v23 }
  0x85   :  { %497 = vmatprep.mubr.f32.mxu0 %v3003_v3 }
  0x88   :  { %2700 = vmatmul.mubr.msk.f32.gmra.mrb[58].mxu0 %vm162_vm0, %v68_v24 }
  0x89   :  { %503 = vmatprep.mubr.f32.mxu0 %v3003_v3 }
  0x8c   :  { %2701 = vmatmul.mubr.msk.f32.gmra.mrb[60].mxu0 %vm162_vm0, %v69_v25 }
  0x8d   :  { %509 = vmatprep.mubr.f32.mxu0 %v3003_v3  ;;  %v3458_v3 = vrot.slane %v26_v30, %v3449_v29 }
  0x90   :  { %2702 = vmatmul.mubr.msk.f32.gmra.mrb[62].mxu0 %vm162_vm0, %v70_v26 }
  0xe7   :  { %v325_v33 = vpop.f32.mrb[0].mxu0 }
  0xe8   :  { %v326_v34 = vadd.f32 %v325_v33, %v3458_v3  ;;  %v327_v35 = vpop.f32.mrb[1].mxu0 }
  0xe9   :  { %v328_v36 = vadd.f32 %v327_v35, %v3461_v32 }
  0xea   :  { %v516_v37 = vmul.f32 0.2, %v326_v34 }
  0xeb   :  { %v331_v38 = vpop.f32.mrb[2].mxu0  ;;  %v517_v39 = vmul.f32 0.2, %v328_v36 }
  0xec   :  { %v332_v40 = vadd.f32 %v331_v38, %v3458_v3  ;;  %v333_v41 = vpop.f32.mrb[3].mxu0  ;;  %v580_v44 = vmax.f32 %v326_v34, %v516_v37 }
  0xed   :  { %v334_v42 = vadd.f32 %v333_v41, %v3461_v32  ;;  %v581_v43 = vmax.f32 %v328_v36, %v517_v39 }
  0xee   :  { %v518_v45 = vmul.f32 0.2, %v332_v40 }
  0xef   :  { %v519_v46 = vmul.f32 0.2, %v334_v42  ;;  %v337_v47 = vpop.f32.mrb[4].mxu0  ;;  %719 = vmatprep.mubr.f32.mxu1 %v581_v43 }
  0xf0   :  { %v338_v48 = vadd.f32 %v337_v47, %v3458_v3  ;;  %v339_v49 = vpop.f32.mrb[5].mxu0  ;;  %720 = vmatmul.mubr.f32.vlgmr.msra.gmra.mrb[0].mxu1 %v580_v44  ;;  %v582_v52 = vmax.f32 %v332_v40, %v518_v45 }
  0xf1   :  { %v583_v50 = vmax.f32 %v334_v42, %v519_v46  ;;  %v340_v51 = vadd.f32 %v339_v49, %v3461_v32 }
  0xf2   :  { %v520_v53 = vmul.f32 0.2, %v338_v48 }
  0xf3   :  { %v521_v54 = vmul.f32 0.2, %v340_v51  ;;  %v343_v55 = vpop.f32.mrb[6].mxu0  ;;  %725 = vmatprep.mubr.f32.mxu1 %v583_v50 }
  0xf4   :  { %v344_v56 = vadd.f32 %v343_v55, %v3458_v3  ;;  %v345_v57 = vpop.f32.mrb[7].mxu0  ;;  %726 = vmatmul.mubr.f32.gmra.mrb[2].mxu1 %v582_v52  ;;  %v584_v60 = vmax.f32 %v338_v48, %v520_v53 }
  0xf5   :  { %v585_v58 = vmax.f32 %v340_v51, %v521_v54  ;;  %v346_v59 = vadd.f32 %v345_v57, %v3461_v32 }
  0xf6   :  { %v522_v61 = vmul.f32 0.2, %v344_v56 }
  0xf7   :  { %v523_v62 = vmul.f32 0.2, %v346_v59  ;;  %v349_v63 = vpop.f32.mrb[8].mxu0  ;;  %731 = vmatprep.mubr.f32.mxu1 %v585_v58 }
  0xf8   :  { %v350_v0 = vadd.f32 %v349_v63, %v3458_v3  ;;  %v351_v1 = vpop.f32.mrb[9].mxu0  ;;  %732 = vmatmul.mubr.f32.gmra.mrb[4].mxu1 %v584_v60  ;;  %v586_v5 = vmax.f32 %v344_v56, %v522_v61 }
  0xf9   :  { %v587_v2 = vmax.f32 %v346_v59, %v523_v62  ;;  %v352_v4 = vadd.f32 %v351_v1, %v3461_v32 }
  0xfa   :  { %v524_v6 = vmul.f32 0.2, %v350_v0 }
  0xfb   :  { %v525_v7 = vmul.f32 0.2, %v352_v4  ;;  %v355_v8 = vpop.f32.mrb[10].mxu0  ;;  %737 = vmatprep.mubr.f32.mxu1 %v587_v2 }
  0xfc   :  { %v356_v9 = vadd.f32 %v355_v8, %v3458_v3  ;;  %v357_v10 = vpop.f32.mrb[11].mxu0  ;;  %738 = vmatmul.mubr.f32.gmra.mrb[6].mxu1 %v586_v5  ;;  %v588_v13 = vmax.f32 %v350_v0, %v524_v6 }
  0xfd   :  { %v589_v11 = vmax.f32 %v352_v4, %v525_v7  ;;  %v358_v12 = vadd.f32 %v357_v10, %v3461_v32 }
  0xfe   :  { %v526_v14 = vmul.f32 0.2, %v356_v9 }
  0xff   :  { %v527_v15 = vmul.f32 0.2, %v358_v12  ;;  %v361_v16 = vpop.f32.mrb[12].mxu0  ;;  %743 = vmatprep.mubr.f32.mxu1 %v589_v11 }
 0x100   :  { %v362_v17 = vadd.f32 %v361_v16, %v3458_v3  ;;  %v363_v18 = vpop.f32.mrb[13].mxu0  ;;  %744 = vmatmul.mubr.f32.gmra.mrb[8].mxu1 %v588_v13  ;;  %v590_v21 = vmax.f32 %v356_v9, %v526_v14 }
 0x101   :  { %v591_v19 = vmax.f32 %v358_v12, %v527_v15  ;;  %v364_v20 = vadd.f32 %v363_v18, %v3461_v32 }
 0x102   :  { %v528_v22 = vmul.f32 0.2, %v362_v17 }
 0x103   :  { %v529_v23 = vmul.f32 0.2, %v364_v20  ;;  %v367_v24 = vpop.f32.mrb[14].mxu0  ;;  %749 = vmatprep.mubr.f32.mxu1 %v591_v19 }
 0x104   :  { %v368_v25 = vadd.f32 %v367_v24, %v3458_v3  ;;  %v369_v26 = vpop.f32.mrb[15].mxu0  ;;  %750 = vmatmul.mubr.f32.gmra.mrb[10].mxu1 %v590_v21  ;;  %v592_v33 = vmax.f32 %v362_v17, %v528_v22 }
 0x105   :  { %v593_v27 = vmax.f32 %v364_v20, %v529_v23  ;;  %v370_v30 = vadd.f32 %v369_v26, %v3461_v32 }
 0x106   :  { %v530_v34 = vmul.f32 0.2, %v368_v25 }
 0x107   :  { %v531_v35 = vmul.f32 0.2, %v370_v30  ;;  %v373_v36 = vpop.f32.mrb[16].mxu0  ;;  %755 = vmatprep.mubr.f32.mxu1 %v593_v27 }
 0x108   :  { %v374_v37 = vadd.f32 %v373_v36, %v3458_v3  ;;  %v375_v38 = vpop.f32.mrb[17].mxu0  ;;  %756 = vmatmul.mubr.f32.gmra.mrb[12].mxu1 %v592_v33  ;;  %v594_v41 = vmax.f32 %v368_v25, %v530_v34 }
 0x109   :  { %v595_v39 = vmax.f32 %v370_v30, %v531_v35  ;;  %v376_v40 = vadd.f32 %v375_v38, %v3461_v32 }
 0x10a   :  { %v532_v42 = vmul.f32 0.2, %v374_v37 }
 0x10b   :  { %v533_v43 = vmul.f32 0.2, %v376_v40  ;;  %v379_v44 = vpop.f32.mrb[18].mxu0  ;;  %761 = vmatprep.mubr.f32.mxu1 %v595_v39 }
 0x10c   :  { %v380_v45 = vadd.f32 %v379_v44, %v3458_v3  ;;  %v381_v46 = vpop.f32.mrb[19].mxu0  ;;  %762 = vmatmul.mubr.f32.gmra.mrb[14].mxu1 %v594_v41  ;;  %v596_v49 = vmax.f32 %v374_v37, %v532_v42 }
 0x10d   :  { %v597_v47 = vmax.f32 %v376_v40, %v533_v43  ;;  %v382_v48 = vadd.f32 %v381_v46, %v3461_v32 }
 0x10e   :  { %v534_v50 = vmul.f32 0.2, %v380_v45 }
 0x10f   :  { %v535_v51 = vmul.f32 0.2, %v382_v48  ;;  %v385_v52 = vpop.f32.mrb[20].mxu0  ;;  %767 = vmatprep.mubr.f32.mxu1 %v597_v47 }
 0x110   :  { %v386_v53 = vadd.f32 %v385_v52, %v3458_v3  ;;  %v387_v54 = vpop.f32.mrb[21].mxu0  ;;  %768 = vmatmul.mubr.f32.gmra.mrb[16].mxu1 %v596_v49  ;;  %v598_v57 = vmax.f32 %v380_v45, %v534_v50 }
 0x111   :  { %v599_v55 = vmax.f32 %v382_v48, %v535_v51  ;;  %v388_v56 = vadd.f32 %v387_v54, %v3461_v32 }
 0x112   :  { %v536_v58 = vmul.f32 0.2, %v386_v53 }
 0x113   :  { %v537_v59 = vmul.f32 0.2, %v388_v56  ;;  %v391_v60 = vpop.f32.mrb[22].mxu0  ;;  %773 = vmatprep.mubr.f32.mxu1 %v599_v55 }
 0x114   :  { %v392_v61 = vadd.f32 %v391_v60, %v3458_v3  ;;  %v393_v62 = vpop.f32.mrb[23].mxu0  ;;  %774 = vmatmul.mubr.f32.gmra.mrb[18].mxu1 %v598_v57  ;;  %v600_v1 = vmax.f32 %v386_v53, %v536_v58 }
 0x115   :  { %v601_v63 = vmax.f32 %v388_v56, %v537_v59  ;;  %v394_v0 = vadd.f32 %v393_v62, %v3461_v32 }
 0x116   :  { %v538_v2 = vmul.f32 0.2, %v392_v61 }
 0x117   :  { %v539_v4 = vmul.f32 0.2, %v394_v0  ;;  %v397_v5 = vpop.f32.mrb[24].mxu0  ;;  %779 = vmatprep.mubr.f32.mxu1 %v601_v63 }
 0x118   :  { %v398_v6 = vadd.f32 %v397_v5, %v3458_v3  ;;  %v399_v7 = vpop.f32.mrb[25].mxu0  ;;  %780 = vmatmul.mubr.f32.gmra.mrb[20].mxu1 %v600_v1  ;;  %v602_v10 = vmax.f32 %v392_v61, %v538_v2 }
 0x119   :  { %v603_v8 = vmax.f32 %v394_v0, %v539_v4  ;;  %v400_v9 = vadd.f32 %v399_v7, %v3461_v32 }
 0x11a   :  { %v540_v11 = vmul.f32 0.2, %v398_v6 }
 0x11b   :  { %v541_v12 = vmul.f32 0.2, %v400_v9  ;;  %v403_v13 = vpop.f32.mrb[26].mxu0  ;;  %785 = vmatprep.mubr.f32.mxu1 %v603_v8 }
 0x11c   :  { %v404_v14 = vadd.f32 %v403_v13, %v3458_v3  ;;  %v405_v15 = vpop.f32.mrb[27].mxu0  ;;  %786 = vmatmul.mubr.f32.gmra.mrb[22].mxu1 %v602_v10  ;;  %v604_v18 = vmax.f32 %v398_v6, %v540_v11 }
 0x11d   :  { %v605_v16 = vmax.f32 %v400_v9, %v541_v12  ;;  %v406_v17 = vadd.f32 %v405_v15, %v3461_v32 }
 0x11e   :  { %v542_v19 = vmul.f32 0.2, %v404_v14 }
 0x11f   :  { %v543_v20 = vmul.f32 0.2, %v406_v17  ;;  %v409_v21 = vpop.f32.mrb[28].mxu0  ;;  %791 = vmatprep.mubr.f32.mxu1 %v605_v16 }
 0x120   :  { %v410_v22 = vadd.f32 %v409_v21, %v3458_v3  ;;  %v411_v23 = vpop.f32.mrb[29].mxu0  ;;  %792 = vmatmul.mubr.f32.gmra.mrb[24].mxu1 %v604_v18  ;;  %v606_v26 = vmax.f32 %v404_v14, %v542_v19 }
 0x121   :  { %v607_v24 = vmax.f32 %v406_v17, %v543_v20  ;;  %v412_v25 = vadd.f32 %v411_v23, %v3461_v32 }
 0x122   :  { %v544_v27 = vmul.f32 0.2, %v410_v22 }
 0x123   :  { %v545_v30 = vmul.f32 0.2, %v412_v25  ;;  %v415_v33 = vpop.f32.mrb[30].mxu0  ;;  %797 = vmatprep.mubr.f32.mxu1 %v607_v24 }
 0x124   :  { %v416_v34 = vadd.f32 %v415_v33, %v3458_v3  ;;  %v417_v35 = vpop.f32.mrb[31].mxu0  ;;  %798 = vmatmul.mubr.f32.gmra.mrb[26].mxu1 %v606_v26  ;;  %v608_v38 = vmax.f32 %v410_v22, %v544_v27 }
 0x125   :  { %v609_v36 = vmax.f32 %v412_v25, %v545_v30  ;;  %v418_v37 = vadd.f32 %v417_v35, %v3461_v32 }
 0x126   :  { %v546_v39 = vmul.f32 0.2, %v416_v34 }
 0x127   :  { %v547_v40 = vmul.f32 0.2, %v418_v37  ;;  %v421_v41 = vpop.f32.mrb[32].mxu0  ;;  %803 = vmatprep.mubr.f32.mxu1 %v609_v36 }
 0x128   :  { %v422_v42 = vadd.f32 %v421_v41, %v3458_v3  ;;  %v423_v43 = vpop.f32.mrb[33].mxu0  ;;  %804 = vmatmul.mubr.f32.gmra.mrb[28].mxu1 %v608_v38  ;;  %v610_v46 = vmax.f32 %v416_v34, %v546_v39 }
 0x129   :  { %v611_v44 = vmax.f32 %v418_v37, %v547_v40  ;;  %v424_v45 = vadd.f32 %v423_v43, %v3461_v32 }
 0x12a   :  { %v548_v47 = vmul.f32 0.2, %v422_v42 }
 0x12b   :  { %v549_v48 = vmul.f32 0.2, %v424_v45  ;;  %v427_v49 = vpop.f32.mrb[34].mxu0  ;;  %809 = vmatprep.mubr.f32.mxu1 %v611_v44 }
 0x12c   :  { %v428_v50 = vadd.f32 %v427_v49, %v3458_v3  ;;  %v429_v51 = vpop.f32.mrb[35].mxu0  ;;  %810 = vmatmul.mubr.f32.gmra.mrb[30].mxu1 %v610_v46  ;;  %v612_v54 = vmax.f32 %v422_v42, %v548_v47 }
 0x12d   :  { %v613_v52 = vmax.f32 %v424_v45, %v549_v48  ;;  %v430_v53 = vadd.f32 %v429_v51, %v3461_v32 }
 0x12e   :  { %v550_v55 = vmul.f32 0.2, %v428_v50 }
 0x12f   :  { %v551_v56 = vmul.f32 0.2, %v430_v53  ;;  %v433_v57 = vpop.f32.mrb[36].mxu0  ;;  %815 = vmatprep.mubr.f32.mxu1 %v613_v52 }
 0x130   :  { %v434_v58 = vadd.f32 %v433_v57, %v3458_v3  ;;  %v435_v59 = vpop.f32.mrb[37].mxu0  ;;  %816 = vmatmul.mubr.f32.gmra.mrb[32].mxu1 %v612_v54  ;;  %v614_v62 = vmax.f32 %v428_v50, %v550_v55 }
 0x131   :  { %v615_v60 = vmax.f32 %v430_v53, %v551_v56  ;;  %v436_v61 = vadd.f32 %v435_v59, %v3461_v32 }
 0x132   :  { %v552_v63 = vmul.f32 0.2, %v434_v58 }
 0x133   :  { %v553_v0 = vmul.f32 0.2, %v436_v61  ;;  %v439_v1 = vpop.f32.mrb[38].mxu0  ;;  %821 = vmatprep.mubr.f32.mxu1 %v615_v60 }
 0x134   :  { %v440_v2 = vadd.f32 %v439_v1, %v3458_v3  ;;  %v441_v4 = vpop.f32.mrb[39].mxu0  ;;  %822 = vmatmul.mubr.f32.gmra.mrb[34].mxu1 %v614_v62  ;;  %v616_v7 = vmax.f32 %v434_v58, %v552_v63 }
 0x135   :  { %v617_v5 = vmax.f32 %v436_v61, %v553_v0  ;;  %v442_v6 = vadd.f32 %v441_v4, %v3461_v32 }
 0x136   :  { %v554_v8 = vmul.f32 0.2, %v440_v2 }
 0x137   :  { %v555_v9 = vmul.f32 0.2, %v442_v6  ;;  %v445_v10 = vpop.f32.mrb[40].mxu0  ;;  %827 = vmatprep.mubr.f32.mxu1 %v617_v5 }
 0x138   :  { %v446_v11 = vadd.f32 %v445_v10, %v3458_v3  ;;  %v447_v12 = vpop.f32.mrb[41].mxu0  ;;  %828 = vmatmul.mubr.f32.gmra.mrb[36].mxu1 %v616_v7  ;;  %v618_v15 = vmax.f32 %v440_v2, %v554_v8 }
 0x139   :  { %v619_v13 = vmax.f32 %v442_v6, %v555_v9  ;;  %v448_v14 = vadd.f32 %v447_v12, %v3461_v32 }
 0x13a   :  { %v556_v16 = vmul.f32 0.2, %v446_v11 }
 0x13b   :  { %v557_v17 = vmul.f32 0.2, %v448_v14  ;;  %v451_v18 = vpop.f32.mrb[42].mxu0  ;;  %833 = vmatprep.mubr.f32.mxu1 %v619_v13 }
 0x13c   :  { %v452_v19 = vadd.f32 %v451_v18, %v3458_v3  ;;  %v453_v20 = vpop.f32.mrb[43].mxu0  ;;  %834 = vmatmul.mubr.f32.gmra.mrb[38].mxu1 %v618_v15  ;;  %v620_v23 = vmax.f32 %v446_v11, %v556_v16 }
 0x13d   :  { %v621_v21 = vmax.f32 %v448_v14, %v557_v17  ;;  %v454_v22 = vadd.f32 %v453_v20, %v3461_v32 }
 0x13e   :  { %v558_v24 = vmul.f32 0.2, %v452_v19 }
 0x13f   :  { %v559_v25 = vmul.f32 0.2, %v454_v22  ;;  %v457_v26 = vpop.f32.mrb[44].mxu0  ;;  %839 = vmatprep.mubr.f32.mxu1 %v621_v21 }
 0x140   :  { %v458_v27 = vadd.f32 %v457_v26, %v3458_v3  ;;  %v459_v30 = vpop.f32.mrb[45].mxu0  ;;  %840 = vmatmul.mubr.f32.gmra.mrb[40].mxu1 %v620_v23  ;;  %v622_v35 = vmax.f32 %v452_v19, %v558_v24 }
 0x141   :  { %v623_v33 = vmax.f32 %v454_v22, %v559_v25  ;;  %v460_v34 = vadd.f32 %v459_v30, %v3461_v32 }
 0x142   :  { %v560_v36 = vmul.f32 0.2, %v458_v27 }
 0x143   :  { %v561_v37 = vmul.f32 0.2, %v460_v34  ;;  %v463_v38 = vpop.f32.mrb[46].mxu0  ;;  %845 = vmatprep.mubr.f32.mxu1 %v623_v33 }
 0x144   :  { %v464_v39 = vadd.f32 %v463_v38, %v3458_v3  ;;  %v465_v40 = vpop.f32.mrb[47].mxu0  ;;  %846 = vmatmul.mubr.f32.gmra.mrb[42].mxu1 %v622_v35  ;;  %v624_v43 = vmax.f32 %v458_v27, %v560_v36 }
 0x145   :  { %v625_v41 = vmax.f32 %v460_v34, %v561_v37  ;;  %v466_v42 = vadd.f32 %v465_v40, %v3461_v32 }
 0x146   :  { %v562_v44 = vmul.f32 0.2, %v464_v39 }
 0x147   :  { %v563_v45 = vmul.f32 0.2, %v466_v42  ;;  %v469_v46 = vpop.f32.mrb[48].mxu0  ;;  %851 = vmatprep.mubr.f32.mxu1 %v625_v41 }
 0x148   :  { %v470_v47 = vadd.f32 %v469_v46, %v3458_v3  ;;  %v471_v48 = vpop.f32.mrb[49].mxu0  ;;  %852 = vmatmul.mubr.f32.gmra.mrb[44].mxu1 %v624_v43  ;;  %v626_v51 = vmax.f32 %v464_v39, %v562_v44 }
 0x149   :  { %v627_v49 = vmax.f32 %v466_v42, %v563_v45  ;;  %v472_v50 = vadd.f32 %v471_v48, %v3461_v32 }
 0x14a   :  { %v564_v52 = vmul.f32 0.2, %v470_v47 }
 0x14b   :  { %v565_v53 = vmul.f32 0.2, %v472_v50  ;;  %v475_v54 = vpop.f32.mrb[50].mxu0  ;;  %857 = vmatprep.mubr.f32.mxu1 %v627_v49 }
 0x14c   :  { %v476_v55 = vadd.f32 %v475_v54, %v3458_v3  ;;  %v477_v56 = vpop.f32.mrb[51].mxu0  ;;  %858 = vmatmul.mubr.f32.gmra.mrb[46].mxu1 %v626_v51  ;;  %v628_v59 = vmax.f32 %v470_v47, %v564_v52 }
 0x14d   :  { %v629_v57 = vmax.f32 %v472_v50, %v565_v53  ;;  %v478_v58 = vadd.f32 %v477_v56, %v3461_v32  ;;  %v1458_v53 = vld [vmem:[%s5853_s3 + $0x8] sm:$0xff] }
 0x14e   :  { %v566_v60 = vmul.f32 0.2, %v476_v55 }
 0x14f   :  { %v567_v61 = vmul.f32 0.2, %v478_v58  ;;  %v481_v62 = vpop.f32.mrb[52].mxu0  ;;  %863 = vmatprep.mubr.f32.mxu1 %v629_v57  ;;  %v1462_v57 = vld [vmem:[%s5853_s3 + $0x28] sm:$0xff] }
 0x150   :  { %v482_v63 = vadd.f32 %v481_v62, %v3458_v3  ;;  %v483_v0 = vpop.f32.mrb[53].mxu0  ;;  %864 = vmatmul.mubr.f32.gmra.mrb[48].mxu1 %v628_v59  ;;  %v630_v4 = vmax.f32 %v476_v55, %v566_v60  ;;  %v1459_v55 = vld [vmem:[%s5853_s3 + $0x10] sm:$0xff]  ;;  %v1461_v60 = vld [vmem:[%s5853_s3 + $0x20] sm:$0xff] }
 0x151   :  { %v631_v1 = vmax.f32 %v478_v58, %v567_v61  ;;  %v484_v2 = vadd.f32 %v483_v0, %v3461_v32  ;;  %v1464_v58 = vld [vmem:[%s5853_s3 + $0x38] sm:$0xff]  ;;  %v1463_v61 = vld [vmem:[%s5853_s3 + $0x30] sm:$0xff] }
 0x152   :  { %v568_v5 = vmul.f32 0.2, %v482_v63  ;;  %v2788_v59 = vpack.c.bf16 %v1464_v58, %v1462_v57  ;;  %v2790_v62 = vpack.c.bf16 %v1463_v61, %v1461_v60  ;;  %v1468_v0 = vld [vmem:[%s5853_s3 + $0x58] sm:$0xff] }
 0x153   :  { %v569_v6 = vmul.f32 0.2, %v484_v2  ;;  %v487_v7 = vpop.f32.mrb[54].mxu0  ;;  %869 = vmatprep.mubr.f32.mxu1 %v631_v1 }
 0x154   :  { %v488_v8 = vadd.f32 %v487_v7, %v3458_v3  ;;  %v489_v9 = vpop.f32.mrb[55].mxu0  ;;  %870 = vmatmul.mubr.f32.gmra.mrb[50].mxu1 %v630_v4  ;;  %v632_v12 = vmax.f32 %v482_v63, %v568_v5  ;;  %v1466_v63 = vld [vmem:[%s5853_s3 + $0x48] sm:$0xff]  ;;  %v1467_v4 = vld [vmem:[%s5853_s3 + $0x50] sm:$0xff]  ;;  %v1472_v7 = vld [vmem:[%s5853_s3 + $0x78] sm:$0xff] }
 0x155   :  { %v633_v10 = vmax.f32 %v484_v2, %v569_v6  ;;  %v490_v11 = vadd.f32 %v489_v9, %v3461_v32  ;;  %v2792_v1 = vpack.c.bf16 %v1468_v0, %v1466_v63  ;;  %v1465_v2 = vld [vmem:[%s5853_s3 + $0x40] sm:$0xff]  ;;  %v1470_v6 = vld [vmem:[%s5853_s3 + $0x68] sm:$0xff]  ;;  %v1492_v63 = vld [vmem:[%s5853_s3 + $0x118] sm:$0xff] }
 0x156   :  { %v570_v13 = vmul.f32 0.2, %v488_v8  ;;  %v2794_v5 = vpack.c.bf16 %v1467_v4, %v1465_v2  ;;  %v1469_v9 = vld [vmem:[%s5853_s3 + $0x60] sm:$0xff]  ;;  %v1491_v2 = vld [vmem:[%s5853_s3 + $0x110] sm:$0xff] }
 0x157   :  { %v571_v14 = vmul.f32 0.2, %v490_v11  ;;  %v493_v15 = vpop.f32.mrb[56].mxu0  ;;  %875 = vmatprep.mubr.f32.mxu1 %v633_v10  ;;  %v1471_v10 = vld [vmem:[%s5853_s3 + $0x70] sm:$0xff] }
 0x158   :  { %v494_v16 = vadd.f32 %v493_v15, %v3458_v3  ;;  %v495_v17 = vpop.f32.mrb[57].mxu0  ;;  %876 = vmatmul.mubr.f32.gmra.mrb[52].mxu1 %v632_v12  ;;  %v634_v20 = vmax.f32 %v488_v8, %v570_v13  ;;  %v2796_v8 = vpack.c.bf16 %v1472_v7, %v1470_v6  ;;  %v1474_v12 = vld [vmem:[%s5853_s3 + $0x88] sm:$0xff]  ;;  %v1476_v13 = vld [vmem:[%s5853_s3 + $0x98] sm:$0xff]  ;;  %v1473_v15 = vld [vmem:[%s5853_s3 + $0x80] sm:$0xff] }
 0x159   :  { %v635_v18 = vmax.f32 %v490_v11, %v571_v14  ;;  %v496_v19 = vadd.f32 %v495_v17, %v3461_v32  ;;  %v2798_v11 = vpack.c.bf16 %v1471_v10, %v1469_v9  ;;  %v2800_v14 = vpack.c.bf16 %v1476_v13, %v1474_v12  ;;  %v1494_v7 = vld [vmem:[%s5853_s3 + $0x128] sm:$0xff]  ;;  %v1493_v10 = vld [vmem:[%s5853_s3 + $0x120] sm:$0xff] }
 0x15a   :  { %v572_v21 = vmul.f32 0.2, %v494_v16 }
 0x15b   :  { %v573_v22 = vmul.f32 0.2, %v496_v19  ;;  %v499_v23 = vpop.f32.mrb[58].mxu0  ;;  %881 = vmatprep.mubr.f32.mxu1 %v635_v18  ;;  %v1478_v18 = vld [vmem:[%s5853_s3 + $0xa8] sm:$0xff] }
 0x15c   :  { %v500_v24 = vadd.f32 %v499_v23, %v3458_v3  ;;  %v501_v25 = vpop.f32.mrb[59].mxu0  ;;  %882 = vmatmul.mubr.f32.gmra.mrb[54].mxu1 %v634_v20  ;;  %v636_v30 = vmax.f32 %v494_v16, %v572_v21  ;;  %v1475_v16 = vld [vmem:[%s5853_s3 + $0x90] sm:$0xff]  ;;  %v1477_v21 = vld [vmem:[%s5853_s3 + $0xa0] sm:$0xff] }
 0x15d   :  { %v637_v26 = vmax.f32 %v496_v19, %v573_v22  ;;  %v502_v27 = vadd.f32 %v501_v25, %v3461_v32  ;;  %v2802_v17 = vpack.c.bf16 %v1475_v16, %v1473_v15  ;;  %v1480_v19 = vld [vmem:[%s5853_s3 + $0xb8] sm:$0xff]  ;;  %v1479_v22 = vld [vmem:[%s5853_s3 + $0xb0] sm:$0xff]  ;;  %v2665_v15 = vld [vmem:[%s5852_s5 + $0x1] ss:$8 sm:$0x3] }
 0x15e   :  { %v574_v33 = vmul.f32 0.2, %v500_v24  ;;  %v2804_v20 = vpack.c.bf16 %v1480_v19, %v1478_v18  ;;  %v2806_v23 = vpack.c.bf16 %v1479_v22, %v1477_v21  ;;  %v1484_v25 = vld [vmem:[%s5853_s3 + $0xd8] sm:$0xff]  ;;  %v1498_v16 = vld [vmem:[%s5853_s3 + $0x148] sm:$0xff]  ;;  %v1497_v19 = vld [vmem:[%s5853_s3 + $0x140] sm:$0xff] }
 0x15f   :  { %v575_v34 = vmul.f32 0.2, %v502_v27  ;;  %v505_v35 = vpop.f32.mrb[60].mxu0  ;;  %887 = vmatprep.mubr.f32.mxu1 %v637_v26 }
 0x160   :  { %v506_v36 = vadd.f32 %v505_v35, %v3458_v3  ;;  %v507_v37 = vpop.f32.mrb[61].mxu0  ;;  %888 = vmatmul.mubr.f32.gmra.mrb[56].mxu1 %v636_v30  ;;  %v638_v40 = vmax.f32 %v500_v24, %v574_v33  ;;  %v1482_v24 = vld [vmem:[%s5853_s3 + $0xc8] sm:$0xff]  ;;  %v1483_v30 = vld [vmem:[%s5853_s3 + $0xd0] sm:$0xff]  ;;  %v1488_v35 = vld [vmem:[%s5853_s3 + $0xf8] sm:$0xff] }
 0x161   :  { %v639_v38 = vmax.f32 %v502_v27, %v575_v34  ;;  %v508_v39 = vadd.f32 %v507_v37, %v3461_v32  ;;  %v2808_v26 = vpack.c.bf16 %v1484_v25, %v1482_v24  ;;  %v1481_v27 = vld [vmem:[%s5853_s3 + $0xc0] sm:$0xff]  ;;  %v1486_v34 = vld [vmem:[%s5853_s3 + $0xe8] sm:$0xff]  ;;  %v3720_v24 = vrot.slane %v2665_v15, %v3455_v31 }
 0x162   :  { %v576_v41 = vmul.f32 0.2, %v506_v36  ;;  %v2810_v33 = vpack.c.bf16 %v1483_v30, %v1481_v27  ;;  %v1485_v37 = vld [vmem:[%s5853_s3 + $0xe0] sm:$0xff]  ;;  %v1504_v27 = vld [vmem:[%s5853_s3 + $0x178] sm:$0xff] }
 0x163   :  { %v577_v42 = vmul.f32 0.2, %v508_v39  ;;  %v511_v43 = vpop.f32.mrb[62].mxu0  ;;  %893 = vmatprep.mubr.f32.mxu1 %v639_v38  ;;  %v1487_v38 = vld [vmem:[%s5853_s3 + $0xf0] sm:$0xff] }
 0x164   :  { %v512_v44 = vadd.f32 %v511_v43, %v3458_v3  ;;  %v513_v45 = vpop.f32.mrb[63].mxu0  ;;  %894 = vmatmul.mubr.f32.gmra.mrb[58].mxu1 %v638_v40  ;;  %v640_v48 = vmax.f32 %v506_v36, %v576_v41  ;;  %v1460_v3 = vld [vmem:[%s5853_s3 + $0x18] sm:$0xff]  ;;  %v2812_v36 = vpack.c.bf16 %v1488_v35, %v1486_v34  ;;  %v1501_v35 = vld [vmem:[%s5853_s3 + $0x160] sm:$0xff] }
 0x165   :  { %v641_v46 = vmax.f32 %v508_v39, %v577_v42  ;;  %v514_v47 = vadd.f32 %v513_v45, %v3461_v32  ;;  %v2784_v54 = vpack.c.bf16 %v1460_v3, %v1458_v53  ;;  %v1457_v32 = vld [vmem:[%s5853_s3] sm:$0xff]  ;;  %v2814_v39 = vpack.c.bf16 %v1487_v38, %v1485_v37 }
 0x166   :  { %v578_v49 = vmul.f32 0.2, %v512_v44  ;;  %v2786_v56 = vpack.c.bf16 %v1459_v55, %v1457_v32 }
 0x167   :  { %v579_v50 = vmul.f32 0.2, %v514_v47  ;;  %899 = vmatprep.mubr.f32.mxu1 %v641_v46  ;;  %2785 = vmatprep.subr.bf16.mxu0 %v2784_v54 }
 0x168   :  { %900 = vmatmul.mubr.f32.gmra.mrb[60].mxu1 %v640_v48  ;;  %v642_v52 = vmax.f32 %v512_v44, %v578_v49  ;;  %2787 = vmatpush1.bf16.msra.mxu0 %v2786_v56 }
 0x169   :  { %v643_v51 = vmax.f32 %v514_v47, %v579_v50  ;;  %2789 = vmatprep.subr.bf16.mxu0 %v2788_v59 }
 0x16b   :  { %905 = vmatprep.mubr.f32.mxu1 %v643_v51 }
 0x16c   :  { %906 = vmatmul.mubr.f32.gmra.mrb[62].mxu1 %v642_v52  ;;  %2791 = vmatpush1.bf16.msra.mxu0 %v2790_v62  ;;  %v1490_v62 = vld [vmem:[%s5853_s3 + $0x108] sm:$0xff] }
 0x16d   :  { %2793 = vmatprep.subr.bf16.mxu0 %v2792_v1  ;;  %v2816_v0 = vpack.c.bf16 %v1492_v63, %v1490_v62  ;;  %v1489_v1 = vld [vmem:[%s5853_s3 + $0x100] sm:$0xff] }
 0x170   :  { %2795 = vmatpush1.bf16.msra.mxu0 %v2794_v5  ;;  %v2818_v5 = vpack.c.bf16 %v1491_v2, %v1489_v1  ;;  %v1507_v2 = vld [vmem:[%s5853_s3 + $0x190] sm:$0xff] }
 0x171   :  { %2797 = vmatprep.subr.bf16.mxu0 %v2796_v8  ;;  %v1496_v8 = vld [vmem:[%s5853_s3 + $0x138] sm:$0xff] }
 0x172   :  { %v2820_v9 = vpack.c.bf16 %v1496_v8, %v1494_v7 }
 0x174   :  { %2799 = vmatpush1.bf16.msra.mxu0 %v2798_v11  ;;  %v1495_v11 = vld [vmem:[%s5853_s3 + $0x130] sm:$0xff] }
 0x175   :  { %2801 = vmatprep.subr.bf16.mxu0 %v2800_v14  ;;  %v2822_v13 = vpack.c.bf16 %v1495_v11, %v1493_v10 }
 0x178   :  { %2803 = vmatpush1.bf16.msra.mxu0 %v2802_v17  ;;  %v1500_v17 = vld [vmem:[%s5853_s3 + $0x158] sm:$0xff] }
 0x179   :  { %2805 = vmatprep.subr.bf16.mxu0 %v2804_v20  ;;  %v2824_v18 = vpack.c.bf16 %v1500_v17, %v1498_v16  ;;  %v1499_v20 = vld [vmem:[%s5853_s3 + $0x150] sm:$0xff] }
 0x17a   :  { %v2826_v22 = vpack.c.bf16 %v1499_v20, %v1497_v19 }
 0x17c   :  { %2807 = vmatpush1.bf16.msra.mxu0 %v2806_v23  ;;  %v3717_v23 = vrot.slane %v2665_v15, %v3449_v29 }
 0x17d   :  { %2809 = vmatprep.subr.bf16.mxu0 %v2808_v26  ;;  %v1502_v26 = vld [vmem:[%s5853_s3 + $0x168] sm:$0xff] }
 0x17e   :  { %v2828_v34 = vpack.c.bf16 %v1504_v27, %v1502_v26  ;;  %v1509_v27 = vld [vmem:[%s5853_s3 + $0x1a0] sm:$0xff] }
 0x180   :  { %2811 = vmatpush1.bf16.msra.mxu0 %v2810_v33 }
 0x181   :  { %2813 = vmatprep.subr.bf16.mxu0 %v2812_v36  ;;  %v1503_v36 = vld [vmem:[%s5853_s3 + $0x170] sm:$0xff] }
 0x182   :  { %v2830_v38 = vpack.c.bf16 %v1503_v36, %v1501_v35  ;;  %v1514_v35 = vld [vmem:[%s5853_s3 + $0x1c8] sm:$0xff] }
 0x184   :  { %2815 = vmatpush1.bf16.msra.mxu0 %v2814_v39 }
 0x185   :  { %2817 = vmatprep.subr.bf16.mxu0 %v2816_v0 }
 0x188   :  { %2819 = vmatpush1.bf16.msra.mxu0 %v2818_v5 }
 0x189   :  { %2821 = vmatprep.subr.bf16.mxu0 %v2820_v9 }
 0x18c   :  { %2823 = vmatpush1.bf16.msra.mxu0 %v2822_v13 }
 0x18d   :  { %2825 = vmatprep.subr.bf16.mxu0 %v2824_v18  ;;  %v1512_v18 = vld [vmem:[%s5853_s3 + $0x1b8] sm:$0xff] }
 0x190   :  { %2827 = vmatpush1.bf16.msra.mxu0 %v2826_v22 }
 0x191   :  { %2829 = vmatprep.subr.bf16.mxu0 %v2828_v34  ;;  %v1511_v34 = vld [vmem:[%s5853_s3 + $0x1b0] sm:$0xff] }
 0x194   :  { %2831 = vmatpush1.bf16.msra.mxu0 %v2830_v38 }
 0x1c3   :  { %v3623_v40 = vpop.f32.mrb[0].mxu1 }
 0x1c4   :  { %v3625_v41 = vpop.f32.mrb[1].mxu1  ;;  %v3746_v39 = vadd.f32 %v3623_v40, %v3717_v23  ;;  %v1506_v40 = vld [vmem:[%s5853_s3 + $0x188] sm:$0xff] }
 0x1c6   :  { %v989_v9 = vmul.f32 %v3746_v39, %v3746_v39 }
 0x1c7   :  { %v727_v42 = vpop.f32.mrb[2].mxu1 }
 0x1c8   :  { %v729_v43 = vpop.f32.mrb[3].mxu1  ;;  %v3731_v30 = vadd.f32 %v727_v42, %v3717_v23  ;;  %v3750_v42 = vadd.f32 %v3625_v41, %v3720_v24  ;;  %v1508_v41 = vld [vmem:[%s5853_s3 + $0x198] sm:$0xff] }
 0x1c9   :  { %v3734_v33 = vadd.f32 %v729_v43, %v3720_v24  ;;  %v2832_v1 = vpack.c.bf16 %v1508_v41, %v1506_v40  ;;  %v2838_v41 = vpack.c.bf16 %v1511_v34, %v1509_v27 }
 0x1ca   :  { %v991_v0 = vmul.f32 %v3731_v30, %v3731_v30  ;;  %v990_v10 = vmul.f32 %v3750_v42, %v3750_v42 }
 0x1cb   :  { %v3627_v44 = vpop.f32.mrb[4].mxu1  ;;  %2833 = vmatprep.subr.bf16.mxu0 %v2832_v1  ;;  %v949_v15 = vadd.f32 %v3734_v33, %v3750_v42  ;;  %v1515_v1 = vld [vmem:[%s5853_s3 + $0x1d0] sm:$0xff] }
 0x1cc   :  { %v3629_v45 = vpop.f32.mrb[5].mxu1  ;;  %v3756_v62 = vadd.f32 %v3627_v44, %v3717_v23  ;;  %v992_v44 = vmul.f32 %v3734_v33, %v3734_v33  ;;  %v1053_v19 = vadd.f32 %v991_v0, %v989_v9  ;;  %v1516_v0 = vld [vmem:[%s5853_s3 + $0x1d8] sm:$0xff] }
 0x1cd   :  { %v3760_v63 = vadd.f32 %v3629_v45, %v3720_v24  ;;  %v1505_v45 = vld [vmem:[%s5853_s3 + $0x180] sm:$0xff]  ;;  %v2840_v9 = vpack.c.bf16 %v1516_v0, %v1514_v35 }
 0x1ce   :  { %v2834_v8 = vpack.c.bf16 %v1507_v2, %v1505_v45  ;;  %v993_v16 = vmul.f32 %v3756_v62, %v3756_v62  ;;  %v1090_v20 = vadd.f32 %v992_v44, %v990_v10  ;;  %v1513_v44 = vld [vmem:[%s5853_s3 + $0x1c0] sm:$0xff]  ;;  %v1518_v10 = vld [vmem:[%s5853_s3 + $0x1e8] sm:$0xff] }
 0x1cf   :  { %v3631_v46 = vpop.f32.mrb[6].mxu1  ;;  %v994_v17 = vmul.f32 %v3760_v63, %v3760_v63  ;;  %v950_v45 = vadd.f32 %v949_v15, %v3760_v63 }
 0x1d0   :  { %v3633_v47 = vpop.f32.mrb[7].mxu1  ;;  %v3780_v5 = vadd.f32 %v3631_v46, %v3717_v23  ;;  %v912_v46 = vadd.f32 %v3731_v30, %v3746_v39  ;;  %2835 = vmatpush1.bf16.msra.mxu0 %v2834_v8  ;;  %v1054_v15 = vadd.f32 %v1053_v19, %v993_v16  ;;  %v1517_v16 = vld [vmem:[%s5853_s3 + $0x1e0] sm:$0xff] }
 0x1d1   :  { %v3790_v11 = vadd.f32 %v3633_v47, %v3720_v24  ;;  %v1510_v47 = vld [vmem:[%s5853_s3 + $0x1a8] sm:$0xff] }
 0x1d2   :  { %v2836_v26 = vpack.c.bf16 %v1512_v18, %v1510_v47  ;;  %v913_v36 = vadd.f32 %v912_v46, %v3756_v62  ;;  %v995_v38 = vmul.f32 %v3780_v5, %v3780_v5  ;;  %v1520_v46 = vld [vmem:[%s5853_s3 + $0x1f8] sm:$0xff]  ;;  %v1091_v47 = vadd.f32 %v1090_v20, %v994_v17 }
 0x1d3   :  { %v3635_v48 = vpop.f32.mrb[8].mxu1  ;;  %v2844_v35 = vpack.c.bf16 %v1520_v46, %v1518_v10  ;;  %v951_v19 = vadd.f32 %v950_v45, %v3790_v11 }
 0x1d4   :  { %v3637_v49 = vpop.f32.mrb[9].mxu1  ;;  %v3810_v22 = vadd.f32 %v3635_v48, %v3717_v23  ;;  %2837 = vmatprep.subr.bf16.mxu0 %v2836_v26  ;;  %v914_v27 = vadd.f32 %v913_v36, %v3780_v5  ;;  %v1055_v17 = vadd.f32 %v1054_v15, %v995_v38 }
 0x1d5   :  { %v3826_v48 = vadd.f32 %v3637_v49, %v3720_v24  ;;  %v996_v49 = vmul.f32 %v3790_v11, %v3790_v11  ;;  %2839 = vmatpush1.bf16.msra.mxu0 %v2838_v41 }
 0x1d6   :  { %v997_v26 = vmul.f32 %v3810_v22, %v3810_v22  ;;  %2841 = vmatprep.subr.bf16.mxu0 %v2840_v9  ;;  %v915_v0 = vadd.f32 %v914_v27, %v3810_v22 }
 0x1d7   :  { %v3639_v50 = vpop.f32.mrb[10].mxu1  ;;  %v998_v20 = vmul.f32 %v3826_v48, %v3826_v48  ;;  %v1092_v41 = vadd.f32 %v1091_v47, %v996_v49  ;;  %v952_v45 = vadd.f32 %v951_v19, %v3826_v48 }
 0x1d8   :  { %v3641_v51 = vpop.f32.mrb[11].mxu1  ;;  %v3844_v2 = vadd.f32 %v3639_v50, %v3717_v23  ;;  %v2842_v50 = vpack.c.bf16 %v1515_v1, %v1513_v44  ;;  %v1056_v10 = vadd.f32 %v1055_v17, %v997_v26 }
 0x1d9   :  { %v3856_v18 = vadd.f32 %v3641_v51, %v3720_v24  ;;  %v1519_v51 = vld [vmem:[%s5853_s3 + $0x1f0] sm:$0xff]  ;;  %v1093_v47 = vadd.f32 %v1092_v41, %v998_v20 }
 0x1da   :  { %v999_v44 = vmul.f32 %v3844_v2, %v3844_v2  ;;  %2843 = vmatpush1.bf16.msra.mxu0 %v2842_v50  ;;  %v2846_v49 = vpack.c.bf16 %v1519_v51, %v1517_v16  ;;  %v916_v46 = vadd.f32 %v915_v0, %v3844_v2 }
 0x1db   :  { %v3643_v52 = vpop.f32.mrb[12].mxu1  ;;  %2845 = vmatprep.subr.bf16.mxu0 %v2844_v35  ;;  %v953_v27 = vadd.f32 %v952_v45, %v3856_v18 }
 0x1dc   :  { %v3645_v53 = vpop.f32.mrb[13].mxu1  ;;  %v3863_v34 = vadd.f32 %v3643_v52, %v3717_v23  ;;  %v1057_v16 = vadd.f32 %v1056_v10, %v999_v44 }
 0x1dd   :  { %v3876_v52 = vadd.f32 %v3645_v53, %v3720_v24  ;;  %v1000_v53 = vmul.f32 %v3856_v18, %v3856_v18 }
 0x1de   :  { %v917_v51 = vadd.f32 %v916_v46, %v3863_v34  ;;  %2847 = vmatpush1.bf16.msra.mxu0 %v2846_v49 }
 0x1df   :  { %v3647_v3 = vpop.f32.mrb[14].mxu1  ;;  %v1094_v19 = vadd.f32 %v1093_v47, %v1000_v53  ;;  %v954_v20 = vadd.f32 %v953_v27, %v3876_v52 }
 0x1e0   :  { %v3649_v54 = vpop.f32.mrb[15].mxu1  ;;  %v3885_v38 = vadd.f32 %v3647_v3, %v3717_v23  ;;  %v1001_v3 = vmul.f32 %v3863_v34, %v3863_v34 }
 0x1e1   :  { %v3894_v9 = vadd.f32 %v3649_v54, %v3720_v24  ;;  %v1002_v54 = vmul.f32 %v3876_v52, %v3876_v52 }
 0x1e2   :  { %v1058_v0 = vadd.f32 %v1057_v16, %v1001_v3  ;;  %v918_v44 = vadd.f32 %v917_v51, %v3885_v38 }
 0x1e3   :  { %v3651_v32 = vpop.f32.mrb[16].mxu1  ;;  %v1095_v53 = vadd.f32 %v1094_v19, %v1002_v54  ;;  %v955_v10 = vadd.f32 %v954_v20, %v3894_v9 }
 0x1e4   :  { %v3653_v55 = vpop.f32.mrb[17].mxu1  ;;  %v3901_v15 = vadd.f32 %v3651_v32, %v3717_v23  ;;  %v1003_v32 = vmul.f32 %v3885_v38, %v3885_v38 }
 0x1e5   :  { %v3908_v50 = vadd.f32 %v3653_v55, %v3720_v24  ;;  %v1004_v55 = vmul.f32 %v3894_v9, %v3894_v9 }
 0x1e6   :  { %v1059_v3 = vadd.f32 %v1058_v0, %v1003_v32  ;;  %v919_v47 = vadd.f32 %v918_v44, %v3901_v15 }
 0x1e7   :  { %v3655_v56 = vpop.f32.mrb[18].mxu1  ;;  %v1006_v46 = vmul.f32 %v3908_v50, %v3908_v50  ;;  %v1096_v16 = vadd.f32 %v1095_v53, %v1004_v55  ;;  %v956_v51 = vadd.f32 %v955_v10, %v3908_v50 }
 0x1e8   :  { %v3657_v57 = vpop.f32.mrb[19].mxu1  ;;  %v3917_v35 = vadd.f32 %v3655_v56, %v3717_v23  ;;  %v1005_v56 = vmul.f32 %v3901_v15, %v3901_v15 }
 0x1e9   :  { %v3926_v41 = vadd.f32 %v3657_v57, %v3720_v24  ;;  %v1097_v55 = vadd.f32 %v1096_v16, %v1006_v46 }
 0x1ea   :  { %v1007_v27 = vmul.f32 %v3917_v35, %v3917_v35  ;;  %v1060_v19 = vadd.f32 %v1059_v3, %v1005_v56  ;;  %v920_v20 = vadd.f32 %v919_v47, %v3917_v35 }
 0x1eb   :  { %v3659_v58 = vpop.f32.mrb[20].mxu1  ;;  %v957_v44 = vadd.f32 %v956_v51, %v3926_v41 }
 0x1ec   :  { %v3661_v59 = vpop.f32.mrb[21].mxu1  ;;  %v3933_v45 = vadd.f32 %v3659_v58, %v3717_v23  ;;  %v1061_v10 = vadd.f32 %v1060_v19, %v1007_v27 }
 0x1ed   :  { %v3940_v57 = vadd.f32 %v3661_v59, %v3720_v24  ;;  %v1008_v59 = vmul.f32 %v3926_v41, %v3926_v41 }
 0x1ee   :  { %5919 = vst [vmem:[#allocation2_spill] sm:$0xff] %v3933_v45  ;;  %v1009_v0 = vmul.f32 %v3933_v45, %v3933_v45  ;;  %v921_v3 = vadd.f32 %v920_v20, %v3933_v45 }
 0x1ef   :  { %v3663_v60 = vpop.f32.mrb[22].mxu1  ;;  %v1010_v53 = vmul.f32 %v3940_v57, %v3940_v57  ;;  %v1098_v16 = vadd.f32 %v1097_v55, %v1008_v59  ;;  %v958_v51 = vadd.f32 %v957_v44, %v3940_v57 }
 0x1f0   :  { %v3665_v61 = vpop.f32.mrb[23].mxu1  ;;  %v3949_v58 = vadd.f32 %v3663_v60, %v3717_v23  ;;  %v1062_v19 = vadd.f32 %v1061_v10, %v1009_v0 }
 0x1f1   :  { %v3958_v32 = vadd.f32 %v3665_v61, %v3720_v24  ;;  %v1099_v59 = vadd.f32 %v1098_v16, %v1010_v53 }
 0x1f2   :  { %5920 = vst [vmem:[#allocation3_spill] sm:$0xff] %v3949_v58  ;;  %v1011_v47 = vmul.f32 %v3949_v58, %v3949_v58  ;;  %v922_v20 = vadd.f32 %v921_v3, %v3949_v58 }
 0x1f3   :  { %v3679_v4 = vpop.f32.mrb[24].mxu1  ;;  %v959_v55 = vadd.f32 %v958_v51, %v3958_v32 }
 0x1f4   :  { %v3681_v6 = vpop.f32.mrb[25].mxu1  ;;  %v3965_v60 = vadd.f32 %v3679_v4, %v3717_v23  ;;  %v1063_v10 = vadd.f32 %v1062_v19, %v1011_v47 }
 0x1f5   :  { %v3972_v61 = vadd.f32 %v3681_v6, %v3720_v24  ;;  %v1012_v6 = vmul.f32 %v3958_v32, %v3958_v32 }
 0x1f6   :  { %5921 = vst [vmem:[#allocation4_spill] sm:$0xff] %v3965_v60  ;;  %v1013_v45 = vmul.f32 %v3965_v60, %v3965_v60  ;;  %v923_v3 = vadd.f32 %v922_v20, %v3965_v60 }
 0x1f7   :  { %v3695_v12 = vpop.f32.mrb[26].mxu1  ;;  %v1014_v44 = vmul.f32 %v3972_v61, %v3972_v61  ;;  %v1100_v16 = vadd.f32 %v1099_v59, %v1012_v6  ;;  %v960_v51 = vadd.f32 %v959_v55, %v3972_v61 }
 0x1f8   :  { %v3697_v14 = vpop.f32.mrb[27].mxu1  ;;  %v3981_v4 = vadd.f32 %v3695_v12, %v3717_v23  ;;  %v1064_v19 = vadd.f32 %v1063_v10, %v1013_v45 }
 0x1f9   :  { %v3990_v27 = vadd.f32 %v3697_v14, %v3720_v24  ;;  %v1101_v6 = vadd.f32 %v1100_v16, %v1014_v44 }
 0x1fa   :  { %5922 = vst [vmem:[#allocation5_spill] sm:$0xff] %v3981_v4  ;;  %v1015_v58 = vmul.f32 %v3981_v4, %v3981_v4  ;;  %v924_v20 = vadd.f32 %v923_v3, %v3981_v4 }
 0x1fb   :  { %v3714_v21 = vpop.f32.mrb[28].mxu1  ;;  %5923 = vst [vmem:[#allocation6_spill] sm:$0xff] %v3990_v27  ;;  %v961_v59 = vadd.f32 %v960_v51, %v3990_v27 }
 0x1fc   :  { %v3722_v25 = vpop.f32.mrb[29].mxu1  ;;  %v3997_v12 = vadd.f32 %v3714_v21, %v3717_v23  ;;  %v1065_v10 = vadd.f32 %v1064_v19, %v1015_v58 }
 0x1fd   :  { %v4004_v14 = vadd.f32 %v3722_v25, %v3720_v24  ;;  %v1016_v25 = vmul.f32 %v3990_v27, %v3990_v27 }
 0x1fe   :  { %v1017_v60 = vmul.f32 %v3997_v12, %v3997_v12  ;;  %v925_v3 = vadd.f32 %v924_v20, %v3997_v12 }
 0x1ff   :  { %v3742_v37 = vpop.f32.mrb[30].mxu1  ;;  %v1018_v55 = vmul.f32 %v4004_v14, %v4004_v14  ;;  %v1102_v16 = vadd.f32 %v1101_v6, %v1016_v25  ;;  %v962_v51 = vadd.f32 %v961_v59, %v4004_v14 }
 0x200   :  { %v3752_v43 = vpop.f32.mrb[31].mxu1  ;;  %v4013_v21 = vadd.f32 %v3742_v37, %v3717_v23  ;;  %v1066_v58 = vadd.f32 %v1065_v10, %v1017_v60 }
 0x201   :  { %v4022_v47 = vadd.f32 %v3752_v43, %v3720_v24  ;;  %v1103_v25 = vadd.f32 %v1102_v16, %v1018_v55 }
 0x202   :  { %5924 = vst [vmem:[#allocation7_spill] sm:$0xff] %v4013_v21  ;;  %v1019_v4 = vmul.f32 %v4013_v21, %v4013_v21  ;;  %v926_v19 = vadd.f32 %v925_v3, %v4013_v21 }
 0x203   :  { %v3782_v7 = vpop.f32.mrb[32].mxu1  ;;  %5925 = vst [vmem:[#allocation8_spill] sm:$0xff] %v4022_v47  ;;  %v1020_v27 = vmul.f32 %v4022_v47, %v4022_v47  ;;  %v963_v6 = vadd.f32 %v962_v51, %v4022_v47 }
 0x204   :  { %v3792_v13 = vpop.f32.mrb[33].mxu1  ;;  %v4029_v37 = vadd.f32 %v3782_v7, %v3717_v23  ;;  %v1067_v10 = vadd.f32 %v1066_v58, %v1019_v4 }
 0x205   :  { %v4036_v43 = vadd.f32 %v3792_v13, %v3720_v24  ;;  %v1104_v16 = vadd.f32 %v1103_v25, %v1020_v27 }
 0x206   :  { %v1021_v20 = vmul.f32 %v4029_v37, %v4029_v37  ;;  %v927_v3 = vadd.f32 %v926_v19, %v4029_v37 }
 0x207   :  { %v3828_v40 = vpop.f32.mrb[34].mxu1  ;;  %v1022_v59 = vmul.f32 %v4036_v43, %v4036_v43  ;;  %v964_v51 = vadd.f32 %v963_v6, %v4036_v43 }
 0x208   :  { %v3846_v8 = vpop.f32.mrb[35].mxu1  ;;  %v4043_v7 = vadd.f32 %v3828_v40, %v3717_v23  ;;  %v1068_v4 = vadd.f32 %v1067_v10, %v1021_v20 }
 0x209   :  { %v4050_v13 = vadd.f32 %v3846_v8, %v3720_v24  ;;  %v1105_v27 = vadd.f32 %v1104_v16, %v1022_v59 }
 0x20a   :  { %5926 = vst [vmem:[#allocation9_spill] sm:$0xff] %v4043_v7  ;;  %v1023_v21 = vmul.f32 %v4043_v7, %v4043_v7  ;;  %v928_v58 = vadd.f32 %v927_v3, %v4043_v7 }
 0x20b   :  { %v3878_v36 = vpop.f32.mrb[36].mxu1  ;;  %5927 = vst [vmem:[#allocation10_spill] sm:$0xff] %v4050_v13  ;;  %v1024_v47 = vmul.f32 %v4050_v13, %v4050_v13  ;;  %v965_v25 = vadd.f32 %v964_v51, %v4050_v13 }
 0x20c   :  { %v3887_v1 = vpop.f32.mrb[37].mxu1  ;;  %v4057_v40 = vadd.f32 %v3878_v36, %v3717_v23  ;;  %v1069_v10 = vadd.f32 %v1068_v4, %v1023_v21 }
 0x20d   :  { %v4064_v8 = vadd.f32 %v3887_v1, %v3720_v24  ;;  %v1106_v16 = vadd.f32 %v1105_v27, %v1024_v47 }
 0x20e   :  { %v1025_v19 = vmul.f32 %v4057_v40, %v4057_v40  ;;  %v929_v3 = vadd.f32 %v928_v58, %v4057_v40 }
 0x20f   :  { %v3910_v26 = vpop.f32.mrb[38].mxu1  ;;  %5928 = vst [vmem:[#allocation11_spill] sm:$0xff] %v4064_v8  ;;  %v1026_v6 = vmul.f32 %v4064_v8, %v4064_v8  ;;  %v966_v51 = vadd.f32 %v965_v25, %v4064_v8 }
 0x210   :  { %v3919_v17 = vpop.f32.mrb[39].mxu1  ;;  %v4071_v36 = vadd.f32 %v3910_v26, %v3717_v23  ;;  %v1070_v21 = vadd.f32 %v1069_v10, %v1025_v19 }
 0x211   :  { %v4078_v1 = vadd.f32 %v3919_v17, %v3720_v24  ;;  %v1107_v47 = vadd.f32 %v1106_v16, %v1026_v6 }
 0x212   :  { %5929 = vst [vmem:[#allocation12_spill] sm:$0xff] %v4071_v36  ;;  %v1027_v7 = vmul.f32 %v4071_v36, %v4071_v36  ;;  %v930_v4 = vadd.f32 %v929_v3, %v4071_v36 }
 0x213   :  { %v3942_v49 = vpop.f32.mrb[40].mxu1  ;;  %5930 = vst [vmem:[#allocation13_spill] sm:$0xff] %v4078_v1  ;;  %v1028_v13 = vmul.f32 %v4078_v1, %v4078_v1  ;;  %v967_v27 = vadd.f32 %v966_v51, %v4078_v1 }
 0x214   :  { %v3951_v54 = vpop.f32.mrb[41].mxu1  ;;  %v4085_v26 = vadd.f32 %v3942_v49, %v3717_v23  ;;  %v1071_v10 = vadd.f32 %v1070_v21, %v1027_v7 }
 0x215   :  { %v4092_v17 = vadd.f32 %v3951_v54, %v3720_v24  ;;  %v1108_v16 = vadd.f32 %v1107_v47, %v1028_v13 }
 0x216   :  { %v1029_v58 = vmul.f32 %v4085_v26, %v4085_v26  ;;  %v931_v3 = vadd.f32 %v930_v4, %v4085_v26 }
 0x217   :  { %v3974_v56 = vpop.f32.mrb[42].mxu1  ;;  %5931 = vst [vmem:[#allocation14_spill] sm:$0xff] %v4092_v17  ;;  %v1030_v25 = vmul.f32 %v4092_v17, %v4092_v17  ;;  %v968_v51 = vadd.f32 %v967_v27, %v4092_v17 }
 0x218   :  { %v3983_v46 = vpop.f32.mrb[43].mxu1  ;;  %v4099_v49 = vadd.f32 %v3974_v56, %v3717_v23  ;;  %v1072_v8 = vadd.f32 %v1071_v10, %v1029_v58 }
 0x219   :  { %v4106_v54 = vadd.f32 %v3983_v46, %v3720_v24 }
 0x21a   :  { %v1031_v36 = vmul.f32 %v4099_v49, %v4099_v49  ;;  %v932_v7 = vadd.f32 %v931_v3, %v4099_v49 }
 0x21b   :  { %v4006_v0 = vpop.f32.mrb[44].mxu1  ;;  %5932 = vst [vmem:[#allocation15_spill] sm:$0xff] %v4106_v54  ;;  %v1032_v1 = vmul.f32 %v4106_v54, %v4106_v54  ;;  %v969_v13 = vadd.f32 %v968_v51, %v4106_v54 }
 0x21c   :  { %v4015_v53 = vpop.f32.mrb[45].mxu1  ;;  %v4113_v56 = vadd.f32 %v4006_v0, %v3717_v23  ;;  %v1073_v17 = vadd.f32 %v1072_v8, %v1031_v36 }
 0x21d   :  { %v4120_v46 = vadd.f32 %v4015_v53, %v3720_v24 }
 0x21e   :  { %v1033_v21 = vmul.f32 %v4113_v56, %v4113_v56  ;;  %v933_v58 = vadd.f32 %v932_v7, %v4113_v56 }
 0x21f   :  { %v859_v45 = vpop.f32.mrb[46].mxu1  ;;  %5933 = vst [vmem:[#allocation16_spill] sm:$0xff] %v4120_v46  ;;  %v1034_v47 = vmul.f32 %v4120_v46, %v4120_v46 }
 0x220   :  { %v861_v44 = vpop.f32.mrb[47].mxu1  ;;  %v4126_v0 = vadd.f32 %v859_v45, %v3717_v23  ;;  %v1109_v45 = vadd.f32 %v1108_v16, %v1030_v25  ;;  %v970_v16 = vadd.f32 %v969_v13, %v4120_v46  ;;  %v1074_v54 = vadd.f32 %v1073_v17, %v1033_v21 }
 0x221   :  { %v4132_v53 = vadd.f32 %v861_v44, %v3720_v24 }
 0x222   :  { %5934 = vst [vmem:[#allocation17_spill] sm:$0xff] %v4126_v0  ;;  %v1035_v10 = vmul.f32 %v4126_v0, %v4126_v0  ;;  %v1110_v25 = vadd.f32 %v1109_v45, %v1032_v1  ;;  %v934_v8 = vadd.f32 %v933_v58, %v4126_v0 }
 0x223   :  { %v865_v60 = vpop.f32.mrb[48].mxu1  ;;  %v1036_v51 = vmul.f32 %v4132_v53, %v4132_v53  ;;  %v971_v1 = vadd.f32 %v970_v16, %v4132_v53 }
 0x224   :  { %v867_v55 = vpop.f32.mrb[49].mxu1  ;;  %v4138_v4 = vadd.f32 %v865_v60, %v3717_v23  ;;  %v1075_v46 = vadd.f32 %v1074_v54, %v1035_v10 }
 0x225   :  { %v4144_v27 = vadd.f32 %v867_v55, %v3720_v24 }
 0x226   :  { %5935 = vst [vmem:[#allocation18_spill] sm:$0xff] %v4138_v4  ;;  %v1037_v36 = vmul.f32 %v4138_v4, %v4138_v4  ;;  %v935_v17 = vadd.f32 %v934_v8, %v4138_v4 }
 0x227   :  { %v871_v20 = vpop.f32.mrb[50].mxu1  ;;  %5936 = vst [vmem:[#allocation19_spill] sm:$0xff] %v4144_v27  ;;  %v1038_v45 = vmul.f32 %v4144_v27, %v4144_v27 }
 0x228   :  { %v873_v59 = vpop.f32.mrb[51].mxu1  ;;  %v4150_v3 = vadd.f32 %v871_v20, %v3717_v23  ;;  %v1111_v20 = vadd.f32 %v1110_v25, %v1034_v47  ;;  %v972_v25 = vadd.f32 %v971_v1, %v4144_v27  ;;  %v1076_v0 = vadd.f32 %v1075_v46, %v1037_v36 }
 0x229   :  { %v4156_v55 = vadd.f32 %v873_v59, %v3720_v24 }
 0x22a   :  { %5937 = vst [vmem:[#allocation20_spill] sm:$0xff] %v4150_v3  ;;  %v1039_v21 = vmul.f32 %v4150_v3, %v4150_v3  ;;  %v1112_v47 = vadd.f32 %v1111_v20, %v1036_v51  ;;  %v936_v54 = vadd.f32 %v935_v17, %v4150_v3 }
 0x22b   :  { %v877_v19 = vpop.f32.mrb[52].mxu1  ;;  %5938 = vst [vmem:[#allocation21_spill] sm:$0xff] %v4156_v55  ;;  %v1040_v16 = vmul.f32 %v4156_v55, %v4156_v55  ;;  %v973_v51 = vadd.f32 %v972_v25, %v4156_v55 }
 0x22c   :  { %v879_v6 = vpop.f32.mrb[53].mxu1  ;;  %v4162_v7 = vadd.f32 %v877_v19, %v3717_v23  ;;  %v1077_v27 = vadd.f32 %v1076_v0, %v1039_v21 }
 0x22d   :  { %v4168_v13 = vadd.f32 %v879_v6, %v3720_v24 }
 0x22e   :  { %5939 = vst [vmem:[#allocation22_spill] sm:$0xff] %v4162_v7  ;;  %v1041_v10 = vmul.f32 %v4162_v7, %v4162_v7  ;;  %v937_v46 = vadd.f32 %v936_v54, %v4162_v7 }
 0x22f   :  { %v883_v44 = vpop.f32.mrb[54].mxu1  ;;  %5940 = vst [vmem:[#allocation23_spill] sm:$0xff] %v4168_v13  ;;  %v1042_v20 = vmul.f32 %v4168_v13, %v4168_v13 }
 0x230   :  { %v885_v60 = vpop.f32.mrb[55].mxu1  ;;  %v4174_v58 = vadd.f32 %v883_v44, %v3717_v23  ;;  %v1113_v44 = vadd.f32 %v1112_v47, %v1038_v45  ;;  %v974_v47 = vadd.f32 %v973_v51, %v4168_v13  ;;  %v1078_v3 = vadd.f32 %v1077_v27, %v1041_v10 }
 0x231   :  { %v4180_v6 = vadd.f32 %v885_v60, %v3720_v24 }
 0x232   :  { %5941 = vst [vmem:[#allocation24_spill] sm:$0xff] %v4174_v58  ;;  %v1043_v36 = vmul.f32 %v4174_v58, %v4174_v58  ;;  %v1114_v45 = vadd.f32 %v1113_v44, %v1040_v16  ;;  %v938_v0 = vadd.f32 %v937_v46, %v4174_v58 }
 0x233   :  { %v889_v59 = vpop.f32.mrb[56].mxu1  ;;  %5942 = vst [vmem:[#allocation25_spill] sm:$0xff] %v4180_v6  ;;  %v1044_v25 = vmul.f32 %v4180_v6, %v4180_v6 }
 0x234   :  { %v891_v19 = vpop.f32.mrb[57].mxu1  ;;  %v4186_v8 = vadd.f32 %v889_v59, %v3717_v23  ;;  %v1115_v54 = vadd.f32 %v1114_v45, %v1042_v20  ;;  %v1079_v51 = vadd.f32 %v1078_v3, %v1043_v36 }
 0x235   :  { %v4192_v1 = vadd.f32 %v891_v19, %v3720_v24 }
 0x236   :  { %5943 = vst [vmem:[#allocation26_spill] sm:$0xff] %v4186_v8  ;;  %v1045_v21 = vmul.f32 %v4186_v8, %v4186_v8  ;;  %v939_v13 = vadd.f32 %v938_v0, %v4186_v8  ;;  %v1116_v46 = vadd.f32 %v1115_v54, %v1044_v25 }
 0x237   :  { %5944 = vst [vmem:[#allocation27_spill] sm:$0xff] %v4192_v1  ;;  %v895_v60 = vpop.f32.mrb[58].mxu1  ;;  %v1046_v16 = vmul.f32 %v4192_v1, %v4192_v1 }
 0x238   :  { %v4198_v17 = vadd.f32 %v895_v60, %v3717_v23  ;;  %v897_v59 = vpop.f32.mrb[59].mxu1  ;;  %v975_v60 = vadd.f32 %v974_v47, %v4180_v6  ;;  %v1080_v47 = vadd.f32 %v1079_v51, %v1045_v21 }
 0x239   :  { %v4204_v19 = vadd.f32 %v897_v59, %v3720_v24  ;;  %v1117_v0 = vadd.f32 %v1116_v46, %v1046_v16 }
 0x23a   :  { %5945 = vst [vmem:[#allocation28_spill] sm:$0xff] %v4198_v17  ;;  %v1047_v59 = vmul.f32 %v4198_v17, %v4198_v17  ;;  %v976_v58 = vadd.f32 %v975_v60, %v4192_v1  ;;  %v940_v3 = vadd.f32 %v939_v13, %v4198_v17 }
 0x23b   :  { %5946 = vst [vmem:[#allocation29_spill] sm:$0xff] %v4204_v19  ;;  %v901_v44 = vpop.f32.mrb[60].mxu1  ;;  %v1048_v20 = vmul.f32 %v4204_v19, %v4204_v19 }
 0x23c   :  { %v4216_v27 = vadd.f32 %v901_v44, %v3717_v23  ;;  %v903_v10 = vpop.f32.mrb[61].mxu1  ;;  %v977_v44 = vadd.f32 %v976_v58, %v4204_v19  ;;  %v1081_v60 = vadd.f32 %v1080_v47, %v1047_v59 }
 0x23d   :  { %v4222_v45 = vadd.f32 %v903_v10, %v3720_v24  ;;  %v1118_v21 = vadd.f32 %v1117_v0, %v1048_v20 }
 0x23e   :  { %5947 = vst [vmem:[#allocation30_spill] sm:$0xff] %v4216_v27  ;;  %v1049_v36 = vmul.f32 %v4216_v27, %v4216_v27  ;;  %v941_v1 = vadd.f32 %v940_v3, %v4216_v27 }
 0x23f   :  { %5948 = vst [vmem:[#allocation31_spill] sm:$0xff] %v4222_v45  ;;  %v1050_v25 = vmul.f32 %v4222_v45, %v4222_v45  ;;  %v907_v54 = vpop.f32.mrb[62].mxu1  ;;  %v978_v13 = vadd.f32 %v977_v44, %v4222_v45 }
 0x240   :  { %v4232_v8 = vadd.f32 %v907_v54, %v3717_v23  ;;  %v909_v10 = vpop.f32.mrb[63].mxu1  ;;  %v1082_v17 = vadd.f32 %v1081_v60, %v1049_v36 }
 0x241   :  { %v910_v51 = vadd.f32 %v909_v10, %v3720_v24  ;;  %v1119_v46 = vadd.f32 %v1118_v21, %v1050_v25 }
 0x242   :  { %v942_v16 = vadd.f32 %v941_v1, %v4232_v8  ;;  %v1051_v58 = vmul.f32 %v4232_v8, %v4232_v8 }
 0x243   :  { %v979_v19 = vadd.f32 %v978_v13, %v910_v51  ;;  %v1052_v59 = vmul.f32 %v910_v51, %v910_v51 }
 0x244   :  { %v943_v47 = vrot.slane %v942_v16, 4  ;;  %v1083_v3 = vadd.f32 %v1082_v17, %v1051_v58 }
 0x245   :  { %v980_v27 = vrot.slane %v979_v19, 4  ;;  %v1120_v23 = vadd.f32 %v1119_v46, %v1052_v59 }
 0x246   :  { %v944_v54 = vadd.f32 %v943_v47, %v942_v16  ;;  %v1084_v6 = vrot.slane %v1083_v3, 4 }
 0x247   :  { %v981_v20 = vadd.f32 %v980_v27, %v979_v19  ;;  %v1121_v0 = vrot.slane %v1120_v23, 4 }
 0x248   :  { %v945_v44 = vrot.slane %v944_v54, 2  ;;  %v1085_v45 = vadd.f32 %v1084_v6, %v1083_v3 }
 0x249   :  { %v982_v24 = vrot.slane %v981_v20, 2  ;;  %v1122_v36 = vadd.f32 %v1121_v0, %v1120_v23 }
 0x24a   :  { %v946_v60 = vadd.f32 %v945_v44, %v944_v54  ;;  %v1086_v1 = vrot.slane %v1085_v45, 2 }
 0x24b   :  { %v983_v10 = vadd.f32 %v982_v24, %v981_v20  ;;  %v1123_v7 = vrot.slane %v1122_v36, 2 }
 0x24c   :  { %v947_v55 = vrot.slane %v946_v60, 1  ;;  %v1087_v25 = vadd.f32 %v1086_v1, %v1085_v45 }
 0x24d   :  { %v984_v21 = vrot.slane %v983_v10, 1  ;;  %v1124_v13 = vadd.f32 %v1123_v7, %v1122_v36 }
 0x24e   :  { %v948_v4 = vadd.f32 %v947_v55, %v946_v60  ;;  %v1088_v17 = vrot.slane %v1087_v25, 1  ;;  %v3004_v55 = vmov 1966171168  }
 0x24f   :  { %v985_v58 = vadd.f32 %v984_v21, %v983_v10  ;;  %v1125_v46 = vrot.slane %v1124_v13, 1  ;;  %v1143_v7 = vunpack.c.l.s4 %v3004_v55  ;;  %v2666_v21 = vld [vmem:[%s5852_s5 + $0x2] ss:$8 sm:$0x3] }
 0x250   :  { %v987_v16 = vmul.f32 0.00390625, %v948_v4  ;;  %v1089_v59 = vadd.f32 %v1088_v17, %v1087_v25 }
 0x251   :  { %v988_v19 = vmul.f32 0.00390625, %v985_v58  ;;  %v1126_v27 = vadd.f32 %v1125_v46, %v1124_v13  ;;  %v1144_v36 = vunpack.c.0.s8 %v1143_v7 }
 0x252   :  { %v1127_v47 = vmul.f32 0.00390625, %v1089_v59  ;;  %v1129_v6 = vmul.f32 %v987_v16, %v987_v16 }
 0x253   :  { %v1128_v3 = vmul.f32 0.00390625, %v1126_v27  ;;  %v1130_v23 = vmul.f32 %v988_v19, %v988_v19  ;;  %v4240_v4 = vsub.s32 %v1144_v36, %v3446_v28 }
 0x254   :  { %v1131_v54 = vsub.f32 %v1127_v47, %v1129_v6 }
 0x255   :  { %v1132_v0 = vsub.f32 %v1128_v3, %v1130_v23  ;;  %v2667_v23 = vld [vmem:[%s5852_s5 + $0x3] ss:$8 sm:$0x3] }
 0x256   :  { %v1133_v20 = vmax.f32 %v1131_v54, 0.0 }
 0x257   :  { %v1134_v44 = vmax.f32 %v1132_v0, 0.0 }
 0x258   :  { %v1135_v24 = vadd.f32 0.8, %v1133_v20 }
 0x259   :  { %v1136_v45 = vadd.f32 0.8, %v1134_v44 }
 0x25a   :  { %2931 = vrsqrt.f32 %v1135_v24 }
 0x25b   :  { %2933 = vrsqrt.f32 %v1136_v45 }
 0x264   :  { %v2932_v60 = vpop.eup %2931 }
 0x265   :  { %v2934_v1 = vpop.eup %2933 }
 0x266   :  { %v1141_v10 = vcombine.low %v2932_v60, %v2934_v1 }
 0x268   :  { %v1148_v25 = vrot.slane %v1141_v10, %v4240_v4 }
 0x26a   :  { %v1155_v13 = vrot.slane %v1148_v25, %v4240_v4 }
 0x26c   :  { %v1157_v17 = vmul.f32 %v2666_v21, %v1155_v13 }
 0x26e   :  { %v4248_v58 = vrot.slane %v1157_v17, %v3449_v29  ;;  %v4251_v46 = vrot.slane %v1157_v17, %v3455_v31 }
 0x270   :  { %v4254_v28 = vmul.f32 %v4251_v46, %v910_v51  ;;  %v1233_v59 = vmul.f32 %v4248_v58, %v987_v16  ;;  %v1234_v27 = vmul.f32 %v4251_v46, %v988_v19  ;;  %v1169_v16 = vmul.f32 %v4248_v58, %v3746_v39 }
 0x271   :  { %v1170_v19 = vmul.f32 %v4251_v46, %v3750_v42  ;;  %v1171_v20 = vmul.f32 %v4248_v58, %v3731_v30  ;;  %v1172_v44 = vmul.f32 %v4251_v46, %v3734_v33  ;;  %v1173_v24 = vmul.f32 %v4248_v58, %v3756_v62 }
 0x272   :  { %v1237_v47 = vcombine.low %v1233_v59, %v1234_v27  ;;  %v1174_v45 = vmul.f32 %v4251_v46, %v3760_v63  ;;  %v1175_v55 = vmul.f32 %v4248_v58, %v3780_v5  ;;  %v1176_v39 = vmul.f32 %v4251_v46, %v3790_v11 }
 0x273   :  { %v1177_v42 = vmul.f32 %v4248_v58, %v3810_v22  ;;  %v1178_v30 = vmul.f32 %v4251_v46, %v3826_v48  ;;  %v4291_v33 = vmul.f32 %v4248_v58, %v4232_v8  ;;  %v1180_v21 = vmul.f32 %v4251_v46, %v3856_v18 }
 0x274   :  { %v1244_v6 = vrot.slane %v1237_v47, %v4240_v4  ;;  %v1179_v59 = vmul.f32 %v4248_v58, %v3844_v2  ;;  %v1181_v27 = vmul.f32 %v4248_v58, %v3863_v34  ;;  %v1182_v47 = vmul.f32 %v4251_v46, %v3876_v52 }
 0x276   :  { %v1251_v3 = vrot.slane %v1244_v6, %v4240_v4 }
 0x278   :  { %v1253_v54 = vsub.f32 %v2667_v23, %v1251_v3  ;;  %v1184_v3 = vmul.f32 %v4251_v46, %v3894_v9  ;;  %v1185_v9 = vmul.f32 %v4248_v58, %v3901_v15 }
 0x27a   :  { %v4264_v0 = vrot.slane %v1253_v54, %v3449_v29  ;;  %v4267_v51 = vrot.slane %v1253_v54, %v3455_v31 }
 0x27c   :  { %v1265_v62 = vadd.f32 %v4264_v0, %v1169_v16  ;;  %v1266_v63 = vadd.f32 %v4267_v51, %v1170_v19  ;;  %v1268_v7 = vadd.f32 %v4267_v51, %v1172_v44  ;;  %v1267_v5 = vadd.f32 %v4264_v0, %v1171_v20 }
 0x27d   :  { %v1270_v11 = vadd.f32 %v4267_v51, %v1174_v45  ;;  %v1269_v36 = vadd.f32 %v4264_v0, %v1173_v24  ;;  %v1272_v22 = vadd.f32 %v4267_v51, %v1176_v39  ;;  %v4301_v48 = vadd.f32 %v4264_v0, %v1175_v55 }
 0x27e   :  { %v1329_v60 = vmul.f32 0.2, %v1265_v62  ;;  %v1330_v8 = vmul.f32 0.2, %v1266_v63  ;;  %v1332_v1 = vmul.f32 0.2, %v1268_v7  ;;  %v4304_v10 = vadd.f32 %v4267_v51, %v1178_v30 }
 0x27f   :  { %v4307_v25 = vadd.f32 %v4264_v0, %v1177_v42  ;;  %v1331_v6 = vmul.f32 0.2, %v1267_v5  ;;  %v1334_v54 = vmul.f32 0.2, %v1270_v11  ;;  %v4320_v18 = vadd.f32 %v4267_v51, %v1180_v21  ;;  %v5949_v30 = vld [vmem:[#allocation2_spill] sm:$0xff] }
 0x280   :  { %v1393_v13 = vmax.f32 %v1265_v62, %v1329_v60  ;;  %v1394_v17 = vmax.f32 %v1266_v63, %v1330_v8  ;;  %v1396_v23 = vmax.f32 %v1268_v7, %v1332_v1  ;;  %v1183_v16 = vmul.f32 %v4248_v58, %v3885_v38  ;;  %v5950_v63 = vld [vmem:[#allocation3_spill] sm:$0xff] }
 0x281   :  { %v4325_v2 = vadd.f32 %v4264_v0, %v1179_v59  ;;  %v4328_v34 = vadd.f32 %v4267_v51, %v1182_v47  ;;  %v4331_v52 = vadd.f32 %v4264_v0, %v1181_v27  ;;  %v1186_v19 = vmul.f32 %v4251_v46, %v3908_v50  ;;  %v5952_v47 = vld [vmem:[#allocation5_spill] sm:$0xff] }
 0x282   :  { %1596 = vmatprep.mubr.f32.mxu0 %v1394_v17  ;;  %v1333_v20 = vmul.f32 0.2, %v1269_v36  ;;  %v4338_v38 = vadd.f32 %v4267_v51, %v1184_v3  ;;  %v1188_v44 = vmul.f32 %v4251_v46, %v3926_v41  ;;  %v1395_v24 = vmax.f32 %v1267_v5, %v1331_v6  ;;  %v5953_v3 = vld [vmem:[#allocation6_spill] sm:$0xff] }
 0x283   :  { %1597 = vmatmul.mubr.f32.vlgmr.msra.gmra.mrb[64].mxu0 %v1393_v13  ;;  %v4343_v45 = vadd.f32 %v4264_v0, %v1183_v16  ;;  %v1398_v55 = vmax.f32 %v1270_v11, %v1334_v54  ;;  %v1336_v39 = vmul.f32 0.2, %v1272_v22  ;;  %v4346_v42 = vadd.f32 %v4267_v51, %v1186_v19  ;;  %v5951_v11 = vld [vmem:[#allocation4_spill] sm:$0xff] }
 0x284   :  { %1602 = vmatprep.mubr.f32.mxu0 %v1396_v23  ;;  %v4349_v15 = vadd.f32 %v4264_v0, %v1185_v9  ;;  %v1187_v50 = vmul.f32 %v4248_v58, %v3917_v35  ;;  %v1189_v62 = vmul.f32 %v4248_v58, %v5949_v30  ;;  %v1190_v41 = vmul.f32 %v4251_v46, %v3940_v57 }
 0x285   :  { %v1191_v7 = vmul.f32 %v4248_v58, %v5950_v63  ;;  %v1192_v5 = vmul.f32 %v4251_v46, %v3958_v32  ;;  %v1193_v60 = vmul.f32 %v4248_v58, %v5951_v11  ;;  %v1397_v8 = vmax.f32 %v1269_v36, %v1333_v20  ;;  %v5954_v20 = vld [vmem:[#allocation8_spill] sm:$0xff]  ;;  %v5956_v63 = vld [vmem:[#allocation10_spill] sm:$0xff] }
 0x286   :  { %v4364_v35 = vadd.f32 %v4267_v51, %v1188_v44  ;;  %v1335_v1 = vmul.f32 0.2, %v4301_v48  ;;  %v4368_v21 = vadd.f32 %v4264_v0, %v1187_v50  ;;  %v4371_v57 = vadd.f32 %v4267_v51, %v1190_v41  ;;  %v5955_v50 = vld [vmem:[#allocation7_spill] sm:$0xff] }
 0x287   :  { %1603 = vmatmul.mubr.f32.gmra.mrb[66].mxu0 %v1395_v24  ;;  %v4374_v13 = vadd.f32 %v4264_v0, %v1189_v62  ;;  %v1194_v32 = vmul.f32 %v4251_v46, %v3972_v61  ;;  %v1400_v17 = vmax.f32 %v1272_v22, %v1336_v39  ;;  %v1338_v36 = vmul.f32 0.2, %v4304_v10 }
 0x288   :  { %1608 = vmatprep.mubr.f32.mxu0 %v1398_v55  ;;  %v4380_v59 = vadd.f32 %v4267_v51, %v1192_v5  ;;  %v4383_v27 = vadd.f32 %v4264_v0, %v1191_v7  ;;  %v1195_v6 = vmul.f32 %v4248_v58, %v5952_v47  ;;  %v1196_v23 = vmul.f32 %v4251_v46, %v5953_v3  ;;  %v5960_v3 = vld [vmem:[#allocation13_spill] sm:$0xff] }
 0x289   :  { %v4390_v54 = vadd.f32 %v4267_v51, %v1194_v32  ;;  %v4393_v61 = vadd.f32 %v4264_v0, %v1193_v60  ;;  %v1197_v22 = vmul.f32 %v4248_v58, %v3997_v12  ;;  %v1198_v16 = vmul.f32 %v4251_v46, %v4004_v14  ;;  %v5957_v32 = vld [vmem:[#allocation9_spill] sm:$0xff] }
 0x28a   :  { %v1399_v9 = vmax.f32 %v4301_v48, %v1335_v1  ;;  %v1337_v19 = vmul.f32 0.2, %v4307_v25  ;;  %v1200_v44 = vmul.f32 %v4251_v46, %v5954_v20  ;;  %v1402_v24 = vmax.f32 %v4304_v10, %v1338_v36  ;;  %v5958_v36 = vld [vmem:[#allocation11_spill] sm:$0xff] }
 0x28b   :  { %1609 = vmatmul.mubr.f32.gmra.mrb[68].mxu0 %v1397_v8  ;;  %v1340_v55 = vmul.f32 0.2, %v4320_v18  ;;  %v4406_v39 = vadd.f32 %v4267_v51, %v1196_v23  ;;  %v1199_v12 = vmul.f32 %v4248_v58, %v5955_v50  ;;  %v4411_v14 = vadd.f32 %v4264_v0, %v1195_v6  ;;  %v5959_v6 = vld [vmem:[#allocation12_spill] sm:$0xff] }
 0x28c   :  { %1614 = vmatprep.mubr.f32.mxu0 %v1400_v17  ;;  %v4414_v48 = vadd.f32 %v4267_v51, %v1198_v16  ;;  %v4417_v30 = vadd.f32 %v4264_v0, %v1197_v22  ;;  %v1201_v10 = vmul.f32 %v4248_v58, %v4029_v37  ;;  %v1202_v62 = vmul.f32 %v4251_v46, %v4036_v43 }
 0x28d   :  { %v4424_v41 = vadd.f32 %v4267_v51, %v1200_v44  ;;  %v1204_v7 = vmul.f32 %v4251_v46, %v5956_v63  ;;  %v1401_v5 = vmax.f32 %v4307_v25, %v1337_v19  ;;  %v1339_v11 = vmul.f32 0.2, %v4325_v2 }
 0x28e   :  { %v4431_v60 = vadd.f32 %v4264_v0, %v1199_v12  ;;  %v1404_v8 = vmax.f32 %v4320_v18, %v1340_v55  ;;  %v1342_v37 = vmul.f32 0.2, %v4328_v34  ;;  %v4436_v43 = vadd.f32 %v4267_v51, %v1202_v62  ;;  %v5962_v62 = vld [vmem:[#allocation15_spill] sm:$0xff] }
 0x28f   :  { %1615 = vmatmul.mubr.f32.gmra.mrb[70].mxu0 %v1399_v9  ;;  %v4439_v1 = vadd.f32 %v4264_v0, %v1201_v10  ;;  %v1203_v17 = vmul.f32 %v4248_v58, %v5957_v32  ;;  %v1205_v25 = vmul.f32 %v4248_v58, %v4057_v40  ;;  %v1206_v47 = vmul.f32 %v4251_v46, %v5958_v36 }
 0x290   :  { %1620 = vmatprep.mubr.f32.mxu0 %v1402_v24  ;;  %v1207_v18 = vmul.f32 %v4248_v58, %v5959_v6  ;;  %v1208_v23 = vmul.f32 %v4251_v46, %v5960_v3  ;;  %v1209_v22 = vmul.f32 %v4248_v58, %v4085_v26  ;;  %v1341_v16 = vmul.f32 0.2, %v4331_v52  ;;  %v5961_v24 = vld [vmem:[#allocation14_spill] sm:$0xff]  ;;  %v5966_v3 = vld [vmem:[#allocation19_spill] sm:$0xff] }
 0x291   :  { %v4455_v9 = vadd.f32 %v4267_v51, %v1204_v7  ;;  %v1403_v40 = vmax.f32 %v4325_v2, %v1339_v11  ;;  %v4459_v19 = vadd.f32 %v4264_v0, %v1203_v17  ;;  %v4462_v20 = vadd.f32 %v4267_v51, %v1206_v47  ;;  %v5963_v11 = vld [vmem:[#allocation16_spill] sm:$0xff]  ;;  %v5964_v47 = vld [vmem:[#allocation17_spill] sm:$0xff] }
 0x292   :  { %v4465_v44 = vadd.f32 %v4264_v0, %v1205_v25  ;;  %v1210_v26 = vmul.f32 %v4251_v46, %v5961_v24  ;;  %v1406_v55 = vmax.f32 %v4328_v34, %v1342_v37  ;;  %v1344_v50 = vmul.f32 0.2, %v4338_v38 }
 0x293   :  { %1621 = vmatmul.mubr.f32.gmra.mrb[72].mxu0 %v1401_v5  ;;  %v4472_v12 = vadd.f32 %v4267_v51, %v1208_v23  ;;  %v4475_v2 = vadd.f32 %v4264_v0, %v1207_v18  ;;  %v1211_v10 = vmul.f32 %v4248_v58, %v4099_v49  ;;  %v1212_v63 = vmul.f32 %v4251_v46, %v5962_v62 }
 0x294   :  { %1626 = vmatprep.mubr.f32.mxu0 %v1404_v8  ;;  %v4482_v7 = vadd.f32 %v4267_v51, %v1210_v26  ;;  %v4485_v34 = vadd.f32 %v4264_v0, %v1209_v22  ;;  %v1213_v5 = vmul.f32 %v4248_v58, %v4113_v56  ;;  %v1214_v8 = vmul.f32 %v4251_v46, %v5963_v11 }
 0x295   :  { %v1405_v37 = vmax.f32 %v4331_v52, %v1341_v16  ;;  %v1343_v49 = vmul.f32 0.2, %v4343_v45  ;;  %v1216_v32 = vmul.f32 %v4251_v46, %v4132_v53  ;;  %v1408_v17 = vmax.f32 %v4338_v38, %v1344_v50  ;;  %v5965_v53 = vld [vmem:[#allocation18_spill] sm:$0xff] }
 0x296   :  { %v1346_v25 = vmul.f32 0.2, %v4346_v42  ;;  %v4498_v36 = vadd.f32 %v4267_v51, %v1212_v63  ;;  %v1215_v56 = vmul.f32 %v4248_v58, %v5964_v47  ;;  %v4503_v6 = vadd.f32 %v4264_v0, %v1211_v10  ;;  %v5973_v47 = vld [vmem:[#allocation26_spill] sm:$0xff] }
 0x297   :  { %1627 = vmatmul.mubr.f32.gmra.mrb[74].mxu0 %v1403_v40  ;;  %v4506_v52 = vadd.f32 %v4267_v51, %v1214_v8  ;;  %v4509_v18 = vadd.f32 %v4264_v0, %v1213_v5  ;;  %v1217_v38 = vmul.f32 %v4248_v58, %v5965_v53  ;;  %v1218_v23 = vmul.f32 %v4251_v46, %v5966_v3  ;;  %v5967_v40 = vld [vmem:[#allocation21_spill] sm:$0xff]  ;;  %v5968_v5 = vld [vmem:[#allocation20_spill] sm:$0xff]  ;;  %v5969_v8 = vld [vmem:[#allocation22_spill] sm:$0xff] }
 0x298   :  { %1632 = vmatprep.mubr.f32.mxu0 %v1406_v55  ;;  %v1345_v22 = vmul.f32 0.2, %v4349_v15  ;;  %v4517_v16 = vadd.f32 %v4267_v51, %v1216_v32  ;;  %v1220_v24 = vmul.f32 %v4251_v46, %v5967_v40  ;;  %v1407_v26 = vmax.f32 %v4343_v45, %v1343_v49  ;;  %v5970_v45 = vld [vmem:[#allocation23_spill] sm:$0xff]  ;;  %v5971_v32 = vld [vmem:[#allocation24_spill] sm:$0xff] }
 0x299   :  { %v4523_v55 = vadd.f32 %v4264_v0, %v1215_v56  ;;  %v1410_v50 = vmax.f32 %v4346_v42, %v1346_v25  ;;  %v1348_v10 = vmul.f32 0.2, %v4364_v35  ;;  %v4528_v62 = vadd.f32 %v4267_v51, %v1218_v23 }
 0x29a   :  { %v4531_v63 = vadd.f32 %v4264_v0, %v1217_v38  ;;  %v1219_v11 = vmul.f32 %v4248_v58, %v5968_v5  ;;  %v1222_v49 = vmul.f32 %v4251_v46, %v5970_v45  ;;  %v1223_v42 = vmul.f32 %v4248_v58, %v5971_v32  ;;  %v5974_v5 = vld [vmem:[#allocation27_spill] sm:$0xff] }
 0x29b   :  { %1633 = vmatmul.mubr.f32.gmra.mrb[76].mxu0 %v1405_v37  ;;  %v1221_v37 = vmul.f32 %v4248_v58, %v5969_v8  ;;  %v1225_v56 = vmul.f32 %v4248_v58, %v5973_v47  ;;  %v1409_v53 = vmax.f32 %v4349_v15, %v1345_v22  ;;  %v4547_v38 = vadd.f32 %v4267_v51, %v1220_v24 }
 0x29c   :  { %1638 = vmatprep.mubr.f32.mxu0 %v1408_v17  ;;  %v5972_v17 = vld [vmem:[#allocation25_spill] sm:$0xff]  ;;  %v1347_v3 = vmul.f32 0.2, %v4368_v21  ;;  %v4551_v23 = vadd.f32 %v4264_v0, %v1219_v11  ;;  %v4554_v40 = vadd.f32 %v4267_v51, %v1222_v49  ;;  %v1226_v8 = vmul.f32 %v4251_v46, %v5974_v5  ;;  %v5975_v11 = vld [vmem:[#allocation28_spill] sm:$0xff] }
 0x29d   :  { %v1224_v25 = vmul.f32 %v4251_v46, %v5972_v17  ;;  %v1350_v15 = vmul.f32 0.2, %v4371_v57  ;;  %v4567_v24 = vadd.f32 %v4264_v0, %v1223_v42  ;;  %v1227_v45 = vmul.f32 %v4248_v58, %v5975_v11  ;;  %v5976_v49 = vld [vmem:[#allocation29_spill] sm:$0xff] }
 0x29e   :  { %v4574_v32 = vadd.f32 %v4267_v51, %v1226_v8  ;;  %v1411_v47 = vmax.f32 %v4368_v21, %v1347_v3  ;;  %v4601_v21 = vadd.f32 %v4267_v51, %v4254_v28  ;;  %v1351_v3 = vmul.f32 0.2, %v4383_v27 }
 0x29f   :  { %1639 = vmatmul.mubr.f32.gmra.mrb[78].mxu0 %v1407_v26  ;;  %v4557_v26 = vadd.f32 %v4264_v0, %v1221_v37  ;;  %v4564_v22 = vadd.f32 %v4267_v51, %v1224_v25  ;;  %v1228_v37 = vmul.f32 %v4251_v46, %v5976_v49  ;;  %v5978_v25 = vld [vmem:[#allocation31_spill] sm:$0xff]  ;;  %v1414_v5 = vmax.f32 %v4371_v57, %v1350_v15 }
 0x2a0   :  { %1644 = vmatprep.mubr.f32.mxu0 %v1410_v50  ;;  %v1412_v50 = vmax.f32 %v4364_v35, %v1348_v10  ;;  %v4577_v35 = vadd.f32 %v4264_v0, %v1225_v56  ;;  %v5977_v10 = vld [vmem:[#allocation30_spill] sm:$0xff]  ;;  %v1230_v42 = vmul.f32 %v4251_v46, %v5978_v25  ;;  %v4591_v56 = vadd.f32 %v4264_v0, %v1227_v45 }
 0x2a1   :  { %v1229_v17 = vmul.f32 %v4248_v58, %v5977_v10  ;;  %v4588_v8 = vadd.f32 %v4267_v51, %v1228_v37  ;;  %v4607_v15 = vadd.f32 %v4264_v0, %v4291_v33  ;;  %v1354_v45 = vmul.f32 0.2, %v4390_v54 }
 0x2a2   :  { %v4594_v58 = vadd.f32 %v4267_v51, %v1230_v42  ;;  %v1415_v49 = vmax.f32 %v4383_v27, %v1351_v3  ;;  %v1353_v37 = vmul.f32 0.2, %v4393_v61  ;;  %v1356_v51 = vmul.f32 0.2, %v4406_v39 }
 0x2a3   :  { %1645 = vmatmul.mubr.f32.gmra.mrb[80].mxu0 %v1409_v53  ;;  %v1349_v53 = vmul.f32 0.2, %v4374_v13  ;;  %v4597_v46 = vadd.f32 %v4264_v0, %v1229_v17  ;;  %v1418_v28 = vmax.f32 %v4390_v54, %v1354_v45  ;;  %v1355_v0 = vmul.f32 0.2, %v4411_v14 }
 0x2a4   :  { %1650 = vmatprep.mubr.f32.mxu0 %v1412_v50  ;;  %v1352_v50 = vmul.f32 0.2, %v4380_v59  ;;  %v1420_v33 = vmax.f32 %v4406_v39, %v1356_v51  ;;  %v1357_v10 = vmul.f32 0.2, %v4417_v30  ;;  %v1360_v17 = vmul.f32 0.2, %v4424_v41 }
 0x2a5   :  { %v1413_v57 = vmax.f32 %v4374_v13, %v1349_v53  ;;  %v1417_v13 = vmax.f32 %v4393_v61, %v1353_v37  ;;  %v1419_v27 = vmax.f32 %v4411_v14, %v1355_v0  ;;  %v1359_v25 = vmul.f32 0.2, %v4431_v60 }
 0x2a6   :  { %v1416_v11 = vmax.f32 %v4380_v59, %v1352_v50  ;;  %v1358_v59 = vmul.f32 0.2, %v4414_v48  ;;  %v1421_v61 = vmax.f32 %v4417_v30, %v1357_v10  ;;  %v1424_v39 = vmax.f32 %v4424_v41, %v1360_v17 }
 0x2a7   :  { %1651 = vmatmul.mubr.f32.gmra.mrb[82].mxu0 %v1411_v47  ;;  %v1362_v42 = vmul.f32 0.2, %v4436_v43  ;;  %v1423_v14 = vmax.f32 %v4431_v60, %v1359_v25  ;;  %v1361_v47 = vmul.f32 0.2, %v4439_v1  ;;  %v1364_v53 = vmul.f32 0.2, %v4455_v9 }
 0x2a8   :  { %1656 = vmatprep.mubr.f32.mxu0 %v1414_v5  ;;  %v1422_v54 = vmax.f32 %v4414_v48, %v1358_v59  ;;  %v1363_v5 = vmul.f32 0.2, %v4459_v19  ;;  %v1366_v50 = vmul.f32 0.2, %v4462_v20  ;;  %v1368_v3 = vmul.f32 0.2, %v4472_v12 }
 0x2a9   :  { %v1426_v48 = vmax.f32 %v4436_v43, %v1362_v42  ;;  %v1425_v30 = vmax.f32 %v4439_v1, %v1361_v47  ;;  %v1428_v41 = vmax.f32 %v4455_v9, %v1364_v53  ;;  %v1370_v45 = vmul.f32 0.2, %v4482_v7 }
 0x2aa   :  { %v1427_v60 = vmax.f32 %v4459_v19, %v1363_v5  ;;  %v1430_v43 = vmax.f32 %v4462_v20, %v1366_v50  ;;  %v1432_v9 = vmax.f32 %v4472_v12, %v1368_v3  ;;  %v1372_v37 = vmul.f32 0.2, %v4498_v36  ;;  %v2338_v3 = vld [vmem:[%s5854_s4 + $0x28] sm:$0xff] }
 0x2ab   :  { %1657 = vmatmul.mubr.f32.gmra.mrb[84].mxu0 %v1413_v57  ;;  %v1365_v57 = vmul.f32 0.2, %v4465_v44  ;;  %v1434_v20 = vmax.f32 %v4482_v7, %v1370_v45  ;;  %v1374_v51 = vmul.f32 0.2, %v4506_v52  ;;  %v1376_v0 = vmul.f32 0.2, %v4517_v16 }
 0x2ac   :  { %1662 = vmatprep.mubr.f32.mxu0 %v1416_v11  ;;  %v1367_v11 = vmul.f32 0.2, %v4475_v2  ;;  %v1436_v12 = vmax.f32 %v4498_v36, %v1372_v37  ;;  %v1378_v59 = vmul.f32 0.2, %v4528_v62  ;;  %v1380_v10 = vmul.f32 0.2, %v4547_v38 }
 0x2ad   :  { %v1429_v1 = vmax.f32 %v4465_v44, %v1365_v57  ;;  %v1438_v7 = vmax.f32 %v4506_v52, %v1374_v51  ;;  %v1440_v36 = vmax.f32 %v4517_v16, %v1376_v0  ;;  %v1382_v17 = vmul.f32 0.2, %v4554_v40  ;;  %v2343_v37 = vld [vmem:[%s5854_s4 + $0x50] sm:$0xff]  ;;  %v2346_v51 = vld [vmem:[%s5854_s4 + $0x68] sm:$0xff] }
 0x2ae   :  { %v1431_v19 = vmax.f32 %v4475_v2, %v1367_v11  ;;  %v1442_v52 = vmax.f32 %v4528_v62, %v1378_v59  ;;  %v1444_v16 = vmax.f32 %v4547_v38, %v1380_v10  ;;  %v1384_v25 = vmul.f32 0.2, %v4564_v22  ;;  %v2339_v11 = vld [vmem:[%s5854_s4 + $0x30] sm:$0xff] }
 0x2af   :  { %1663 = vmatmul.mubr.f32.gmra.mrb[86].mxu0 %v1415_v49  ;;  %v1369_v49 = vmul.f32 0.2, %v4485_v34  ;;  %v1446_v62 = vmax.f32 %v4554_v40, %v1382_v17  ;;  %v1386_v42 = vmul.f32 0.2, %v4574_v32  ;;  %v1388_v47 = vmul.f32 0.2, %v4588_v8 }
 0x2b0   :  { %1668 = vmatprep.mubr.f32.mxu0 %v1418_v28  ;;  %v1371_v28 = vmul.f32 0.2, %v4503_v6  ;;  %v1448_v38 = vmax.f32 %v4564_v22, %v1384_v25  ;;  %v1390_v53 = vmul.f32 0.2, %v4594_v58  ;;  %v1392_v5 = vmul.f32 0.2, %v4601_v21 }
 0x2b1   :  { %v1433_v44 = vmax.f32 %v4485_v34, %v1369_v49  ;;  %v1450_v40 = vmax.f32 %v4574_v32, %v1386_v42  ;;  %v1452_v22 = vmax.f32 %v4588_v8, %v1388_v47  ;;  %v2342_v49 = vld [vmem:[%s5854_s4 + $0x48] sm:$0xff] }
 0x2b2   :  { %v1435_v2 = vmax.f32 %v4503_v6, %v1371_v28  ;;  %v1454_v32 = vmax.f32 %v4594_v58, %v1390_v53  ;;  %v1456_v8 = vmax.f32 %v4601_v21, %v1392_v5  ;;  %v2333_v58 = vld [vmem:[%s5854_s4] sm:$0xff]  ;;  %v2335_v21 = vld [vmem:[%s5854_s4 + $0x10] sm:$0xff] }
 0x2b3   :  { %1669 = vmatmul.mubr.f32.gmra.mrb[88].mxu0 %v1417_v13  ;;  %v1373_v13 = vmul.f32 0.2, %v4509_v18 }
 0x2b4   :  { %1674 = vmatprep.mubr.f32.mxu0 %v1420_v33  ;;  %v1375_v33 = vmul.f32 0.2, %v4523_v55 }
 0x2b5   :  { %v1437_v34 = vmax.f32 %v4509_v18, %v1373_v13  ;;  %v2347_v13 = vld [vmem:[%s5854_s4 + $0x70] sm:$0xff] }
 0x2b6   :  { %v1439_v6 = vmax.f32 %v4523_v55, %v1375_v33 }
 0x2b7   :  { %1675 = vmatmul.mubr.f32.gmra.mrb[90].mxu0 %v1419_v27  ;;  %v1377_v27 = vmul.f32 0.2, %v4531_v63 }
 0x2b8   :  { %1680 = vmatprep.mubr.f32.mxu0 %v1422_v54  ;;  %v1379_v54 = vmul.f32 0.2, %v4551_v23 }
 0x2b9   :  { %v1441_v18 = vmax.f32 %v4531_v63, %v1377_v27 }
 0x2ba   :  { %v1443_v55 = vmax.f32 %v4551_v23, %v1379_v54 }
 0x2bb   :  { %1681 = vmatmul.mubr.f32.gmra.mrb[92].mxu0 %v1421_v61  ;;  %v1381_v61 = vmul.f32 0.2, %v4557_v26 }
 0x2bc   :  { %1686 = vmatprep.mubr.f32.mxu0 %v1424_v39  ;;  %v1383_v39 = vmul.f32 0.2, %v4567_v24 }
 0x2bd   :  { %v1445_v63 = vmax.f32 %v4557_v26, %v1381_v61 }
 0x2be   :  { %v1447_v23 = vmax.f32 %v4567_v24, %v1383_v39 }
 0x2bf   :  { %1687 = vmatmul.mubr.f32.gmra.mrb[94].mxu0 %v1423_v14  ;;  %v1385_v14 = vmul.f32 0.2, %v4577_v35 }
 0x2c0   :  { %1692 = vmatprep.mubr.f32.mxu0 %v1426_v48  ;;  %v1387_v48 = vmul.f32 0.2, %v4591_v56 }
 0x2c1   :  { %v1449_v26 = vmax.f32 %v4577_v35, %v1385_v14 }
 0x2c2   :  { %v1451_v24 = vmax.f32 %v4591_v56, %v1387_v48  ;;  %v5887_v56 = vmov 0.0|0.0   ;;  %v2668_v48 = vld [vmem:[%s5852_s5 + $0x4] ss:$8 sm:$0x3] }
 0x2c3   :  { %1693 = vmatmul.mubr.f32.gmra.mrb[96].mxu0 %v1425_v30  ;;  %v1389_v30 = vmul.f32 0.2, %v4597_v46  ;;  %2896 = vmatprep.subr.bf16.mxu1 %v5887_v56  ;;  %v4785_v53 = vrot.slane %v2668_v48, %v3449_v29 }
 0x2c4   :  { %1698 = vmatprep.mubr.f32.mxu0 %v1428_v41  ;;  %v1391_v41 = vmul.f32 0.2, %v4607_v15  ;;  %2848 = vmatprep.subr.bf16.mxu0 %v5887_v56 }
 0x2c5   :  { %v1453_v35 = vmax.f32 %v4597_v46, %v1389_v30  ;;  %v2334_v46 = vld [vmem:[%s5854_s4 + $0x8] sm:$0xff] }
 0x2c6   :  { %v1455_v50 = vmax.f32 %v4607_v15, %v1391_v41  ;;  %v2336_v15 = vld [vmem:[%s5854_s4 + $0x18] sm:$0xff] }
 0x2c7   :  { %1699 = vmatmul.mubr.f32.gmra.mrb[98].mxu0 %v1427_v60  ;;  %v2849_v60 = vpack.c.bf16 %v2334_v46, %v2333_v58  ;;  %v2852_v57 = vpack.c.bf16 %v2336_v15, %v2335_v21 }
 0x2c8   :  { %1704 = vmatprep.mubr.f32.mxu0 %v1430_v43  ;;  %v2337_v43 = vld [vmem:[%s5854_s4 + $0x20] sm:$0xff] }
 0x2c9   :  { %2912 = vmatpush1.bf16.msra.mxu1 %v2849_v60  ;;  %2850 = vmatpush1.bf16.msra.mxu0 %v2849_v60 }
 0x2ca   :  { %2897 = vmatprep.subr.bf16.mxu1 %v5887_v56  ;;  %2851 = vmatprep.subr.bf16.mxu0 %v5887_v56 }
 0x2cb   :  { %1705 = vmatmul.mubr.f32.gmra.mrb[100].mxu0 %v1429_v1  ;;  %v2855_v1 = vpack.c.bf16 %v2338_v3, %v2337_v43 }
 0x2cc   :  { %1710 = vmatprep.mubr.f32.mxu0 %v1432_v9  ;;  %v2340_v9 = vld [vmem:[%s5854_s4 + $0x38] sm:$0xff] }
 0x2cd   :  { %2913 = vmatpush1.bf16.msra.mxu1 %v2852_v57  ;;  %2853 = vmatpush1.bf16.msra.mxu0 %v2852_v57  ;;  %v2858_v45 = vpack.c.bf16 %v2340_v9, %v2339_v11 }
 0x2ce   :  { %2898 = vmatprep.subr.bf16.mxu1 %v5887_v56  ;;  %2854 = vmatprep.subr.bf16.mxu0 %v5887_v56 }
 0x2cf   :  { %1711 = vmatmul.mubr.f32.gmra.mrb[102].mxu0 %v1431_v19  ;;  %v2341_v19 = vld [vmem:[%s5854_s4 + $0x40] sm:$0xff] }
 0x2d0   :  { %1716 = vmatprep.mubr.f32.mxu0 %v1434_v20  ;;  %v2861_v20 = vpack.c.bf16 %v2342_v49, %v2341_v19 }
 0x2d1   :  { %2914 = vmatpush1.bf16.msra.mxu1 %v2855_v1  ;;  %2856 = vmatpush1.bf16.msra.mxu0 %v2855_v1 }
 0x2d2   :  { %2899 = vmatprep.subr.bf16.mxu1 %v5887_v56  ;;  %2857 = vmatprep.subr.bf16.mxu0 %v5887_v56 }
 0x2d3   :  { %1717 = vmatmul.mubr.f32.gmra.mrb[104].mxu0 %v1433_v44  ;;  %v2344_v44 = vld [vmem:[%s5854_s4 + $0x58] sm:$0xff] }
 0x2d4   :  { %1722 = vmatprep.mubr.f32.mxu0 %v1436_v12  ;;  %v2864_v28 = vpack.c.bf16 %v2344_v44, %v2343_v37  ;;  %v2345_v12 = vld [vmem:[%s5854_s4 + $0x60] sm:$0xff] }
 0x2d5   :  { %2915 = vmatpush1.bf16.msra.mxu1 %v2858_v45  ;;  %2859 = vmatpush1.bf16.msra.mxu0 %v2858_v45 }
 0x2d6   :  { %2900 = vmatprep.subr.bf16.mxu1 %v5887_v56  ;;  %2860 = vmatprep.subr.bf16.mxu0 %v5887_v56 }
 0x2d7   :  { %1723 = vmatmul.mubr.f32.gmra.mrb[106].mxu0 %v1435_v2  ;;  %v2867_v2 = vpack.c.bf16 %v2346_v51, %v2345_v12 }
 0x2d8   :  { %1728 = vmatprep.mubr.f32.mxu0 %v1438_v7  ;;  %v2348_v7 = vld [vmem:[%s5854_s4 + $0x78] sm:$0xff] }
 0x2d9   :  { %2916 = vmatpush1.bf16.msra.mxu1 %v2861_v20  ;;  %2862 = vmatpush1.bf16.msra.mxu0 %v2861_v20  ;;  %v2870_v0 = vpack.c.bf16 %v2348_v7, %v2347_v13 }
 0x2da   :  { %2901 = vmatprep.subr.bf16.mxu1 %v5887_v56  ;;  %2863 = vmatprep.subr.bf16.mxu0 %v5887_v56 }
 0x2db   :  { %1729 = vmatmul.mubr.f32.gmra.mrb[108].mxu0 %v1437_v34 }
 0x2dc   :  { %1734 = vmatprep.mubr.f32.mxu0 %v1440_v36 }
 0x2dd   :  { %2917 = vmatpush1.bf16.msra.mxu1 %v2864_v28  ;;  %2865 = vmatpush1.bf16.msra.mxu0 %v2864_v28 }
 0x2de   :  { %2902 = vmatprep.subr.bf16.mxu1 %v5887_v56  ;;  %2866 = vmatprep.subr.bf16.mxu0 %v5887_v56 }
 0x2df   :  { %1735 = vmatmul.mubr.f32.gmra.mrb[110].mxu0 %v1439_v6 }
 0x2e0   :  { %1740 = vmatprep.mubr.f32.mxu0 %v1442_v52 }
 0x2e1   :  { %2918 = vmatpush1.bf16.msra.mxu1 %v2867_v2  ;;  %2868 = vmatpush1.bf16.msra.mxu0 %v2867_v2 }
 0x2e2   :  { %2903 = vmatprep.subr.bf16.mxu1 %v5887_v56  ;;  %2869 = vmatprep.subr.bf16.mxu0 %v5887_v56 }
 0x2e3   :  { %1741 = vmatmul.mubr.f32.gmra.mrb[112].mxu0 %v1441_v18 }
 0x2e4   :  { %1746 = vmatprep.mubr.f32.mxu0 %v1444_v16 }
 0x2e5   :  { %2919 = vmatpush1.bf16.msra.mxu1 %v2870_v0  ;;  %2871 = vmatpush1.bf16.msra.mxu0 %v2870_v0 }
 0x2e6   :  { %2904 = vmatprep.subr.bf16.mxu1 %v5887_v56  ;;  %2872 = vmatprep.subr.bf16.mxu0 %v5887_v56 }
 0x2e7   :  { %1747 = vmatmul.mubr.f32.gmra.mrb[114].mxu0 %v1443_v55 }
 0x2e8   :  { %1752 = vmatprep.mubr.f32.mxu0 %v1446_v62 }
 0x2eb   :  { %1753 = vmatmul.mubr.f32.gmra.mrb[116].mxu0 %v1445_v63 }
 0x2ec   :  { %1758 = vmatprep.mubr.f32.mxu0 %v1448_v38 }
 0x2ef   :  { %1759 = vmatmul.mubr.f32.gmra.mrb[118].mxu0 %v1447_v23 }
 0x2f0   :  { %1764 = vmatprep.mubr.f32.mxu0 %v1450_v40 }
 0x2f3   :  { %1765 = vmatmul.mubr.f32.gmra.mrb[120].mxu0 %v1449_v26 }
 0x2f4   :  { %1770 = vmatprep.mubr.f32.mxu0 %v1452_v22 }
 0x2f7   :  { %1771 = vmatmul.mubr.f32.gmra.mrb[122].mxu0 %v1451_v24  ;;  %v4788_v24 = vrot.slane %v2668_v48, %v3455_v31 }
 0x2f8   :  { %1776 = vmatprep.mubr.f32.mxu0 %v1454_v32 }
 0x2fb   :  { %1777 = vmatmul.mubr.f32.gmra.mrb[124].mxu0 %v1453_v35 }
 0x2fc   :  { %1782 = vmatprep.mubr.f32.mxu0 %v1456_v8 }
 0x2ff   :  { %1783 = vmatmul.mubr.f32.gmra.mrb[126].mxu0 %v1455_v50 }
 0x356   :  { %v1598_v34 = vpop.f32.mrb[64].mxu0 }
 0x357   :  { %v1600_v33 = vpop.f32.mrb[65].mxu0  ;;  %v4801_v41 = vadd.f32 %v1598_v34, %v4785_v53 }
 0x358   :  { %v4804_v8 = vadd.f32 %v1600_v33, %v4788_v24 }
 0x359   :  { %v1865_v3 = vmul.f32 %v4801_v41, %v4801_v41 }
 0x35a   :  { %v1604_v36 = vpop.f32.mrb[66].mxu0  ;;  %v1866_v1 = vmul.f32 %v4804_v8, %v4804_v8 }
 0x35b   :  { %v1606_v59 = vpop.f32.mrb[67].mxu0  ;;  %v4795_v5 = vadd.f32 %v1604_v36, %v4785_v53 }
 0x35c   :  { %v4798_v35 = vadd.f32 %v1606_v59, %v4788_v24 }
 0x35d   :  { %v1867_v21 = vmul.f32 %v4795_v5, %v4795_v5  ;;  %v1789_v45 = vadd.f32 %v4795_v5, %v4801_v41 }
 0x35e   :  { %v1610_v6 = vpop.f32.mrb[68].mxu0  ;;  %v1868_v15 = vmul.f32 %v4798_v35, %v4798_v35  ;;  %v1826_v28 = vadd.f32 %v4798_v35, %v4804_v8 }
 0x35f   :  { %v1612_v27 = vpop.f32.mrb[69].mxu0  ;;  %v4807_v50 = vadd.f32 %v1610_v6, %v4785_v53  ;;  %v1929_v44 = vadd.f32 %v1867_v21, %v1865_v3  ;;  %v2350_v3 = vld [vmem:[%s5854_s4 + $0x88] sm:$0xff] }
 0x360   :  { %v4812_v46 = vadd.f32 %v1612_v27, %v4788_v24  ;;  %v1966_v12 = vadd.f32 %v1868_v15, %v1866_v1  ;;  %v2349_v15 = vld [vmem:[%s5854_s4 + $0x80] sm:$0xff] }
 0x361   :  { %v1869_v11 = vmul.f32 %v4807_v50, %v4807_v50  ;;  %v1790_v51 = vadd.f32 %v1789_v45, %v4807_v50 }
 0x362   :  { %v1616_v52 = vpop.f32.mrb[70].mxu0  ;;  %v1870_v19 = vmul.f32 %v4812_v46, %v4812_v46  ;;  %v1827_v0 = vadd.f32 %v1826_v28, %v4812_v46 }
 0x363   :  { %v1618_v10 = vpop.f32.mrb[71].mxu0  ;;  %v4821_v57 = vadd.f32 %v1616_v52, %v4785_v53  ;;  %v1930_v7 = vadd.f32 %v1929_v44, %v1869_v11  ;;  %v2352_v44 = vld [vmem:[%s5854_s4 + $0x98] sm:$0xff] }
 0x364   :  { %v4824_v43 = vadd.f32 %v1618_v10, %v4788_v24  ;;  %v1967_v59 = vadd.f32 %v1966_v12, %v1870_v19  ;;  %v2873_v19 = vpack.c.bf16 %v2350_v3, %v2349_v15 }
 0x365   :  { %v1871_v2 = vmul.f32 %v4821_v57, %v4821_v57  ;;  %v1791_v6 = vadd.f32 %v1790_v51, %v4821_v57 }
 0x366   :  { %v1622_v18 = vpop.f32.mrb[72].mxu0  ;;  %v1872_v13 = vmul.f32 %v4824_v43, %v4824_v43  ;;  %2920 = vmatpush1.bf16.msra.mxu1 %v2873_v19  ;;  %2874 = vmatpush1.bf16.msra.mxu0 %v2873_v19 }
 0x367   :  { %v1624_v54 = vpop.f32.mrb[73].mxu0  ;;  %v4839_v49 = vadd.f32 %v1622_v18, %v4785_v53  ;;  %v1828_v18 = vadd.f32 %v1827_v0, %v4824_v43  ;;  %2905 = vmatprep.subr.bf16.mxu1 %v5887_v56  ;;  %2875 = vmatprep.subr.bf16.mxu0 %v5887_v56 }
 0x368   :  { %v4842_v20 = vadd.f32 %v1624_v54, %v4788_v24 }
 0x369   :  { %v1873_v27 = vmul.f32 %v4839_v49, %v4839_v49  ;;  %v1792_v48 = vadd.f32 %v1791_v6, %v4839_v49 }
 0x36a   :  { %v1628_v16 = vpop.f32.mrb[74].mxu0  ;;  %v1874_v52 = vmul.f32 %v4842_v20, %v4842_v20  ;;  %v1829_v1 = vadd.f32 %v1828_v18, %v4842_v20 }
 0x36b   :  { %v1630_v17 = vpop.f32.mrb[75].mxu0  ;;  %v4855_v34 = vadd.f32 %v1628_v16, %v4785_v53  ;;  %v1931_v16 = vadd.f32 %v1930_v7, %v1871_v2 }
 0x36c   :  { %v4858_v33 = vadd.f32 %v1630_v17, %v4788_v24  ;;  %v1968_v17 = vadd.f32 %v1967_v59, %v1872_v13 }
 0x36d   :  { %v1875_v11 = vmul.f32 %v4855_v34, %v4855_v34  ;;  %v1932_v28 = vadd.f32 %v1931_v16, %v1873_v27  ;;  %v1793_v7 = vadd.f32 %v1792_v48, %v4855_v34 }
 0x36e   :  { %v1634_v55 = vpop.f32.mrb[76].mxu0  ;;  %v1969_v12 = vadd.f32 %v1968_v17, %v1874_v52  ;;  %v1830_v6 = vadd.f32 %v1829_v1, %v4858_v33  ;;  %v2354_v52 = vld [vmem:[%s5854_s4 + $0xa8] sm:$0xff] }
 0x36f   :  { %v1636_v61 = vpop.f32.mrb[77].mxu0  ;;  %v4871_v54 = vadd.f32 %v1634_v55, %v4785_v53  ;;  %v2351_v55 = vld [vmem:[%s5854_s4 + $0x90] sm:$0xff]  ;;  %v1933_v18 = vadd.f32 %v1932_v28, %v1875_v11 }
 0x370   :  { %v4875_v21 = vadd.f32 %v1636_v61, %v4788_v24  ;;  %v1876_v61 = vmul.f32 %v4858_v33, %v4858_v33  ;;  %v2876_v59 = vpack.c.bf16 %v2352_v44, %v2351_v55 }
 0x371   :  { %v1877_v0 = vmul.f32 %v4871_v54, %v4871_v54  ;;  %v1794_v17 = vadd.f32 %v1793_v7, %v4871_v54 }
 0x372   :  { %v4757_v62 = vpop.f32.mrb[78].mxu0  ;;  %v1970_v16 = vadd.f32 %v1969_v12, %v1876_v61  ;;  %v1831_v15 = vadd.f32 %v1830_v6, %v4875_v21  ;;  %2921 = vmatpush1.bf16.msra.mxu1 %v2876_v59  ;;  %2877 = vmatpush1.bf16.msra.mxu0 %v2876_v59 }
 0x373   :  { %v4759_v25 = vpop.f32.mrb[79].mxu0  ;;  %v4898_v51 = vadd.f32 %v4757_v62, %v4785_v53  ;;  %v1878_v62 = vmul.f32 %v4875_v21, %v4875_v21  ;;  %v1934_v61 = vadd.f32 %v1933_v18, %v1877_v0  ;;  %2906 = vmatprep.subr.bf16.mxu1 %v5887_v56  ;;  %2878 = vmatprep.subr.bf16.mxu0 %v5887_v56 }
 0x374   :  { %v4902_v2 = vadd.f32 %v4759_v25, %v4788_v24  ;;  %v2353_v25 = vld [vmem:[%s5854_s4 + $0xa0] sm:$0xff] }
 0x375   :  { %v1879_v3 = vmul.f32 %v4898_v51, %v4898_v51  ;;  %v2879_v19 = vpack.c.bf16 %v2354_v52, %v2353_v25  ;;  %v1971_v44 = vadd.f32 %v1970_v16, %v1878_v62  ;;  %v1795_v28 = vadd.f32 %v1794_v17, %v4898_v51 }
 0x376   :  { %v4761_v63 = vpop.f32.mrb[80].mxu0  ;;  %v1880_v55 = vmul.f32 %v4902_v2, %v4902_v2  ;;  %v1832_v7 = vadd.f32 %v1831_v15, %v4902_v2 }
 0x377   :  { %v4763_v39 = vpop.f32.mrb[81].mxu0  ;;  %v4914_v27 = vadd.f32 %v4761_v63, %v4785_v53  ;;  %v1935_v25 = vadd.f32 %v1934_v61, %v1879_v3  ;;  %2922 = vmatpush1.bf16.msra.mxu1 %v2879_v19  ;;  %2880 = vmatpush1.bf16.msra.mxu0 %v2879_v19  ;;  %v5984_v61 = vmov 0.0|0.0  }
 0x378   :  { %v4927_v63 = vadd.f32 %v4763_v39, %v4788_v24  ;;  %v1972_v52 = vadd.f32 %v1971_v44, %v1880_v55  ;;  %2907 = vmatprep.subr.bf16.mxu1 %v5984_v61  ;;  %v2357_v44 = vld [vmem:[%s5854_s4 + $0xc0] sm:$0xff]  ;;  %2881 = vmatprep.subr.bf16.mxu0 %v5984_v61 }
 0x379   :  { %v1881_v12 = vmul.f32 %v4914_v27, %v4914_v27  ;;  %v1796_v18 = vadd.f32 %v1795_v28, %v4914_v27  ;;  %v2358_v28 = vld [vmem:[%s5854_s4 + $0xc8] sm:$0xff] }
 0x37a   :  { %v4765_v38 = vpop.f32.mrb[82].mxu0  ;;  %5979 = vst [vmem:[#allocation2_spill] sm:$0xff] %v4927_v63  ;;  %v1882_v0 = vmul.f32 %v4927_v63, %v4927_v63  ;;  %v1833_v15 = vadd.f32 %v1832_v7, %v4927_v63  ;;  %v2885_v63 = vpack.c.bf16 %v2358_v28, %v2357_v44 }
 0x37b   :  { %v4767_v42 = vpop.f32.mrb[83].mxu0  ;;  %v4938_v1 = vadd.f32 %v4765_v38, %v4785_v53  ;;  %v2355_v38 = vld [vmem:[%s5854_s4 + $0xb0] sm:$0xff] }
 0x37c   :  { %v4944_v39 = vadd.f32 %v4767_v42, %v4788_v24  ;;  %v2356_v42 = vld [vmem:[%s5854_s4 + $0xb8] sm:$0xff]  ;;  %v1973_v19 = vadd.f32 %v1972_v52, %v1882_v0 }
 0x37d   :  { %5980 = vst [vmem:[#allocation3_spill] sm:$0xff] %v4938_v1  ;;  %v1883_v16 = vmul.f32 %v4938_v1, %v4938_v1  ;;  %v2882_v56 = vpack.c.bf16 %v2356_v42, %v2355_v38 }
 0x37e   :  { %v4769_v23 = vpop.f32.mrb[84].mxu0  ;;  %v1834_v7 = vadd.f32 %v1833_v15, %v4944_v39 }
 0x37f   :  { %v4771_v14 = vpop.f32.mrb[85].mxu0  ;;  %v4962_v59 = vadd.f32 %v4769_v23, %v4785_v53  ;;  %v1884_v23 = vmul.f32 %v4944_v39, %v4944_v39  ;;  %2923 = vmatpush1.bf16.msra.mxu1 %v2882_v56  ;;  %2883 = vmatpush1.bf16.msra.mxu0 %v2882_v56  ;;  %v2360_v56 = vld [vmem:[%s5854_s4 + $0xd8] sm:$0xff] }
 0x380   :  { %v4966_v6 = vadd.f32 %v4771_v14, %v4788_v24  ;;  %v1936_v14 = vadd.f32 %v1935_v25, %v1881_v12  ;;  %2908 = vmatprep.subr.bf16.mxu1 %v5984_v61  ;;  %2884 = vmatprep.subr.bf16.mxu0 %v5984_v61 }
 0x381   :  { %5981 = vst [vmem:[#allocation4_spill] sm:$0xff] %v4962_v59  ;;  %v1885_v12 = vmul.f32 %v4962_v59, %v4962_v59 }
 0x382   :  { %v4773_v40 = vpop.f32.mrb[86].mxu0  ;;  %v1937_v42 = vadd.f32 %v1936_v14, %v1883_v16  ;;  %v1835_v14 = vadd.f32 %v1834_v7, %v4966_v6 }
 0x383   :  { %v4775_v47 = vpop.f32.mrb[87].mxu0  ;;  %v4980_v3 = vadd.f32 %v4773_v40, %v4785_v53  ;;  %v1797_v40 = vadd.f32 %v1796_v18, %v4938_v1  ;;  %v1974_v18 = vadd.f32 %v1973_v19, %v1884_v23  ;;  %2924 = vmatpush1.bf16.msra.mxu1 %v2885_v63  ;;  %2886 = vmatpush1.bf16.msra.mxu0 %v2885_v63 }
 0x384   :  { %v4984_v55 = vadd.f32 %v4775_v47, %v4788_v24  ;;  %v1886_v47 = vmul.f32 %v4966_v6, %v4966_v6  ;;  %v1938_v23 = vadd.f32 %v1937_v42, %v1885_v12  ;;  %2909 = vmatprep.subr.bf16.mxu1 %v5984_v61  ;;  %2887 = vmatprep.subr.bf16.mxu0 %v5984_v61 }
 0x385   :  { %5982 = vst [vmem:[#allocation5_spill] sm:$0xff] %v4980_v3  ;;  %v1798_v1 = vadd.f32 %v1797_v40, %v4962_v59  ;;  %v1887_v16 = vmul.f32 %v4980_v3, %v4980_v3 }
 0x386   :  { %v4777_v26 = vpop.f32.mrb[88].mxu0  ;;  %5983 = vst [vmem:[#allocation6_spill] sm:$0xff] %v4984_v55  ;;  %v1888_v15 = vmul.f32 %v4984_v55, %v4984_v55  ;;  %v1975_v44 = vadd.f32 %v1974_v18, %v1886_v47  ;;  %v1836_v47 = vadd.f32 %v1835_v14, %v4984_v55  ;;  %v2362_v14 = vld [vmem:[%s5854_s4 + $0xe8] sm:$0xff] }
 0x387   :  { %v4782_v22 = vpop.f32.mrb[89].mxu0  ;;  %v5004_v25 = vadd.f32 %v4777_v26, %v4785_v53  ;;  %v1799_v19 = vadd.f32 %v1798_v1, %v4980_v3  ;;  %v1939_v7 = vadd.f32 %v1938_v23, %v1887_v16 }
 0x388   :  { %v5008_v0 = vadd.f32 %v4782_v22, %v4788_v24  ;;  %v2359_v22 = vld [vmem:[%s5854_s4 + $0xd0] sm:$0xff]  ;;  %v1976_v18 = vadd.f32 %v1975_v44, %v1888_v15 }
 0x389   :  { %5985 = vst [vmem:[#allocation8_spill] sm:$0xff] %v5004_v25  ;;  %v1889_v40 = vmul.f32 %v5004_v25, %v5004_v25  ;;  %v2888_v1 = vpack.c.bf16 %v2360_v56, %v2359_v22 }
 0x38a   :  { %v4790_v30 = vpop.f32.mrb[90].mxu0  ;;  %5986 = vst [vmem:[#allocation7_spill] sm:$0xff] %v5008_v0  ;;  %v1890_v59 = vmul.f32 %v5008_v0, %v5008_v0  ;;  %v1837_v63 = vadd.f32 %v1836_v47, %v5008_v0 }
 0x38b   :  { %v4792_v32 = vpop.f32.mrb[91].mxu0  ;;  %v5019_v26 = vadd.f32 %v4790_v30, %v4785_v53  ;;  %v1940_v56 = vadd.f32 %v1939_v7, %v1889_v40  ;;  %2925 = vmatpush1.bf16.msra.mxu1 %v2888_v1  ;;  %2889 = vmatpush1.bf16.msra.mxu0 %v2888_v1  ;;  %v2364_v7 = vld [vmem:[%s5854_s4 + $0xf8] sm:$0xff] }
 0x38c   :  { %v5032_v30 = vadd.f32 %v4792_v32, %v4788_v24  ;;  %v1977_v23 = vadd.f32 %v1976_v18, %v1890_v59  ;;  %2910 = vmatprep.subr.bf16.mxu1 %v5984_v61  ;;  %2890 = vmatprep.subr.bf16.mxu0 %v5984_v61 }
 0x38d   :  { %v1891_v3 = vmul.f32 %v5019_v26, %v5019_v26 }
 0x38e   :  { %v4809_v58 = vpop.f32.mrb[92].mxu0  ;;  %v1892_v16 = vmul.f32 %v5032_v30, %v5032_v30  ;;  %v1838_v59 = vadd.f32 %v1837_v63, %v5032_v30 }
 0x38f   :  { %v4814_v60 = vpop.f32.mrb[93].mxu0  ;;  %v5043_v12 = vadd.f32 %v4809_v58, %v4785_v53  ;;  %v2361_v58 = vld [vmem:[%s5854_s4 + $0xe0] sm:$0xff] }
 0x390   :  { %v5050_v32 = vadd.f32 %v4814_v60, %v4788_v24  ;;  %v1800_v60 = vadd.f32 %v1799_v19, %v5004_v25  ;;  %v1941_v25 = vadd.f32 %v1940_v56, %v1891_v3  ;;  %v1978_v1 = vadd.f32 %v1977_v23, %v1892_v16 }
 0x391   :  { %v1893_v44 = vmul.f32 %v5043_v12, %v5043_v12 }
 0x392   :  { %v4832_v9 = vpop.f32.mrb[94].mxu0  ;;  %v1801_v47 = vadd.f32 %v1800_v60, %v5019_v26  ;;  %v1894_v0 = vmul.f32 %v5050_v32, %v5050_v32  ;;  %v1839_v60 = vadd.f32 %v1838_v59, %v5050_v32 }
 0x393   :  { %v4844_v37 = vpop.f32.mrb[95].mxu0  ;;  %v5068_v15 = vadd.f32 %v4832_v9, %v4785_v53  ;;  %v2891_v9 = vpack.c.bf16 %v2362_v14, %v2361_v58  ;;  %v1942_v14 = vadd.f32 %v1941_v25, %v1893_v44 }
 0x394   :  { %v5076_v55 = vadd.f32 %v4844_v37, %v4788_v24  ;;  %v2363_v37 = vld [vmem:[%s5854_s4 + $0xf0] sm:$0xff]  ;;  %v1802_v3 = vadd.f32 %v1801_v47, %v5043_v12  ;;  %v1979_v23 = vadd.f32 %v1978_v1, %v1894_v0 }
 0x395   :  { %v1895_v18 = vmul.f32 %v5068_v15, %v5068_v15  ;;  %2926 = vmatpush1.bf16.msra.mxu1 %v2891_v9  ;;  %2892 = vmatpush1.bf16.msra.mxu0 %v2891_v9 }
 0x396   :  { %v4860_v36 = vpop.f32.mrb[96].mxu0  ;;  %v1896_v63 = vmul.f32 %v5076_v55, %v5076_v55  ;;  %v1803_v25 = vadd.f32 %v1802_v3, %v5068_v15  ;;  %2911 = vmatprep.subr.bf16.mxu1 %v5984_v61  ;;  %2893 = vmatprep.subr.bf16.mxu0 %v5984_v61 }
 0x397   :  { %v4867_v10 = vpop.f32.mrb[97].mxu0  ;;  %v5086_v40 = vadd.f32 %v4860_v36, %v4785_v53 }
 0x398   :  { %v5101_v36 = vadd.f32 %v4867_v10, %v4788_v24  ;;  %v2894_v10 = vpack.c.bf16 %v2364_v7, %v2363_v37  ;;  %v1980_v7 = vadd.f32 %v1979_v23, %v1896_v63 }
 0x399   :  { %v1897_v44 = vmul.f32 %v5086_v40, %v5086_v40  ;;  %v1804_v1 = vadd.f32 %v1803_v25, %v5086_v40 }
 0x39a   :  { %v4891_v45 = vpop.f32.mrb[98].mxu0  ;;  %5987 = vst [vmem:[#allocation10_spill] sm:$0xff] %v5101_v36  ;;  %v1898_v0 = vmul.f32 %v5101_v36, %v5101_v36  ;;  %2927 = vmatpush1.bf16.msra.mxu1 %v2894_v10  ;;  %2895 = vmatpush1.bf16.msra.mxu0 %v2894_v10 }
 0x39b   :  { %v4904_v13 = vpop.f32.mrb[99].mxu0  ;;  %v5108_v56 = vadd.f32 %v4891_v45, %v4785_v53  ;;  %v1943_v45 = vadd.f32 %v1942_v14, %v1895_v18 }
 0x39c   :  { %v5112_v47 = vadd.f32 %v4904_v13, %v4788_v24  ;;  %v1840_v13 = vadd.f32 %v1839_v60, %v5076_v55  ;;  %v1981_v25 = vadd.f32 %v1980_v7, %v1898_v0 }
 0x39d   :  { %v1944_v60 = vadd.f32 %v1943_v45, %v1897_v44  ;;  %v1805_v63 = vadd.f32 %v1804_v1, %v5108_v56 }
 0x39e   :  { %v4929_v48 = vpop.f32.mrb[100].mxu0  ;;  %5988 = vst [vmem:[#allocation9_spill] sm:$0xff] %v5112_v47  ;;  %v1841_v18 = vadd.f32 %v1840_v13, %v5101_v36  ;;  %v1900_v14 = vmul.f32 %v5112_v47, %v5112_v47 }
 0x39f   :  { %v4940_v11 = vpop.f32.mrb[101].mxu0  ;;  %v5119_v59 = vadd.f32 %v4929_v48, %v4785_v53  ;;  %v1899_v48 = vmul.f32 %v5108_v56, %v5108_v56 }
 0x3a0   :  { %v5128_v9 = vadd.f32 %v4940_v11, %v4788_v24  ;;  %v1842_v13 = vadd.f32 %v1841_v18, %v5112_v47  ;;  %v1982_v7 = vadd.f32 %v1981_v25, %v1900_v14 }
 0x3a1   :  { %v1901_v23 = vmul.f32 %v5119_v59, %v5119_v59  ;;  %v1945_v44 = vadd.f32 %v1944_v60, %v1899_v48  ;;  %v1806_v45 = vadd.f32 %v1805_v63, %v5119_v59 }
 0x3a2   :  { %v4968_v62 = vpop.f32.mrb[102].mxu0  ;;  %5989 = vst [vmem:[#allocation11_spill] sm:$0xff] %v5128_v9  ;;  %v1902_v36 = vmul.f32 %v5128_v9, %v5128_v9  ;;  %v1843_v18 = vadd.f32 %v1842_v13, %v5128_v9 }
 0x3a3   :  { %v4973_v17 = vpop.f32.mrb[103].mxu0  ;;  %v5135_v61 = vadd.f32 %v4968_v62, %v4785_v53  ;;  %v1946_v48 = vadd.f32 %v1945_v44, %v1901_v23 }
 0x3a4   :  { %v5142_v11 = vadd.f32 %v4973_v17, %v4788_v24  ;;  %v1983_v14 = vadd.f32 %v1982_v7, %v1902_v36 }
 0x3a5   :  { %5990 = vst [vmem:[#allocation12_spill] sm:$0xff] %v5135_v61  ;;  %v1903_v1 = vmul.f32 %v5135_v61, %v5135_v61  ;;  %v1807_v60 = vadd.f32 %v1806_v45, %v5135_v61 }
 0x3a6   :  { %v4999_v38 = vpop.f32.mrb[104].mxu0  ;;  %5991 = vst [vmem:[#allocation13_spill] sm:$0xff] %v5142_v11  ;;  %v1904_v47 = vmul.f32 %v5142_v11, %v5142_v11  ;;  %v1844_v25 = vadd.f32 %v1843_v18, %v5142_v11 }
 0x3a7   :  { %v5010_v52 = vpop.f32.mrb[105].mxu0  ;;  %v5149_v62 = vadd.f32 %v4999_v38, %v4785_v53  ;;  %v1947_v44 = vadd.f32 %v1946_v48, %v1903_v1 }
 0x3a8   :  { %v5156_v17 = vadd.f32 %v5010_v52, %v4788_v24  ;;  %v1984_v7 = vadd.f32 %v1983_v14, %v1904_v47 }
 0x3a9   :  { %v1905_v63 = vmul.f32 %v5149_v62, %v5149_v62  ;;  %v1808_v45 = vadd.f32 %v1807_v60, %v5149_v62 }
 0x3aa   :  { %v5034_v28 = vpop.f32.mrb[106].mxu0  ;;  %5992 = vst [vmem:[#allocation14_spill] sm:$0xff] %v5156_v17  ;;  %v1906_v13 = vmul.f32 %v5156_v17, %v5156_v17  ;;  %v1845_v18 = vadd.f32 %v1844_v25, %v5156_v17 }
 0x3ab   :  { %v5045_v42 = vpop.f32.mrb[107].mxu0  ;;  %v5163_v38 = vadd.f32 %v5034_v28, %v4785_v53  ;;  %v1948_v9 = vadd.f32 %v1947_v44, %v1905_v63 }
 0x3ac   :  { %v5170_v52 = vadd.f32 %v5045_v42, %v4788_v24 }
 0x3ad   :  { %5993 = vst [vmem:[#allocation15_spill] sm:$0xff] %v5163_v38  ;;  %v1907_v61 = vmul.f32 %v5163_v38, %v5163_v38  ;;  %v1809_v1 = vadd.f32 %v1808_v45, %v5163_v38 }
 0x3ae   :  { %v5070_v22 = vpop.f32.mrb[108].mxu0  ;;  %v1908_v11 = vmul.f32 %v5170_v52, %v5170_v52  ;;  %v1846_v47 = vadd.f32 %v1845_v18, %v5170_v52 }
 0x3af   :  { %v5078_v19 = vpop.f32.mrb[109].mxu0  ;;  %v5177_v28 = vadd.f32 %v5070_v22, %v4785_v53  ;;  %v1949_v17 = vadd.f32 %v1948_v9, %v1907_v61 }
 0x3b0   :  { %v5184_v42 = vadd.f32 %v5078_v19, %v4788_v24 }
 0x3b1   :  { %v1909_v48 = vmul.f32 %v5177_v28, %v5177_v28  ;;  %v1810_v63 = vadd.f32 %v1809_v1, %v5177_v28 }
 0x3b2   :  { %v1736_v58 = vpop.f32.mrb[110].mxu0  ;;  %5994 = vst [vmem:[#allocation16_spill] sm:$0xff] %v5184_v42  ;;  %v1910_v14 = vmul.f32 %v5184_v42, %v5184_v42 }
 0x3b3   :  { %v1738_v16 = vpop.f32.mrb[111].mxu0  ;;  %v5190_v22 = vadd.f32 %v1736_v58, %v4785_v53  ;;  %v1985_v58 = vadd.f32 %v1984_v7, %v1906_v13  ;;  %v1847_v7 = vadd.f32 %v1846_v47, %v5184_v42  ;;  %v1950_v38 = vadd.f32 %v1949_v17, %v1909_v48 }
 0x3b4   :  { %v5196_v19 = vadd.f32 %v1738_v16, %v4788_v24 }
 0x3b5   :  { %v1911_v44 = vmul.f32 %v5190_v22, %v5190_v22  ;;  %v1986_v13 = vadd.f32 %v1985_v58, %v1908_v11  ;;  %v1811_v9 = vadd.f32 %v1810_v63, %v5190_v22 }
 0x3b6   :  { %v1742_v37 = vpop.f32.mrb[112].mxu0  ;;  %5995 = vst [vmem:[#allocation17_spill] sm:$0xff] %v5196_v19  ;;  %v1912_v18 = vmul.f32 %v5196_v19, %v5196_v19  ;;  %v1848_v11 = vadd.f32 %v1847_v7, %v5196_v19 }
 0x3b7   :  { %v1744_v3 = vpop.f32.mrb[113].mxu0  ;;  %v5202_v60 = vadd.f32 %v1742_v37, %v4785_v53  ;;  %v1951_v42 = vadd.f32 %v1950_v38, %v1911_v44 }
 0x3b8   :  { %v5208_v25 = vadd.f32 %v1744_v3, %v4788_v24 }
 0x3b9   :  { %5996 = vst [vmem:[#allocation18_spill] sm:$0xff] %v5202_v60  ;;  %v1913_v61 = vmul.f32 %v5202_v60, %v5202_v60  ;;  %v1812_v17 = vadd.f32 %v1811_v9, %v5202_v60 }
 0x3ba   :  { %v1748_v10 = vpop.f32.mrb[114].mxu0  ;;  %5997 = vst [vmem:[#allocation19_spill] sm:$0xff] %v5208_v25  ;;  %v1914_v58 = vmul.f32 %v5208_v25, %v5208_v25 }
 0x3bb   :  { %v1750_v0 = vpop.f32.mrb[115].mxu0  ;;  %v5214_v45 = vadd.f32 %v1748_v10, %v4785_v53  ;;  %v1987_v10 = vadd.f32 %v1986_v13, %v1910_v14  ;;  %v1849_v13 = vadd.f32 %v1848_v11, %v5208_v25  ;;  %v1952_v19 = vadd.f32 %v1951_v42, %v1913_v61 }
 0x3bc   :  { %v5220_v3 = vadd.f32 %v1750_v0, %v4788_v24 }
 0x3bd   :  { %5998 = vst [vmem:[#allocation21_spill] sm:$0xff] %v5214_v45  ;;  %v1915_v48 = vmul.f32 %v5214_v45, %v5214_v45  ;;  %v1988_v14 = vadd.f32 %v1987_v10, %v1912_v18  ;;  %v1813_v38 = vadd.f32 %v1812_v17, %v5214_v45 }
 0x3be   :  { %v1754_v23 = vpop.f32.mrb[116].mxu0  ;;  %5999 = vst [vmem:[#allocation20_spill] sm:$0xff] %v5220_v3  ;;  %v1916_v7 = vmul.f32 %v5220_v3, %v5220_v3  ;;  %v1850_v18 = vadd.f32 %v1849_v13, %v5220_v3 }
 0x3bf   :  { %v1756_v36 = vpop.f32.mrb[117].mxu0  ;;  %v5226_v1 = vadd.f32 %v1754_v23, %v4785_v53  ;;  %v1953_v25 = vadd.f32 %v1952_v19, %v1915_v48 }
 0x3c0   :  { %v5232_v47 = vadd.f32 %v1756_v36, %v4788_v24 }
 0x3c1   :  { %6000 = vst [vmem:[#allocation22_spill] sm:$0xff] %v5226_v1  ;;  %v1917_v44 = vmul.f32 %v5226_v1, %v5226_v1  ;;  %v1814_v42 = vadd.f32 %v1813_v38, %v5226_v1 }
 0x3c2   :  { %v1760_v16 = vpop.f32.mrb[118].mxu0  ;;  %6001 = vst [vmem:[#allocation23_spill] sm:$0xff] %v5232_v47  ;;  %v1918_v10 = vmul.f32 %v5232_v47, %v5232_v47 }
 0x3c3   :  { %v1762_v37 = vpop.f32.mrb[119].mxu0  ;;  %v5238_v63 = vadd.f32 %v1760_v16, %v4785_v53  ;;  %v1989_v16 = vadd.f32 %v1988_v14, %v1914_v58  ;;  %v1851_v14 = vadd.f32 %v1850_v18, %v5232_v47  ;;  %v1954_v45 = vadd.f32 %v1953_v25, %v1917_v44 }
 0x3c4   :  { %v5244_v36 = vadd.f32 %v1762_v37, %v4788_v24 }
 0x3c5   :  { %6002 = vst [vmem:[#allocation24_spill] sm:$0xff] %v5238_v63  ;;  %v1919_v61 = vmul.f32 %v5238_v63, %v5238_v63  ;;  %v1990_v58 = vadd.f32 %v1989_v16, %v1916_v7  ;;  %v1815_v19 = vadd.f32 %v1814_v42, %v5238_v63 }
 0x3c6   :  { %v1766_v0 = vpop.f32.mrb[120].mxu0  ;;  %6003 = vst [vmem:[#allocation25_spill] sm:$0xff] %v5244_v36  ;;  %v1920_v13 = vmul.f32 %v5244_v36, %v5244_v36 }
 0x3c7   :  { %v1768_v23 = vpop.f32.mrb[121].mxu0  ;;  %v5250_v9 = vadd.f32 %v1766_v0, %v4785_v53  ;;  %v1991_v38 = vadd.f32 %v1990_v58, %v1918_v10  ;;  %v1955_v18 = vadd.f32 %v1954_v45, %v1919_v61 }
 0x3c8   :  { %v5256_v11 = vadd.f32 %v1768_v23, %v4788_v24 }
 0x3c9   :  { %6004 = vst [vmem:[#allocation26_spill] sm:$0xff] %v5250_v9  ;;  %v1921_v48 = vmul.f32 %v5250_v9, %v5250_v9  ;;  %v1816_v1 = vadd.f32 %v1815_v19, %v5250_v9  ;;  %v1992_v42 = vadd.f32 %v1991_v38, %v1920_v13 }
 0x3ca   :  { %6005 = vst [vmem:[#allocation27_spill] sm:$0xff] %v5256_v11  ;;  %v1772_v37 = vpop.f32.mrb[122].mxu0  ;;  %v1922_v7 = vmul.f32 %v5256_v11, %v5256_v11 }
 0x3cb   :  { %v5262_v17 = vadd.f32 %v1772_v37, %v4785_v53  ;;  %v1774_v0 = vpop.f32.mrb[123].mxu0  ;;  %v1852_v37 = vadd.f32 %v1851_v14, %v5244_v36  ;;  %v1956_v14 = vadd.f32 %v1955_v18, %v1921_v48 }
 0x3cc   :  { %v5268_v23 = vadd.f32 %v1774_v0, %v4788_v24  ;;  %v1993_v19 = vadd.f32 %v1992_v42, %v1922_v7 }
 0x3cd   :  { %6006 = vst [vmem:[#allocation28_spill] sm:$0xff] %v5262_v17  ;;  %v1923_v0 = vmul.f32 %v5262_v17, %v5262_v17  ;;  %v1853_v63 = vadd.f32 %v1852_v37, %v5256_v11  ;;  %v1817_v45 = vadd.f32 %v1816_v1, %v5262_v17 }
 0x3ce   :  { %6007 = vst [vmem:[#allocation29_spill] sm:$0xff] %v5268_v23  ;;  %v1778_v16 = vpop.f32.mrb[124].mxu0  ;;  %v1924_v10 = vmul.f32 %v5268_v23, %v5268_v23 }
 0x3cf   :  { %v5280_v25 = vadd.f32 %v1778_v16, %v4785_v53  ;;  %v1780_v44 = vpop.f32.mrb[125].mxu0  ;;  %v1854_v16 = vadd.f32 %v1853_v63, %v5268_v23  ;;  %v1957_v37 = vadd.f32 %v1956_v14, %v1923_v0 }
 0x3d0   :  { %v5286_v58 = vadd.f32 %v1780_v44, %v4788_v24  ;;  %v1994_v48 = vadd.f32 %v1993_v19, %v1924_v10 }
 0x3d1   :  { %6008 = vst [vmem:[#allocation30_spill] sm:$0xff] %v5280_v25  ;;  %v1925_v61 = vmul.f32 %v5280_v25, %v5280_v25  ;;  %v1818_v11 = vadd.f32 %v1817_v45, %v5280_v25 }
 0x3d2   :  { %6009 = vst [vmem:[#allocation31_spill] sm:$0xff] %v5286_v58  ;;  %v1926_v13 = vmul.f32 %v5286_v58, %v5286_v58  ;;  %v1784_v38 = vpop.f32.mrb[126].mxu0  ;;  %v1855_v1 = vadd.f32 %v1854_v16, %v5286_v58 }
 0x3d3   :  { %v5296_v9 = vadd.f32 %v1784_v38, %v4785_v53  ;;  %v1786_v44 = vpop.f32.mrb[127].mxu0  ;;  %v1958_v17 = vadd.f32 %v1957_v37, %v1925_v61 }
 0x3d4   :  { %v1787_v18 = vadd.f32 %v1786_v44, %v4788_v24  ;;  %v1995_v42 = vadd.f32 %v1994_v48, %v1926_v13 }
 0x3d5   :  { %v1819_v7 = vadd.f32 %v1818_v11, %v5296_v9  ;;  %v1927_v63 = vmul.f32 %v5296_v9, %v5296_v9 }
 0x3d6   :  { %v1856_v23 = vadd.f32 %v1855_v1, %v1787_v18  ;;  %v1928_v0 = vmul.f32 %v1787_v18, %v1787_v18 }
 0x3d7   :  { %v1820_v14 = vrot.slane %v1819_v7, 4  ;;  %v1959_v45 = vadd.f32 %v1958_v17, %v1927_v63 }
 0x3d8   :  { %v1857_v25 = vrot.slane %v1856_v23, 4  ;;  %v1996_v53 = vadd.f32 %v1995_v42, %v1928_v0 }
 0x3d9   :  { %v1821_v38 = vadd.f32 %v1820_v14, %v1819_v7  ;;  %v1960_v36 = vrot.slane %v1959_v45, 4 }
 0x3da   :  { %v1858_v10 = vadd.f32 %v1857_v25, %v1856_v23  ;;  %v1997_v19 = vrot.slane %v1996_v53, 4 }
 0x3db   :  { %v1822_v16 = vrot.slane %v1821_v38, 2  ;;  %v1961_v58 = vadd.f32 %v1960_v36, %v1959_v45 }
 0x3dc   :  { %v1859_v24 = vrot.slane %v1858_v10, 2  ;;  %v1998_v61 = vadd.f32 %v1997_v19, %v1996_v53 }
 0x3dd   :  { %v1823_v37 = vadd.f32 %v1822_v16, %v1821_v38  ;;  %v1962_v11 = vrot.slane %v1961_v58, 2 }
 0x3de   :  { %v1860_v44 = vadd.f32 %v1859_v24, %v1858_v10  ;;  %v1999_v47 = vrot.slane %v1998_v61, 2 }
 0x3df   :  { %v1824_v3 = vrot.slane %v1823_v37, 1  ;;  %v1963_v13 = vadd.f32 %v1962_v11, %v1961_v58 }
 0x3e0   :  { %v1861_v48 = vrot.slane %v1860_v44, 1  ;;  %v2000_v1 = vadd.f32 %v1999_v47, %v1998_v61 }
 0x3e1   :  { %v1825_v60 = vadd.f32 %v1824_v3, %v1823_v37  ;;  %v1964_v17 = vrot.slane %v1963_v13, 1  ;;  %v2669_v37 = vld [vmem:[%s5852_s5 + $0x5] ss:$8 sm:$0x3] }
 0x3e2   :  { %v1862_v63 = vadd.f32 %v1861_v48, %v1860_v44  ;;  %v2001_v42 = vrot.slane %v2000_v1, 1 }
 0x3e3   :  { %v1863_v7 = vmul.f32 0.00390625, %v1825_v60  ;;  %v1965_v0 = vadd.f32 %v1964_v17, %v1963_v13 }
 0x3e4   :  { %v1864_v23 = vmul.f32 0.00390625, %v1862_v63  ;;  %v2002_v25 = vadd.f32 %v2001_v42, %v2000_v1 }
 0x3e5   :  { %v2003_v14 = vmul.f32 0.00390625, %v1965_v0  ;;  %v2005_v36 = vmul.f32 %v1863_v7, %v1863_v7 }
 0x3e6   :  { %v2004_v45 = vmul.f32 0.00390625, %v2002_v25  ;;  %v2006_v53 = vmul.f32 %v1864_v23, %v1864_v23 }
 0x3e7   :  { %v2007_v38 = vsub.f32 %v2003_v14, %v2005_v36  ;;  %v2670_v14 = vld [vmem:[%s5852_s5 + $0x6] ss:$8 sm:$0x3] }
 0x3e8   :  { %v2008_v19 = vsub.f32 %v2004_v45, %v2006_v53 }
 0x3e9   :  { %v2009_v10 = vmax.f32 %v2007_v38, 0.0 }
 0x3ea   :  { %v2010_v16 = vmax.f32 %v2008_v19, 0.0 }
 0x3eb   :  { %v2011_v24 = vadd.f32 0.8, %v2009_v10 }
 0x3ec   :  { %v2012_v58 = vadd.f32 0.8, %v2010_v16  ;;  %v6012_v16 = vld [vmem:[#allocation4_spill] sm:$0xff] }
 0x3ed   :  { %2935 = vrsqrt.f32 %v2011_v24 }
 0x3ee   :  { %2937 = vrsqrt.f32 %v2012_v58 }
 0x3f7   :  { %v2936_v3 = vpop.eup %2935 }
 0x3f8   :  { %v2938_v47 = vpop.eup %2937 }
 0x3f9   :  { %v2017_v61 = vcombine.low %v2936_v3, %v2938_v47  ;;  %v6015_v3 = vld [vmem:[#allocation8_spill] sm:$0xff] }
 0x3fb   :  { %v2024_v60 = vrot.slane %v2017_v61, %v4240_v4 }
 0x3fd   :  { %v2031_v11 = vrot.slane %v2024_v60, %v4240_v4 }
 0x3ff   :  { %v2033_v44 = vmul.f32 %v2669_v37, %v2031_v11 }
 0x401   :  { %v5309_v13 = vrot.slane %v2033_v44, %v3449_v29  ;;  %v5312_v48 = vrot.slane %v2033_v44, %v3455_v31 }
 0x403   :  { %v5315_v1 = vmul.f32 %v5312_v48, %v1787_v18  ;;  %v2109_v17 = vmul.f32 %v5309_v13, %v1863_v7  ;;  %v2110_v63 = vmul.f32 %v5312_v48, %v1864_v23  ;;  %v2045_v45 = vmul.f32 %v5309_v13, %v4801_v41 }
 0x404   :  { %v2046_v18 = vmul.f32 %v5312_v48, %v4804_v8  ;;  %v2047_v7 = vmul.f32 %v5309_v13, %v4795_v5  ;;  %v2048_v23 = vmul.f32 %v5312_v48, %v4798_v35  ;;  %v2050_v53 = vmul.f32 %v5312_v48, %v4812_v46 }
 0x405   :  { %v2113_v42 = vcombine.low %v2109_v17, %v2110_v63  ;;  %v5338_v38 = vmul.f32 %v5309_v13, %v4821_v57  ;;  %v2052_v41 = vmul.f32 %v5312_v48, %v4824_v43  ;;  %v5344_v8 = vmul.f32 %v5309_v13, %v4839_v49 }
 0x406   :  { %v5348_v5 = vmul.f32 %v5312_v48, %v4842_v20  ;;  %v5352_v35 = vmul.f32 %v5309_v13, %v4855_v34  ;;  %v2057_v43 = vmul.f32 %v5309_v13, %v4871_v54  ;;  %v2058_v49 = vmul.f32 %v5312_v48, %v4875_v21 }
 0x407   :  { %v2120_v0 = vrot.slane %v2113_v42, %v4240_v4  ;;  %v2059_v20 = vmul.f32 %v5309_v13, %v4898_v51  ;;  %v2060_v34 = vmul.f32 %v5312_v48, %v4902_v2  ;;  %v2064_v54 = vmul.f32 %v5312_v48, %v4944_v39  ;;  %v6013_v2 = vld [vmem:[#allocation5_spill] sm:$0xff] }
 0x408   :  { %v5382_v21 = vmul.f32 %v5309_v13, %v6012_v16  ;;  %v2066_v51 = vmul.f32 %v5312_v48, %v4966_v6  ;;  %v5388_v24 = vmul.f32 %v5309_v13, %v6013_v2  ;;  %v5396_v47 = vmul.f32 %v5309_v13, %v6015_v3 }
 0x409   :  { %v2127_v25 = vrot.slane %v2120_v0, %v4240_v4  ;;  %v2049_v4 = vmul.f32 %v5309_v13, %v4807_v50  ;;  %v5356_v50 = vmul.f32 %v5312_v48, %v4858_v33  ;;  %v2061_v33 = vmul.f32 %v5309_v13, %v4914_v27  ;;  %v6014_v27 = vld [vmem:[#allocation6_spill] sm:$0xff] }
 0x40a   :  { %v5392_v58 = vmul.f32 %v5312_v48, %v6014_v27  ;;  %v5400_v39 = vmul.f32 %v5309_v13, %v5296_v9 }
 0x40b   :  { %v2129_v36 = vsub.f32 %v2670_v14, %v2127_v25 }
 0x40d   :  { %v5359_v46 = vrot.slane %v2129_v36, %v3449_v29  ;;  %v5362_v57 = vrot.slane %v2129_v36, %v3455_v31  ;;  %v6010_v29 = vld [vmem:[#allocation2_spill] sm:$0xff]  ;;  %v6011_v31 = vld [vmem:[#allocation3_spill] sm:$0xff] }
 0x40e   :  { %v2062_v19 = vmul.f32 %v5312_v48, %v6010_v29  ;;  %v2063_v10 = vmul.f32 %v5309_v13, %v6011_v31  ;;  %v6016_v31 = vld [vmem:[#allocation7_spill] sm:$0xff] }
 0x40f   :  { %v2141_v61 = vadd.f32 %v5359_v46, %v2045_v45  ;;  %v2153_v6 = vadd.f32 %v5359_v46, %v2057_v43  ;;  %v2142_v60 = vadd.f32 %v5362_v57, %v2046_v18  ;;  %v2154_v37 = vadd.f32 %v5362_v57, %v2058_v49 }
 0x410   :  { %v2144_v11 = vadd.f32 %v5362_v57, %v2048_v23  ;;  %v2156_v44 = vadd.f32 %v5362_v57, %v2060_v34  ;;  %v2143_v17 = vadd.f32 %v5359_v46, %v2047_v7  ;;  %v2155_v63 = vadd.f32 %v5359_v46, %v2059_v20 }
 0x411   :  { %v2205_v42 = vmul.f32 0.2, %v2141_v61  ;;  %v2217_v0 = vmul.f32 0.2, %v2153_v6  ;;  %v2206_v9 = vmul.f32 0.2, %v2142_v60  ;;  %v2146_v25 = vadd.f32 %v5362_v57, %v2050_v53 }
 0x412   :  { %v2218_v14 = vmul.f32 0.2, %v2154_v37  ;;  %v2208_v36 = vmul.f32 0.2, %v2144_v11  ;;  %v2220_v45 = vmul.f32 0.2, %v2156_v44  ;;  %v2158_v18 = vadd.f32 %v5362_v57, %v2062_v19 }
 0x413   :  { %v2269_v43 = vmax.f32 %v2141_v61, %v2205_v42  ;;  %v2281_v49 = vmax.f32 %v2153_v6, %v2217_v0  ;;  %v2270_v29 = vmax.f32 %v2142_v60, %v2206_v9  ;;  %v2207_v23 = vmul.f32 0.2, %v2143_v17 }
 0x414   :  { %v2070_v34 = vmul.f32 %v5312_v48, %v6016_v31  ;;  %v5416_v7 = vmul.f32 %v5309_v13, %v5019_v26  ;;  %v2282_v20 = vmax.f32 %v2154_v37, %v2218_v14  ;;  %v2219_v16 = vmul.f32 0.2, %v2155_v63  ;;  %v6017_v31 = vld [vmem:[#allocation10_spill] sm:$0xff] }
 0x415   :  { %v5420_v53 = vmul.f32 %v5312_v48, %v5032_v30  ;;  %2436 = vmatprep.mubr.f32.mxu0 %v2270_v29  ;;  %v2272_v2 = vmax.f32 %v2144_v11, %v2208_v36  ;;  %v2210_v19 = vmul.f32 0.2, %v2146_v25  ;;  %v2145_v27 = vadd.f32 %v5359_v46, %v2049_v4 }
 0x416   :  { %2466 = vmatprep.mubr.f32.mxu1 %v2282_v20  ;;  %2437 = vmatmul.mubr.f32.vlgmr.msra.gmra.mrb[128].mxu0 %v2269_v43  ;;  %v2284_v3 = vmax.f32 %v2156_v44, %v2220_v45  ;;  %v2222_v61 = vmul.f32 0.2, %v2158_v18  ;;  %v2157_v6 = vadd.f32 %v5359_v46, %v2061_v33  ;;  %v2148_v26 = vadd.f32 %v5362_v57, %v2052_v41 }
 0x417   :  { %v5427_v60 = vmul.f32 %v5309_v13, %v5043_v12  ;;  %2467 = vmatmul.mubr.f32.vlgmr.msra.gmra.mrb[64].mxu1 %v2281_v49  ;;  %2441 = vmatprep.mubr.f32.mxu0 %v2272_v2  ;;  %v2271_v30 = vmax.f32 %v2143_v17, %v2207_v23  ;;  %v2209_v37 = vmul.f32 0.2, %v2145_v27  ;;  %v2160_v11 = vadd.f32 %v5362_v57, %v2064_v54 }
 0x418   :  { %2471 = vmatprep.mubr.f32.mxu1 %v2284_v3  ;;  %v2283_v4 = vmax.f32 %v2155_v63, %v2219_v16  ;;  %v2221_v42 = vmul.f32 0.2, %v2157_v6  ;;  %v2147_v44 = vadd.f32 %v5359_v46, %v5338_v38  ;;  %v2159_v33 = vadd.f32 %v5359_v46, %v2063_v10 }
 0x419   :  { %v2274_v0 = vmax.f32 %v2146_v25, %v2210_v19  ;;  %v2212_v41 = vmul.f32 0.2, %v2148_v26  ;;  %v2150_v12 = vadd.f32 %v5362_v57, %v5348_v5  ;;  %v2162_v9 = vadd.f32 %v5362_v57, %v2066_v51 }
 0x41a   :  { %v2074_v17 = vmul.f32 %v5312_v48, %v5050_v32  ;;  %v2075_v54 = vmul.f32 %v5309_v13, %v5068_v15  ;;  %2442 = vmatmul.mubr.f32.gmra.mrb[130].mxu0 %v2271_v30  ;;  %v2286_v63 = vmax.f32 %v2158_v18, %v2222_v61  ;;  %v2224_v14 = vmul.f32 0.2, %v2160_v11 }
 0x41b   :  { %v2076_v38 = vmul.f32 %v5312_v48, %v5076_v55  ;;  %2472 = vmatmul.mubr.f32.gmra.mrb[66].mxu1 %v2283_v4  ;;  %2446 = vmatprep.mubr.f32.mxu0 %v2274_v0  ;;  %v2273_v10 = vmax.f32 %v2145_v27, %v2209_v37  ;;  %v2149_v5 = vadd.f32 %v5359_v46, %v5344_v8  ;;  %v2211_v25 = vmul.f32 0.2, %v2147_v44  ;;  %v6019_v0 = vld [vmem:[#allocation11_spill] sm:$0xff] }
 0x41c   :  { %2476 = vmatprep.mubr.f32.mxu1 %v2286_v63  ;;  %v2285_v51 = vmax.f32 %v2157_v6, %v2221_v42  ;;  %v2161_v32 = vadd.f32 %v5359_v46, %v5382_v21  ;;  %v2152_v15 = vadd.f32 %v5362_v57, %v5356_v50  ;;  %v2276_v36 = vmax.f32 %v2148_v26, %v2212_v41  ;;  %v6021_v63 = vld [vmem:[#allocation13_spill] sm:$0xff] }
 0x41d   :  { %v2223_v45 = vmul.f32 0.2, %v2159_v33  ;;  %v2214_v18 = vmul.f32 0.2, %v2150_v12  ;;  %v2164_v55 = vadd.f32 %v5362_v57, %v5392_v58  ;;  %v2288_v43 = vmax.f32 %v2160_v11, %v2224_v14 }
 0x41e   :  { %2447 = vmatmul.mubr.f32.gmra.mrb[132].mxu0 %v2273_v10  ;;  %v2226_v49 = vmul.f32 0.2, %v2162_v9  ;;  %v2151_v8 = vadd.f32 %v5359_v46, %v5352_v35  ;;  %v2163_v29 = vadd.f32 %v5359_v46, %v5388_v24  ;;  %v2077_v21 = vmul.f32 %v5309_v13, %v5086_v40 }
 0x41f   :  { %2477 = vmatmul.mubr.f32.gmra.mrb[68].mxu1 %v2285_v51  ;;  %2451 = vmatprep.mubr.f32.mxu0 %v2276_v36  ;;  %v2213_v50 = vmul.f32 0.2, %v2149_v5  ;;  %v2166_v23 = vadd.f32 %v5362_v57, %v2070_v34  ;;  %v5459_v58 = vadd.f32 %v5359_v46, %v5396_v47  ;;  %v2078_v20 = vmul.f32 %v5312_v48, %v6017_v31  ;;  %v6024_v31 = vld [vmem:[#allocation16_spill] sm:$0xff] }
 0x420   :  { %v2079_v35 = vmul.f32 %v5309_v13, %v5108_v56  ;;  %2481 = vmatprep.mubr.f32.mxu1 %v2288_v43  ;;  %v2275_v24 = vmax.f32 %v2147_v44, %v2211_v25  ;;  %v2225_v16 = vmul.f32 0.2, %v2161_v32  ;;  %v2287_v2 = vmax.f32 %v2159_v33, %v2223_v45  ;;  %v6018_v56 = vld [vmem:[#allocation9_spill] sm:$0xff]  ;;  %v6022_v25 = vld [vmem:[#allocation14_spill] sm:$0xff] }
 0x421   :  { %v2278_v40 = vmax.f32 %v2150_v12, %v2214_v18  ;;  %v2216_v19 = vmul.f32 0.2, %v2152_v15  ;;  %v5467_v27 = vadd.f32 %v5362_v57, %v5420_v53  ;;  %v2290_v34 = vmax.f32 %v2162_v9, %v2226_v49 }
 0x422   :  { %2452 = vmatmul.mubr.f32.gmra.mrb[134].mxu0 %v2275_v24  ;;  %v2228_v47 = vmul.f32 0.2, %v2164_v55  ;;  %v5471_v3 = vadd.f32 %v5359_v46, %v5416_v7  ;;  %v5474_v61 = vadd.f32 %v5362_v57, %v2074_v17  ;;  %v2080_v6 = vmul.f32 %v5312_v48, %v6018_v56  ;;  %v6020_v17 = vld [vmem:[#allocation12_spill] sm:$0xff] }
 0x423   :  { %2482 = vmatmul.mubr.f32.gmra.mrb[70].mxu1 %v2287_v2  ;;  %2456 = vmatprep.mubr.f32.mxu0 %v2278_v40  ;;  %v2277_v26 = vmax.f32 %v2149_v5, %v2213_v50  ;;  %v5480_v53 = vadd.f32 %v5359_v46, %v5427_v60  ;;  %v2289_v30 = vmax.f32 %v2161_v32, %v2225_v16  ;;  %v2215_v37 = vmul.f32 0.2, %v2151_v8 }
 0x424   :  { %2486 = vmatprep.mubr.f32.mxu1 %v2290_v34  ;;  %v5483_v11 = vadd.f32 %v5362_v57, %v2076_v38  ;;  %v5486_v7 = vadd.f32 %v5359_v46, %v2075_v54  ;;  %v2280_v4 = vmax.f32 %v2152_v15, %v2216_v19  ;;  %v2227_v42 = vmul.f32 0.2, %v2163_v29 }
 0x425   :  { %v5489_v44 = vadd.f32 %v5362_v57, %v2078_v20  ;;  %v5492_v33 = vadd.f32 %v5359_v46, %v2077_v21  ;;  %v2081_v60 = vmul.f32 %v5309_v13, %v5119_v59  ;;  %v2082_v41 = vmul.f32 %v5312_v48, %v6019_v0  ;;  %v6023_v21 = vld [vmem:[#allocation15_spill] sm:$0xff] }
 0x426   :  { %2457 = vmatmul.mubr.f32.gmra.mrb[136].mxu0 %v2277_v26  ;;  %v2292_v12 = vmax.f32 %v2164_v55, %v2228_v47  ;;  %v2230_v9 = vmul.f32 0.2, %v2166_v23  ;;  %v2083_v54 = vmul.f32 %v5309_v13, %v6020_v17  ;;  %v2084_v14 = vmul.f32 %v5312_v48, %v6021_v63  ;;  %v6026_v47 = vld [vmem:[#allocation18_spill] sm:$0xff]  ;;  %v6030_v17 = vld [vmem:[#allocation23_spill] sm:$0xff] }
 0x427   :  { %2487 = vmatmul.mubr.f32.gmra.mrb[72].mxu1 %v2289_v30  ;;  %2461 = vmatprep.mubr.f32.mxu0 %v2280_v4  ;;  %v5503_v38 = vadd.f32 %v5362_v57, %v2080_v6  ;;  %v2085_v59 = vmul.f32 %v5309_v13, %v5149_v62  ;;  %v2279_v10 = vmax.f32 %v2151_v8, %v2215_v37  ;;  %v2229_v36 = vmul.f32 0.2, %v5459_v58  ;;  %v6027_v6 = vld [vmem:[#allocation19_spill] sm:$0xff]  ;;  %v6028_v30 = vld [vmem:[#allocation20_spill] sm:$0xff] }
 0x428   :  { %2491 = vmatprep.mubr.f32.mxu1 %v2292_v12  ;;  %v5508_v5 = vadd.f32 %v5359_v46, %v2079_v35  ;;  %v5511_v51 = vadd.f32 %v5362_v57, %v2082_v41  ;;  %v2086_v32 = vmul.f32 %v5312_v48, %v6022_v25  ;;  %v2291_v15 = vmax.f32 %v2163_v29, %v2227_v42  ;;  %v6029_v12 = vld [vmem:[#allocation21_spill] sm:$0xff] }
 0x429   :  { %v5517_v45 = vadd.f32 %v5359_v46, %v2081_v60  ;;  %v2294_v18 = vmax.f32 %v2166_v23, %v2230_v9  ;;  %v2232_v62 = vmul.f32 0.2, %v5467_v27  ;;  %v5521_v55 = vadd.f32 %v5362_v57, %v2084_v14 }
 0x42a   :  { %2462 = vmatmul.mubr.f32.gmra.mrb[138].mxu0 %v2279_v10  ;;  %v5524_v43 = vadd.f32 %v5359_v46, %v2083_v54  ;;  %v2088_v49 = vmul.f32 %v5312_v48, %v5170_v52  ;;  %v5529_v8 = vadd.f32 %v5362_v57, %v2086_v32  ;;  %v5532_v29 = vadd.f32 %v5359_v46, %v2085_v59  ;;  %v6025_v52 = vld [vmem:[#allocation17_spill] sm:$0xff]  ;;  %v6031_v59 = vld [vmem:[#allocation22_spill] sm:$0xff]  ;;  %v6032_v10 = vld [vmem:[#allocation24_spill] sm:$0xff] }
 0x42b   :  { %2492 = vmatmul.mubr.f32.gmra.mrb[74].mxu1 %v2291_v15  ;;  %v2087_v50 = vmul.f32 %v5309_v13, %v6023_v21  ;;  %v2089_v23 = vmul.f32 %v5309_v13, %v5177_v28  ;;  %v2090_v20 = vmul.f32 %v5312_v48, %v6024_v31  ;;  %v2091_v35 = vmul.f32 %v5309_v13, %v5190_v22  ;;  %v6033_v15 = vld [vmem:[#allocation25_spill] sm:$0xff]  ;;  %v6035_v21 = vld [vmem:[#allocation27_spill] sm:$0xff] }
 0x42c   :  { %2496 = vmatprep.mubr.f32.mxu1 %v2294_v18  ;;  %v2092_v24 = vmul.f32 %v5312_v48, %v6025_v52  ;;  %v2293_v16 = vmax.f32 %v5459_v58, %v2229_v36  ;;  %v2231_v2 = vmul.f32 0.2, %v5471_v3  ;;  %v5547_v40 = vadd.f32 %v5362_v57, %v2088_v49  ;;  %v6034_v18 = vld [vmem:[#allocation26_spill] sm:$0xff] }
 0x42d   :  { %v2296_v19 = vmax.f32 %v5467_v27, %v2232_v62  ;;  %v2234_v28 = vmul.f32 0.2, %v5474_v61  ;;  %v5552_v34 = vadd.f32 %v5359_v46, %v2087_v50  ;;  %v5555_v22 = vadd.f32 %v5362_v57, %v2090_v20 }
 0x42e   :  { %v2093_v56 = vmul.f32 %v5309_v13, %v6026_v47  ;;  %v2094_v58 = vmul.f32 %v5312_v48, %v6027_v6  ;;  %v5562_v26 = vadd.f32 %v5359_v46, %v2089_v23  ;;  %v2096_v27 = vmul.f32 %v5312_v48, %v6028_v30  ;;  %v6037_v47 = vld [vmem:[#allocation28_spill] sm:$0xff] }
 0x42f   :  { %2497 = vmatmul.mubr.f32.gmra.mrb[76].mxu1 %v2293_v16  ;;  %v5567_v37 = vadd.f32 %v5362_v57, %v2092_v24  ;;  %v5570_v4 = vadd.f32 %v5359_v46, %v2091_v35  ;;  %v2295_v42 = vmax.f32 %v5471_v3, %v2231_v2  ;;  %v2233_v60 = vmul.f32 0.2, %v5480_v53  ;;  %v6036_v2 = vld [vmem:[#allocation29_spill] sm:$0xff] }
 0x430   :  { %2501 = vmatprep.mubr.f32.mxu1 %v2296_v19  ;;  %v5575_v0 = vadd.f32 %v5362_v57, %v2094_v58  ;;  %v5578_v41 = vadd.f32 %v5359_v46, %v2093_v56  ;;  %v2095_v9 = vmul.f32 %v5309_v13, %v6029_v12  ;;  %v2098_v54 = vmul.f32 %v5312_v48, %v6030_v17  ;;  %v6038_v56 = vld [vmem:[#allocation31_spill] sm:$0xff]  ;;  %v6039_v58 = vld [vmem:[#allocation30_spill] sm:$0xff] }
 0x431   :  { %v2298_v63 = vmax.f32 %v5474_v61, %v2234_v28  ;;  %v2236_v14 = vmul.f32 0.2, %v5483_v11  ;;  %v2097_v3 = vmul.f32 %v5309_v13, %v6031_v59  ;;  %v2099_v25 = vmul.f32 %v5309_v13, %v6032_v10 }
 0x432   :  { %v5591_v32 = vadd.f32 %v5362_v57, %v2096_v27  ;;  %v2100_v36 = vmul.f32 %v5312_v48, %v6033_v15  ;;  %v2101_v62 = vmul.f32 %v5309_v13, %v6034_v18  ;;  %v5598_v61 = vadd.f32 %v5359_v46, %v2095_v9 }
 0x433   :  { %2502 = vmatmul.mubr.f32.gmra.mrb[78].mxu1 %v2295_v42  ;;  %v5601_v49 = vadd.f32 %v5362_v57, %v2098_v54  ;;  %v2102_v50 = vmul.f32 %v5312_v48, %v6035_v21  ;;  %v2297_v23 = vmax.f32 %v5480_v53, %v2233_v60  ;;  %v2235_v31 = vmul.f32 0.2, %v5486_v7 }
 0x434   :  { %2506 = vmatprep.mubr.f32.mxu1 %v2298_v63  ;;  %v5608_v20 = vadd.f32 %v5359_v46, %v2097_v3  ;;  %v2300_v35 = vmax.f32 %v5483_v11, %v2236_v14  ;;  %v2238_v52 = vmul.f32 0.2, %v5489_v44  ;;  %v5613_v24 = vadd.f32 %v5362_v57, %v2100_v36 }
 0x435   :  { %v5616_v16 = vadd.f32 %v5359_v46, %v2099_v25  ;;  %v2104_v19 = vmul.f32 %v5312_v48, %v6036_v2  ;;  %v5621_v53 = vadd.f32 %v5362_v57, %v2102_v50  ;;  %v5624_v28 = vadd.f32 %v5359_v46, %v2101_v62 }
 0x436   :  { %v2103_v11 = vmul.f32 %v5309_v13, %v6037_v47  ;;  %v2106_v6 = vmul.f32 %v5312_v48, %v6038_v56  ;;  %v2105_v30 = vmul.f32 %v5309_v13, %v6039_v58  ;;  %v2299_v27 = vmax.f32 %v5486_v7, %v2235_v31 }
 0x437   :  { %2507 = vmatmul.mubr.f32.gmra.mrb[80].mxu1 %v2297_v23  ;;  %v2237_v42 = vmul.f32 0.2, %v5492_v33  ;;  %v5635_v60 = vadd.f32 %v5362_v57, %v2104_v19  ;;  %v2302_v12 = vmax.f32 %v5489_v44, %v2238_v52  ;;  %v2240_v9 = vmul.f32 0.2, %v5503_v38 }
 0x438   :  { %2511 = vmatprep.mubr.f32.mxu1 %v2300_v35  ;;  %v5640_v17 = vadd.f32 %v5359_v46, %v2103_v11  ;;  %v5643_v48 = vadd.f32 %v5362_v57, %v2106_v6  ;;  %v5646_v13 = vadd.f32 %v5359_v46, %v2105_v30  ;;  %v5650_v7 = vadd.f32 %v5362_v57, %v5315_v1 }
 0x439   :  { %v5654_v44 = vadd.f32 %v5359_v46, %v5400_v39  ;;  %v2301_v54 = vmax.f32 %v5492_v33, %v2237_v42  ;;  %v2239_v63 = vmul.f32 0.2, %v5508_v5  ;;  %v2304_v14 = vmax.f32 %v5503_v38, %v2240_v9 }
 0x43a   :  { %v2242_v59 = vmul.f32 0.2, %v5511_v51  ;;  %v2241_v10 = vmul.f32 0.2, %v5517_v45  ;;  %v2244_v57 = vmul.f32 0.2, %v5521_v55 }
 0x43b   :  { %2512 = vmatmul.mubr.f32.gmra.mrb[82].mxu1 %v2299_v27  ;;  %v2303_v3 = vmax.f32 %v5508_v5, %v2239_v63  ;;  %v2243_v39 = vmul.f32 0.2, %v5524_v43  ;;  %v2246_v38 = vmul.f32 0.2, %v5529_v8  ;;  %v2245_v25 = vmul.f32 0.2, %v5532_v29 }
 0x43c   :  { %2516 = vmatprep.mubr.f32.mxu1 %v2302_v12  ;;  %v2306_v1 = vmax.f32 %v5511_v51, %v2242_v59  ;;  %v2305_v46 = vmax.f32 %v5517_v45, %v2241_v10  ;;  %v2308_v33 = vmax.f32 %v5521_v55, %v2244_v57  ;;  %v2248_v15 = vmul.f32 0.2, %v5547_v40 }
 0x43d   :  { %v2307_v5 = vmax.f32 %v5524_v43, %v2243_v39  ;;  %v2310_v51 = vmax.f32 %v5529_v8, %v2246_v38  ;;  %v2309_v45 = vmax.f32 %v5532_v29, %v2245_v25  ;;  %v2247_v36 = vmul.f32 0.2, %v5552_v34 }
 0x43e   :  { %v2312_v55 = vmax.f32 %v5547_v40, %v2248_v15  ;;  %v2250_v18 = vmul.f32 0.2, %v5555_v22  ;;  %v2249_v62 = vmul.f32 0.2, %v5562_v26  ;;  %v2252_v21 = vmul.f32 0.2, %v5567_v37 }
 0x43f   :  { %2517 = vmatmul.mubr.f32.gmra.mrb[84].mxu1 %v2301_v54  ;;  %v2311_v43 = vmax.f32 %v5552_v34, %v2247_v36  ;;  %v2251_v50 = vmul.f32 0.2, %v5570_v4  ;;  %v2254_v23 = vmul.f32 0.2, %v5575_v0  ;;  %v2253_v31 = vmul.f32 0.2, %v5578_v41 }
 0x440   :  { %2521 = vmatprep.mubr.f32.mxu1 %v2304_v14  ;;  %v2314_v8 = vmax.f32 %v5555_v22, %v2250_v18  ;;  %v2313_v29 = vmax.f32 %v5562_v26, %v2249_v62  ;;  %v2316_v40 = vmax.f32 %v5567_v37, %v2252_v21  ;;  %v2256_v35 = vmul.f32 0.2, %v5591_v32 }
 0x441   :  { %v2315_v34 = vmax.f32 %v5570_v4, %v2251_v50  ;;  %v2318_v22 = vmax.f32 %v5575_v0, %v2254_v23  ;;  %v2317_v26 = vmax.f32 %v5578_v41, %v2253_v31  ;;  %v2255_v52 = vmul.f32 0.2, %v5598_v61 }
 0x442   :  { %v2320_v37 = vmax.f32 %v5591_v32, %v2256_v35  ;;  %v2258_v2 = vmul.f32 0.2, %v5601_v49  ;;  %v2257_v19 = vmul.f32 0.2, %v5608_v20  ;;  %v2260_v47 = vmul.f32 0.2, %v5613_v24 }
 0x443   :  { %2522 = vmatmul.mubr.f32.gmra.mrb[86].mxu1 %v2303_v3  ;;  %v2319_v4 = vmax.f32 %v5598_v61, %v2255_v52  ;;  %v2259_v11 = vmul.f32 0.2, %v5616_v16  ;;  %v2262_v56 = vmul.f32 0.2, %v5621_v53  ;;  %v2261_v6 = vmul.f32 0.2, %v5624_v28 }
 0x444   :  { %2526 = vmatprep.mubr.f32.mxu1 %v2306_v1  ;;  %v2322_v0 = vmax.f32 %v5601_v49, %v2258_v2  ;;  %v2321_v41 = vmax.f32 %v5608_v20, %v2257_v19  ;;  %v2324_v32 = vmax.f32 %v5613_v24, %v2260_v47  ;;  %v2264_v58 = vmul.f32 0.2, %v5635_v60 }
 0x445   :  { %v2323_v61 = vmax.f32 %v5616_v16, %v2259_v11  ;;  %v2326_v49 = vmax.f32 %v5621_v53, %v2262_v56  ;;  %v2325_v20 = vmax.f32 %v5624_v28, %v2261_v6  ;;  %v2263_v30 = vmul.f32 0.2, %v5640_v17 }
 0x446   :  { %v2328_v24 = vmax.f32 %v5635_v60, %v2264_v58  ;;  %v2266_v27 = vmul.f32 0.2, %v5643_v48  ;;  %v2265_v42 = vmul.f32 0.2, %v5646_v13  ;;  %v2268_v12 = vmul.f32 0.2, %v5650_v7 }
 0x447   :  { %2527 = vmatmul.mubr.f32.gmra.mrb[88].mxu1 %v2305_v46  ;;  %v2327_v16 = vmax.f32 %v5640_v17, %v2263_v30  ;;  %v2267_v9 = vmul.f32 0.2, %v5654_v44  ;;  %v5719_v17 = vld [vmem:[%s5855_s6] ss:$0 sm:$0xff] }
 0x448   :  { %2531 = vmatprep.mubr.f32.mxu1 %v2308_v33  ;;  %v2330_v53 = vmax.f32 %v5643_v48, %v2266_v27  ;;  %v2329_v28 = vmax.f32 %v5646_v13, %v2265_v42  ;;  %v2332_v60 = vmax.f32 %v5650_v7, %v2268_v12 }
 0x449   :  { %v2331_v54 = vmax.f32 %v5654_v44, %v2267_v9 }
 0x44b   :  { %2532 = vmatmul.mubr.f32.gmra.mrb[90].mxu1 %v2307_v5 }
 0x44c   :  { %2536 = vmatprep.mubr.f32.mxu1 %v2310_v51 }
 0x44f   :  { %2537 = vmatmul.mubr.f32.gmra.mrb[92].mxu1 %v2309_v45 }
 0x450   :  { %2541 = vmatprep.mubr.f32.mxu1 %v2312_v55 }
 0x453   :  { %2542 = vmatmul.mubr.f32.gmra.mrb[94].mxu1 %v2311_v43 }
 0x454   :  { %2546 = vmatprep.mubr.f32.mxu1 %v2314_v8 }
 0x457   :  { %2547 = vmatmul.mubr.f32.gmra.mrb[96].mxu1 %v2313_v29 }
 0x458   :  { %2551 = vmatprep.mubr.f32.mxu1 %v2316_v40 }
 0x45b   :  { %2552 = vmatmul.mubr.f32.gmra.mrb[98].mxu1 %v2315_v34 }
 0x45c   :  { %2556 = vmatprep.mubr.f32.mxu1 %v2318_v22 }
 0x45f   :  { %2557 = vmatmul.mubr.f32.gmra.mrb[100].mxu1 %v2317_v26 }
 0x460   :  { %2561 = vmatprep.mubr.f32.mxu1 %v2320_v37 }
 0x463   :  { %2562 = vmatmul.mubr.f32.gmra.mrb[102].mxu1 %v2319_v4 }
 0x464   :  { %2566 = vmatprep.mubr.f32.mxu1 %v2322_v0 }
 0x467   :  { %2567 = vmatmul.mubr.f32.gmra.mrb[104].mxu1 %v2321_v41 }
 0x468   :  { %2571 = vmatprep.mubr.f32.mxu1 %v2324_v32 }
 0x46b   :  { %2572 = vmatmul.mubr.f32.gmra.mrb[106].mxu1 %v2323_v61 }
 0x46c   :  { %2576 = vmatprep.mubr.f32.mxu1 %v2326_v49 }
 0x46f   :  { %2577 = vmatmul.mubr.f32.gmra.mrb[108].mxu1 %v2325_v20 }
 0x470   :  { %2581 = vmatprep.mubr.f32.mxu1 %v2328_v24 }
 0x473   :  { %2582 = vmatmul.mubr.f32.gmra.mrb[110].mxu1 %v2327_v16 }
 0x474   :  { %2586 = vmatprep.mubr.f32.mxu1 %v2330_v53 }
 0x477   :  { %2587 = vmatmul.mubr.f32.gmra.mrb[112].mxu1 %v2329_v28 }
 0x478   :  { %2591 = vmatprep.mubr.f32.mxu1 %v2332_v60 }
 0x47b   :  { %2592 = vmatmul.mubr.f32.gmra.mrb[114].mxu1 %v2331_v54 }
 0x4e9   :  { %v2438_v48 = vpop.f32.mrb[128].mxu0 }
 0x4ea   :  { %v2439_v63 = vadd.f32 %v5719_v17, %v2438_v48  ;;  %v2468_v14 = vpop.f32.mrb[64].mxu1  ;;  %v2440_v59 = vpop.f32.mrb[129].mxu0 }
 0x4eb   :  { %v2469_v13 = vadd.f32 %v5719_v17, %v2468_v14  ;;  %v2470_v3 = vpop.f32.mrb[65].mxu1 }
 0x4ec   :  { %2939 = vtanh.f32 %v2439_v63 }
 0x4ed   :  { %2941 = vtanh.f32 %v2469_v13  ;;  %v2443_v7 = vpop.f32.mrb[130].mxu0 }
 0x4ee   :  { %v2444_v10 = vadd.f32 %v5719_v17, %v2443_v7  ;;  %v2473_v44 = vpop.f32.mrb[66].mxu1  ;;  %v2445_v1 = vpop.f32.mrb[131].mxu0 }
 0x4ef   :  { %v2474_v57 = vadd.f32 %v5719_v17, %v2473_v44  ;;  %v2475_v46 = vpop.f32.mrb[67].mxu1 }
 0x4f0   :  { %2943 = vtanh.f32 %v2444_v10 }
 0x4f1   :  { %2945 = vtanh.f32 %v2474_v57  ;;  %v2448_v39 = vpop.f32.mrb[132].mxu0 }
 0x4f2   :  { %v2449_v33 = vadd.f32 %v5719_v17, %v2448_v39  ;;  %v2478_v38 = vpop.f32.mrb[68].mxu1  ;;  %v2450_v5 = vpop.f32.mrb[133].mxu0 }
 0x4f3   :  { %v2479_v25 = vadd.f32 %v5719_v17, %v2478_v38  ;;  %v2480_v51 = vpop.f32.mrb[69].mxu1 }
 0x4f4   :  { %2947 = vtanh.f32 %v2449_v33 }
 0x4f5   :  { %2949 = vtanh.f32 %v2479_v25  ;;  %v2453_v15 = vpop.f32.mrb[134].mxu0 }
 0x4f6   :  { %v2940_v45 = vpop.eup %2939  ;;  %v2454_v36 = vadd.f32 %v5719_v17, %v2453_v15  ;;  %v2483_v55 = vpop.f32.mrb[70].mxu1 }
 0x4f7   :  { %v2455_v18 = vpop.f32.mrb[135].mxu0  ;;  %v2942_v43 = vpop.eup %2941  ;;  %2629 = vst [vmem:[%s5856_s7] sm:$0xff] %v2940_v45  ;;  %v2484_v62 = vadd.f32 %v5719_v17, %v2483_v55 }
 0x4f8   :  { %v2485_v8 = vpop.f32.mrb[71].mxu1  ;;  %2635 = vst [vmem:[%s5856_s7 + $0x30] sm:$0xff] %v2942_v43  ;;  %2951 = vtanh.f32 %v2454_v36 }
 0x4f9   :  { %2953 = vtanh.f32 %v2484_v62  ;;  %v2458_v21 = vpop.f32.mrb[136].mxu0 }
 0x4fa   :  { %v2944_v29 = vpop.eup %2943  ;;  %v2459_v50 = vadd.f32 %v5719_v17, %v2458_v21  ;;  %v2488_v40 = vpop.f32.mrb[72].mxu1 }
 0x4fb   :  { %v2460_v23 = vpop.f32.mrb[137].mxu0  ;;  %v2946_v34 = vpop.eup %2945  ;;  %2630 = vst [vmem:[%s5856_s7 + $0x8] sm:$0xff] %v2944_v29  ;;  %v2489_v31 = vadd.f32 %v5719_v17, %v2488_v40 }
 0x4fc   :  { %v2490_v22 = vpop.f32.mrb[73].mxu1  ;;  %2636 = vst [vmem:[%s5856_s7 + $0x38] sm:$0xff] %v2946_v34  ;;  %2955 = vtanh.f32 %v2459_v50 }
 0x4fd   :  { %2957 = vtanh.f32 %v2489_v31  ;;  %v2463_v35 = vpop.f32.mrb[138].mxu0 }
 0x4fe   :  { %v2948_v26 = vpop.eup %2947  ;;  %v2464_v52 = vadd.f32 %v5719_v17, %v2463_v35  ;;  %v2493_v37 = vpop.f32.mrb[74].mxu1 }
 0x4ff   :  { %v2465_v2 = vpop.f32.mrb[139].mxu0  ;;  %v2950_v4 = vpop.eup %2949  ;;  %2631 = vst [vmem:[%s5856_s7 + $0x10] sm:$0xff] %v2948_v26  ;;  %v2494_v19 = vadd.f32 %v5719_v17, %v2493_v37 }
 0x500   :  { %v2495_v0 = vpop.f32.mrb[75].mxu1  ;;  %2637 = vst [vmem:[%s5856_s7 + $0x40] sm:$0xff] %v2950_v4  ;;  %2959 = vtanh.f32 %v2464_v52 }
 0x501   :  { %2961 = vtanh.f32 %v2494_v19 }
 0x502   :  { %v2952_v47 = vpop.eup %2951  ;;  %v2498_v41 = vpop.f32.mrb[76].mxu1 }
 0x503   :  { %v2954_v11 = vpop.eup %2953  ;;  %2632 = vst [vmem:[%s5856_s7 + $0x18] sm:$0xff] %v2952_v47  ;;  %v2499_v32 = vadd.f32 %v5719_v17, %v2498_v41  ;;  %v2500_v56 = vpop.f32.mrb[77].mxu1 }
 0x504   :  { %2638 = vst [vmem:[%s5856_s7 + $0x48] sm:$0xff] %v2954_v11 }
 0x505   :  { %2963 = vtanh.f32 %v2499_v32 }
 0x506   :  { %v2956_v61 = vpop.eup %2955  ;;  %v2503_v6 = vpop.f32.mrb[78].mxu1 }
 0x507   :  { %v2958_v49 = vpop.eup %2957  ;;  %2633 = vst [vmem:[%s5856_s7 + $0x20] sm:$0xff] %v2956_v61  ;;  %v2504_v58 = vadd.f32 %v5719_v17, %v2503_v6  ;;  %v2505_v20 = vpop.f32.mrb[79].mxu1 }
 0x508   :  { %2639 = vst [vmem:[%s5856_s7 + $0x50] sm:$0xff] %v2958_v49 }
 0x509   :  { %2965 = vtanh.f32 %v2504_v58 }
 0x50a   :  { %v2960_v30 = vpop.eup %2959  ;;  %v2508_v24 = vpop.f32.mrb[80].mxu1 }
 0x50b   :  { %v2962_v27 = vpop.eup %2961  ;;  %2634 = vst [vmem:[%s5856_s7 + $0x28] sm:$0xff] %v2960_v30  ;;  %v2509_v16 = vadd.f32 %v5719_v17, %v2508_v24  ;;  %v2510_v42 = vpop.f32.mrb[81].mxu1 }
 0x50c   :  { %2640 = vst [vmem:[%s5856_s7 + $0x58] sm:$0xff] %v2962_v27 }
 0x50d   :  { %2967 = vtanh.f32 %v2509_v16 }
 0x50e   :  { %v2513_v53 = vpop.f32.mrb[82].mxu1 }
 0x50f   :  { %v2964_v12 = vpop.eup %2963  ;;  %v2514_v28 = vadd.f32 %v5719_v17, %v2513_v53  ;;  %v2515_v9 = vpop.f32.mrb[83].mxu1 }
 0x510   :  { %2641 = vst [vmem:[%s5856_s7 + $0x60] sm:$0xff] %v2964_v12 }
 0x511   :  { %2969 = vtanh.f32 %v2514_v28 }
 0x512   :  { %v2518_v60 = vpop.f32.mrb[84].mxu1 }
 0x513   :  { %v2966_v54 = vpop.eup %2965  ;;  %v2519_v48 = vadd.f32 %v5719_v17, %v2518_v60  ;;  %v2520_v63 = vpop.f32.mrb[85].mxu1 }
 0x514   :  { %2642 = vst [vmem:[%s5856_s7 + $0x68] sm:$0xff] %v2966_v54 }
 0x515   :  { %2971 = vtanh.f32 %v2519_v48 }
 0x516   :  { %v2523_v14 = vpop.f32.mrb[86].mxu1 }
 0x517   :  { %v2968_v59 = vpop.eup %2967  ;;  %v2524_v13 = vadd.f32 %v5719_v17, %v2523_v14  ;;  %v2525_v3 = vpop.f32.mrb[87].mxu1 }
 0x518   :  { %2643 = vst [vmem:[%s5856_s7 + $0x70] sm:$0xff] %v2968_v59 }
 0x519   :  { %2973 = vtanh.f32 %v2524_v13 }
 0x51a   :  { %v2528_v7 = vpop.f32.mrb[88].mxu1 }
 0x51b   :  { %v2970_v10 = vpop.eup %2969  ;;  %v2529_v44 = vadd.f32 %v5719_v17, %v2528_v7  ;;  %v2530_v1 = vpop.f32.mrb[89].mxu1 }
 0x51c   :  { %2644 = vst [vmem:[%s5856_s7 + $0x78] sm:$0xff] %v2970_v10 }
 0x51d   :  { %2975 = vtanh.f32 %v2529_v44 }
 0x51e   :  { %v2533_v57 = vpop.f32.mrb[90].mxu1 }
 0x51f   :  { %v2972_v46 = vpop.eup %2971  ;;  %v2534_v39 = vadd.f32 %v5719_v17, %v2533_v57  ;;  %v2535_v33 = vpop.f32.mrb[91].mxu1 }
 0x520   :  { %2645 = vst [vmem:[%s5856_s7 + $0x80] sm:$0xff] %v2972_v46 }
 0x521   :  { %2977 = vtanh.f32 %v2534_v39 }
 0x522   :  { %v2538_v38 = vpop.f32.mrb[92].mxu1 }
 0x523   :  { %v2974_v5 = vpop.eup %2973  ;;  %v2539_v25 = vadd.f32 %v5719_v17, %v2538_v38  ;;  %v2540_v51 = vpop.f32.mrb[93].mxu1 }
 0x524   :  { %2646 = vst [vmem:[%s5856_s7 + $0x88] sm:$0xff] %v2974_v5 }
 0x525   :  { %2979 = vtanh.f32 %v2539_v25 }
 0x526   :  { %v2543_v15 = vpop.f32.mrb[94].mxu1 }
 0x527   :  { %v2976_v45 = vpop.eup %2975  ;;  %v2544_v36 = vadd.f32 %v5719_v17, %v2543_v15  ;;  %v2545_v55 = vpop.f32.mrb[95].mxu1 }
 0x528   :  { %2647 = vst [vmem:[%s5856_s7 + $0x90] sm:$0xff] %v2976_v45 }
 0x529   :  { %2981 = vtanh.f32 %v2544_v36 }
 0x52a   :  { %v2548_v18 = vpop.f32.mrb[96].mxu1 }
 0x52b   :  { %v2978_v43 = vpop.eup %2977  ;;  %v2549_v62 = vadd.f32 %v5719_v17, %v2548_v18  ;;  %v2550_v8 = vpop.f32.mrb[97].mxu1 }
 0x52c   :  { %2648 = vst [vmem:[%s5856_s7 + $0x98] sm:$0xff] %v2978_v43 }
 0x52d   :  { %2983 = vtanh.f32 %v2549_v62 }
 0x52e   :  { %v2553_v21 = vpop.f32.mrb[98].mxu1 }
 0x52f   :  { %v2980_v29 = vpop.eup %2979  ;;  %v2554_v50 = vadd.f32 %v5719_v17, %v2553_v21  ;;  %v2555_v40 = vpop.f32.mrb[99].mxu1 }
 0x530   :  { %2649 = vst [vmem:[%s5856_s7 + $0xa0] sm:$0xff] %v2980_v29 }
 0x531   :  { %2985 = vtanh.f32 %v2554_v50 }
 0x532   :  { %v2558_v23 = vpop.f32.mrb[100].mxu1 }
 0x533   :  { %v2982_v34 = vpop.eup %2981  ;;  %v2559_v31 = vadd.f32 %v5719_v17, %v2558_v23  ;;  %v2560_v22 = vpop.f32.mrb[101].mxu1 }
 0x534   :  { %2650 = vst [vmem:[%s5856_s7 + $0xa8] sm:$0xff] %v2982_v34 }
 0x535   :  { %2987 = vtanh.f32 %v2559_v31 }
 0x536   :  { %v2563_v35 = vpop.f32.mrb[102].mxu1 }
 0x537   :  { %v2984_v26 = vpop.eup %2983  ;;  %v2564_v52 = vadd.f32 %v5719_v17, %v2563_v35  ;;  %v2565_v37 = vpop.f32.mrb[103].mxu1 }
 0x538   :  { %2651 = vst [vmem:[%s5856_s7 + $0xb0] sm:$0xff] %v2984_v26 }
 0x539   :  { %2989 = vtanh.f32 %v2564_v52 }
 0x53a   :  { %v2568_v2 = vpop.f32.mrb[104].mxu1 }
 0x53b   :  { %v2986_v4 = vpop.eup %2985  ;;  %v2569_v19 = vadd.f32 %v5719_v17, %v2568_v2  ;;  %v2570_v0 = vpop.f32.mrb[105].mxu1 }
 0x53c   :  { %2652 = vst [vmem:[%s5856_s7 + $0xb8] sm:$0xff] %v2986_v4 }
 0x53d   :  { %2991 = vtanh.f32 %v2569_v19 }
 0x53e   :  { %v2573_v47 = vpop.f32.mrb[106].mxu1 }
 0x53f   :  { %v2988_v41 = vpop.eup %2987  ;;  %v2574_v11 = vadd.f32 %v5719_v17, %v2573_v47  ;;  %v2575_v32 = vpop.f32.mrb[107].mxu1 }
 0x540   :  { %2653 = vst [vmem:[%s5856_s7 + $0xc0] sm:$0xff] %v2988_v41 }
 0x541   :  { %2993 = vtanh.f32 %v2574_v11 }
 0x542   :  { %v2578_v56 = vpop.f32.mrb[108].mxu1 }
 0x543   :  { %v2990_v61 = vpop.eup %2989  ;;  %v2579_v6 = vadd.f32 %v5719_v17, %v2578_v56  ;;  %v2580_v49 = vpop.f32.mrb[109].mxu1 }
 0x544   :  { %2654 = vst [vmem:[%s5856_s7 + $0xc8] sm:$0xff] %v2990_v61 }
 0x545   :  { %2995 = vtanh.f32 %v2579_v6 }
 0x546   :  { %v2583_v58 = vpop.f32.mrb[110].mxu1 }
 0x547   :  { %v2992_v20 = vpop.eup %2991  ;;  %v2584_v30 = vadd.f32 %v5719_v17, %v2583_v58  ;;  %v2585_v24 = vpop.f32.mrb[111].mxu1 }
 0x548   :  { %2655 = vst [vmem:[%s5856_s7 + $0xd0] sm:$0xff] %v2992_v20 }
 0x549   :  { %2997 = vtanh.f32 %v2584_v30 }
 0x54a   :  { %v2588_v27 = vpop.f32.mrb[112].mxu1 }
 0x54b   :  { %v2994_v16 = vpop.eup %2993  ;;  %v2589_v42 = vadd.f32 %v5719_v17, %v2588_v27  ;;  %v2590_v53 = vpop.f32.mrb[113].mxu1 }
 0x54c   :  { %2656 = vst [vmem:[%s5856_s7 + $0xd8] sm:$0xff] %v2994_v16 }
 0x54d   :  { %2999 = vtanh.f32 %v2589_v42 }
 0x54e   :  { %v2593_v12 = vpop.f32.mrb[114].mxu1 }
 0x54f   :  { %v2996_v28 = vpop.eup %2995  ;;  %v2594_v9 = vadd.f32 %v5719_v17, %v2593_v12  ;;  %v2595_v60 = vpop.f32.mrb[115].mxu1 }
 0x550   :  { %2657 = vst [vmem:[%s5856_s7 + $0xe0] sm:$0xff] %v2996_v28 }
 0x551   :  { %3001 = vtanh.f32 %v2594_v9 }
 0x553   :  { %v2998_v54 = vpop.eup %2997 }
 0x554   :  { %2658 = vst [vmem:[%s5856_s7 + $0xe8] sm:$0xff] %v2998_v54 }
 0x557   :  { %v3000_v48 = vpop.eup %2999 }
 0x558   :  { %2659 = vst [vmem:[%s5856_s7 + $0xf0] sm:$0xff] %v3000_v48 }
 0x55b   :  { %v3002_v63 = vpop.eup %3001 }
 0x55c   :  { %2660 = vst [vmem:[%s5856_s7 + $0xf8] sm:$0xff] %v3002_v63 }

</bundles_post_ra>
